<compile_context>
chip_gen: v6e
topology: v6e:2x2x1
jax: 0.10.0
libtpu: 0.0.40
codegen_flags: <defaults>
</compile_context>

<pallas_src>
import functools
import math

import jax
import jax.numpy as jnp
from jax.experimental import pallas as pl
from jax.experimental.pallas import tpu as pltpu


def _round_up(x, m):
    return (x + m - 1) // m * m


def _vmem_limit(need_bytes):
    # explicit scoped-VMEM budget (defaults are 16/32 MiB); cap at v7x's 64 MiB.
    return int(min(64 << 20, max(int(need_bytes), 16 << 20)))


def _const_block_spec(block_shape, index_map):
    """Constant-across-grid operand: single-buffer it when this JAX supports
    pipeline_mode (halves the resident weight footprint; matters on v7x's 64 MiB)."""
    try:
        return pl.BlockSpec(block_shape, index_map, pipeline_mode=pl.Buffered(1))
    except (AttributeError, TypeError):
        return pl.BlockSpec(block_shape, index_map)


# ------------------------------------------------------- fused Mix + channel concat
def _mix_fuse_kernel(sig_ref, ai_ref, bi_ref, ak_ref, bk_ref, xi_ref, xk_ref, o_ref,
                     *, f_img, f_ksp):
    """sig*A + (1-sig)*B for both Mix modules, written together with the passthrough
    inputs straight into the fused conv-input channel layout (bf16)."""
    si = sig_ref[0]                                   # SMEM scalars
    sk = sig_ref[1]
    bi = bi_ref[...]
    bk = bk_ref[...]
    # sig*A + (1-sig)*B == B + sig*(A-B)  (one fewer VPU multiply per element)
    o_ref[:, 0:f_img] = (bi + si * (ai_ref[...] - bi)).astype(o_ref.dtype)
    o_ref[:, f_img:f_img + f_ksp] = (bk + sk * (ak_ref[...] - bk)).astype(o_ref.dtype)
    o_ref[:, f_img + f_ksp:2 * f_img + f_ksp] = xi_ref[...].astype(o_ref.dtype)
    o_ref[:, 2 * f_img + f_ksp:] = xk_ref[...].astype(o_ref.dtype)


def fused_mix_concat(img_in, freq_in_as_img, freq_in, img_in_as_freq,
                     inputs_img, inputs_kspace, mix_img, mix_freq):
    """Both Mix modules + the channel concat with the passthrough inputs in a single
    pallas_call.  Returns the bf16 fused conv input (B, D, H, W, 2*f_img + 2*f_ksp)
    with channel order [img_feat | k_feat | inputs_img | inputs_kspace]."""
    b, d, h, w, f_img = img_in.shape
    f_ksp = freq_in.shape[-1]
    c_f = 2 * (f_img + f_ksp)
    rows = b * d * h * w

    def flat(x):  # contiguous collapse of the leading dims -> free metadata reshape
        return x.reshape(rows, x.shape[-1]).astype(jnp.float32)

    tile_r = rows
    for cand in (1024, 512, 256, 64, 8):              # big tiles amortize per-step cost
        if rows % cand == 0 and rows // cand >= 2:
            tile_r = cand
            break

    sig = jax.nn.sigmoid(
        jnp.stack([mix_img.reshape(()), mix_freq.reshape(())]).astype(jnp.float32))

    bytes_per_row = 4 * 3 * (f_img + f_ksp) + 2 * c_f      # f32 inputs + bf16 output
    need = 2 * tile_r * bytes_per_row + (1 << 20)

    out = pl.pallas_call(
        functools.partial(_mix_fuse_kernel, f_img=f_img, f_ksp=f_ksp),
        out_shape=jax.ShapeDtypeStruct((rows, c_f), jnp.bfloat16),
        grid=(rows // tile_r,),
        in_specs=[
            pl.BlockSpec(memory_space=pltpu.MemorySpace.SMEM),          # sigmoids (2,)
            pl.BlockSpec((tile_r, f_img), lambda r: (r, 0)),            # img_in
            pl.BlockSpec((tile_r, f_img), lambda r: (r, 0)),            # freq_in_as_img
            pl.BlockSpec((tile_r, f_ksp), lambda r: (r, 0)),            # freq_in
            pl.BlockSpec((tile_r, f_ksp), lambda r: (r, 0)),            # img_in_as_freq
            pl.BlockSpec((tile_r, f_img), lambda r: (r, 0)),            # inputs_img
            pl.BlockSpec((tile_r, f_ksp), lambda r: (r, 0)),            # inputs_kspace
        ],
        out_specs=pl.BlockSpec((tile_r, c_f), lambda r: (r, 0)),
        compiler_params=pltpu.CompilerParams(
            dimension_semantics=("parallel",),
            vmem_limit_bytes=_vmem_limit(need)),
    )(sig, flat(img_in), flat(freq_in_as_img), flat(freq_in), flat(img_in_as_freq),
      flat(inputs_img), flat(inputs_kspace))

    return out.reshape(b, d, h, w, c_f)


# -------------------------------------------------- fused dual-branch BatchNormConv
def _fused_conv_kernel(x_ref, t_ref, bias_ref, mask_ref, o_ref, *, k, d_out, h_out):
    """One batch element: 'same' Conv3d for both branches + their nonlinearities.

    x_ref   : (D+2p, H+2p, (W+2p)*Cin)  bf16   padded fused input volume
    t_ref   : (k*k, (W+2p)*Cin, W*cp)   bf16   kw taps + W padding folded (Toeplitz)
    bias_ref: (1, W*cp)                 f32
    mask_ref: (1, W*cp)                 f32    1 -> relu (img), 0 -> 3-piece (kspace)
    o_ref   : (D*H, W*cp)               f32
    """
    lanes = x_ref.shape[-1]
    dp = d_out + k - 1
    x = x_ref[...]                                    # already bf16, no per-tap cast
    # Hoisted kh-shifted row-flattened views: the only sublane-misaligned copies are
    # these k slices, built once per grid step (not once per tap).
    xs = [x[:, kh:kh + h_out, :].reshape(dp * h_out, lanes) for kh in range(k)]

    acc = jnp.zeros(o_ref.shape, jnp.float32)
    for kd in range(k):
        r0 = kd * h_out                               # sublane-aligned when H % 8 == 0
        for kh in range(k):
            acc += jnp.dot(xs[kh][r0:r0 + d_out * h_out, :],      # M = D*H rows
                           t_ref[kd * k + kh],
                           preferred_element_type=jnp.float32)

    acc = acc + bias_ref[...]
    relu = jnp.maximum(acc, 0.0)
    pw = (acc + jnp.maximum(0.5 * (acc - 1.0), 0.0)
          + jnp.maximum(0.5 * (-1.0 - acc), 0.0))     # x + relu((x-1)/2) + relu((-1-x)/2)
    o_ref[...] = jnp.where(mask_ref[...] > 0.5, relu, pw)


def _build_conv_operands(w_img, b_img, w_k, b_k, w_len, cp, c_in, img_cin, k_cin):
    """Block-diagonal (img|kspace) per-tap weights folded into a W block-Toeplitz
    contraction matrix T[kd,kh] : ((W+2p)*Cin, W*cp), plus tiled bias and a static
    relu-vs-3-piece selector row."""
    co_i, k = w_img.shape[0], w_img.shape[2]
    co_k = w_k.shape[0]
    pad = k // 2
    wp = w_len + 2 * pad

    # torch weight (Cout, Cin, kd, kh, kw) -> (kd, kh, kw, Cin_fused, cp); the two
    # branches' input channels are scattered to their fused positions and output
    # channels are zero-padded to cp (cross-correlation, like torch Conv3d).
    wt = jnp.zeros((k, k, k, c_in, cp), jnp.float32)
    w_img_t = jnp.transpose(w_img, (2, 3, 4, 1, 0)).astype(jnp.float32)
    for j, cf in enumerate(img_cin):
        wt = wt.at[:, :, :, cf, :co_i].set(w_img_t[:, :, :, j, :])
    w_k_t = jnp.transpose(w_k, (2, 3, 4, 1, 0)).astype(jnp.float32)
    for j, cf in enumerate(k_cin):
        wt = wt.at[:, :, :, cf, co_i:co_i + co_k].set(w_k_t[:, :, :, j, :])

    t = jnp.zeros((k, k, wp * c_in, w_len * cp), jnp.float32)
    for w_out in range(w_len):
        for kw in range(k):
            w_in = w_out + kw                 # padded input column for this tap
            t = t.at[:, :, w_in * c_in:(w_in + 1) * c_in,
                     w_out * cp:(w_out + 1) * cp].set(wt[:, :, kw])
    t = t.reshape(k * k, wp * c_in, w_len * cp).astype(jnp.bfloat16)

    bias = jnp.zeros((cp,), jnp.float32)
    bias = bias.at[:co_i].set(b_img.astype(jnp.float32))
    bias = bias.at[co_i:co_i + co_k].set(b_k.astype(jnp.float32))
    bias = jnp.tile(bias, (w_len,)).reshape(1, w_len * cp)

    # precomputed nonlinearity selector (replaces per-step iota + mod in the kernel)
    is_img = (jnp.arange(cp) < co_i).astype(jnp.float32)
    is_img = jnp.tile(is_img, (w_len,)).reshape(1, w_len * cp)
    return t, bias, is_img


def fused_bnconv3d(x_fused, w_img, b_img, w_k, b_k, img_cin, k_cin):
    """Conv3d('same') + nonlinearity for BOTH branches in one gridded Pallas kernel.

    x_fused: (B, D, H, W, Cin_fused); img_cin / k_cin give each branch's input-channel
    positions inside the fused channel axis.  Returns (img_out, k_out).
    """
    bsz, d_len, h_len, w_len, c_in = x_fused.shape
    co_i, k = w_img.shape[0], w_img.shape[2]
    co_k = w_k.shape[0]
    assert len(img_cin) == w_img.shape[1] and len(k_cin) == w_k.shape[1]
    c_out = co_i + co_k
    pad = k // 2

    # pad output channels so W*cp is a multiple of 128 (unmasked lane-dense stores)
    lane_step = 128 // math.gcd(w_len, 128)
    cp = _round_up(c_out, lane_step)
    n_out = w_len * cp

    t_mat, bias_row, mask_row = _build_conv_operands(
        w_img, b_img, w_k, b_k, w_len, cp, c_in, img_cin, k_cin)

    # 'same' spatial padding (bf16: half the DMA bytes) + fold (W, Cin) into the lane
    # axis; no 27x im2col tensor is ever materialized in HBM.
    xp = jnp.pad(x_fused.astype(jnp.bfloat16),
                 ((0, 0), (pad, pad), (pad, pad), (pad, pad), (0, 0)))
    dp, hp = d_len + 2 * pad, h_len + 2 * pad
    lanes = (w_len + 2 * pad) * c_in
    xp = xp.reshape(bsz, dp, hp, lanes)

    # per-step VMEM budget: haloed input slab (x2 buffers), Toeplitz, bias/mask, output
    need = (2 * dp * hp * lanes * 2 + 2 * t_mat.size * 2
            + 2 * d_len * h_len * n_out * 4 + 4 * n_out * 4 + (1 << 20))

    # TODO(synk): for volumes where one padded (D,H,W) slab no longer fits VMEM, add a
    # halo'd D-tile (and W-tile) grid axis instead of processing a whole batch element
    # per step; with the demo sizes one batch element per step already gives M = D*H.
    out = pl.pallas_call(
        functools.partial(_fused_conv_kernel, k=k, d_out=d_len, h_out=h_len),
        out_shape=jax.ShapeDtypeStruct((bsz, d_len * h_len, n_out), jnp.float32),
        grid=(bsz,),
        in_specs=[
            pl.BlockSpec((None, dp, hp, lanes), lambda b: (b, 0, 0, 0)),
            _const_block_spec((k * k, lanes, n_out), lambda b: (0, 0, 0)),
            _const_block_spec((1, n_out), lambda b: (0, 0)),
            _const_block_spec((1, n_out), lambda b: (0, 0)),
        ],
        out_specs=pl.BlockSpec((None, d_len * h_len, n_out), lambda b: (b, 0, 0)),
        compiler_params=pltpu.CompilerParams(
            dimension_semantics=("parallel",),           # batch axis -> megacore shard
            vmem_limit_bytes=_vmem_limit(need)),
    )(xp, t_mat, bias_row, mask_row)

    out = out.reshape(bsz, d_len, h_len, w_len, cp)
    return out[..., :co_i], out[..., co_i:co_i + co_k]


# ------------------------------------------------------------ domain transforms (glue)
def _complexify(x):
    b, d, h, w, c = x.shape
    xr = x.reshape(b, d, h, w, c // 2, 2)
    return xr[..., 0] + 1j * xr[..., 1]


def _decomplexify(z):
    out = jnp.stack([jnp.real(z), jnp.imag(z)], axis=-1)
    return out.reshape(z.shape[:-1] + (2 * z.shape[-1],))


# TODO(synk): torch_reco_img_to_kspace / torch_reco_kspace_to_img are not defined in
# the reference source; simplified centered-FFT transforms (hamming_grid / homCorr
# applied, sense/perm/phase_coil/use_cc coil combination omitted) stand in for them.
def img_to_kspace(img, hamming_grid, homCorr):
    z = _complexify(img) * homCorr[None, :, :, :, None]
    ksp = jnp.fft.fftn(z, axes=(1, 2, 3)) * hamming_grid[None, :, :, :, None]
    return _decomplexify(ksp).astype(jnp.float32)


def kspace_to_img(freq, hamming_grid, homCorr):
    z = _complexify(freq) * hamming_grid[None, :, :, :, None]
    im = jnp.fft.ifftn(z, axes=(1, 2, 3)) * homCorr[None, :, :, :, None]
    return _decomplexify(im).astype(jnp.float32)


# --------------------------------------------------------------------- Interlacer fwd
def interlacer_forward(params, img_in, freq_in, inputs_img, inputs_kspace,
                       hamming_grid, sense, perm, phase_coil, homCorr,
                       kernel_size=3, num_convs=1):
    del sense, perm, phase_coil, kernel_size  # consumed only by the undefined reco fns

    img_in_as_freq = img_to_kspace(img_in, hamming_grid, homCorr)
    freq_in_as_img = kspace_to_img(freq_in, hamming_grid, homCorr)

    f_img = img_in.shape[-1]
    f_ksp = freq_in.shape[-1]

    # both Mix modules + the concat with the passthrough inputs: one Pallas call,
    # output already in the fused channel order [img_feat | k_feat | in_img | in_ksp]
    fused = fused_mix_concat(img_in, freq_in_as_img, freq_in, img_in_as_freq,
                             inputs_img, inputs_kspace,
                             params["img_mix"], params["freq_mix"])

    img_feat = k_feat = None
    for i in range(num_convs):
        ci_img = params["img_w"][i].shape[1]
        ci_k = params["k_w"][i].shape[1]
        if i == 0:
            img_cin = (tuple(range(f_img))
                       + tuple(range(f_img + f_ksp, 2 * f_img + f_ksp)))
            k_cin = (tuple(range(f_img, f_img + f_ksp))
                     + tuple(range(2 * f_img + f_ksp, 2 * (f_img + f_ksp))))
        else:
            img_cin = tuple(range(ci_img))
            k_cin = tuple(range(ci_img, ci_img + ci_k))
        img_feat, k_feat = fused_bnconv3d(fused, params["img_w"][i], params["img_b"][i],
                                          params["k_w"][i], params["k_b"][i],
                                          img_cin, k_cin)
        if i + 1 < num_convs:
            fused = jnp.concatenate([img_feat, k_feat], axis=-1)
    return img_feat, k_feat


# ------------------------------------------------------------------------------- main
def _init_params(key, features_img, features_kspace, kernel_size, num_convs):
    ks = jax.random.split(key, 2 + 4 * num_convs)
    params = {
        "img_mix": jax.random.uniform(ks[0], (1,), jnp.float32),
        "freq_mix": jax.random.uniform(ks[1], (1,), jnp.float32),
        "img_w": [], "img_b": [], "k_w": [], "k_b": [],
    }
    kk = kernel_size
    for i in range(num_convs):
        cin_i = features_img * 2 if i == 0 else features_img
        cin_k = features_kspace * 2 if i == 0 else features_kspace
        base = 2 + 4 * i
        params["img_w"].append(0.1 * jax.random.normal(
            ks[base + 0], (features_img, cin_i, kk, kk, kk), jnp.float32))
        params["img_b"].append(0.01 * jax.random.normal(
            ks[base + 1], (features_img,), jnp.float32))
        params["k_w"].append(0.1 * jax.random.normal(
            ks[base + 2], (features_kspace, cin_k, kk, kk, kk), jnp.float32))
        params["k_b"].append(0.01 * jax.random.normal(
            ks[base + 3], (features_kspace,), jnp.float32))
    return params


if __name__ == "__main__":
    key = jax.random.PRNGKey(0)
    B, D, H, W = 2, 8, 8, 8
    F_IMG = 4          # features_img  (2 complex features as real/imag pairs)
    F_KSP = 4          # features_kspace
    K = 3              # kernel_size
    N_COILS = 4

    k_in = jax.random.split(key, 9)
    img_in = jax.random.normal(k_in[0], (B, D, H, W, F_IMG), jnp.float32)
    freq_in = jax.random.normal(k_in[1], (B, D, H, W, F_KSP), jnp.float32)
    inputs_img = jax.random.normal(k_in[2], (B, D, H, W, F_IMG), jnp.float32)
    inputs_kspace = jax.random.normal(k_in[3], (B, D, H, W, F_KSP), jnp.float32)
    hamming_grid = 0.5 + 0.5 * jax.random.uniform(k_in[4], (D, H, W), jnp.float32)
    homCorr = 0.5 + 0.5 * jax.random.uniform(k_in[5], (D, H, W), jnp.float32)
    sense = jax.random.normal(k_in[6], (D, H, W, B, N_COILS), jnp.float32)
    perm = jnp.arange(B, dtype=jnp.int32)
    phase_coil = jax.random.normal(k_in[7], (B, N_COILS), jnp.float32)

    params = _init_params(k_in[8], F_IMG, F_KSP, K, num_convs=1)

    forward = jax.jit(functools.partial(interlacer_forward,
                                        kernel_size=K, num_convs=1))
    img_out, k_out = forward(params, img_in, freq_in, inputs_img, inputs_kspace,
                             hamming_grid, sense, perm, phase_coil, homCorr)

    jax.block_until_ready((img_out, k_out))
    assert img_out.shape == (B, D, H, W, F_IMG)
    assert k_out.shape == (B, D, H, W, F_KSP)
    print("KERNEL_OK")
</pallas_src>

<mosaic_0001>
module attributes {stable_mosaic.version = 11 : i64} {
  func.func @_mix_fuse_kernel(%arg0: i32, %arg1: memref<2xf32, #tpu.memory_space<smem>>, %arg2: memref<512x4xf32, #tpu.memory_space<vmem>>, %arg3: memref<512x4xf32, #tpu.memory_space<vmem>>, %arg4: memref<512x4xf32, #tpu.memory_space<vmem>>, %arg5: memref<512x4xf32, #tpu.memory_space<vmem>>, %arg6: memref<512x4xf32, #tpu.memory_space<vmem>>, %arg7: memref<512x4xf32, #tpu.memory_space<vmem>>, %arg8: memref<512x16xbf16, #tpu.memory_space<vmem>>) attributes {dimension_semantics = [#tpu.dimension_semantics<parallel>], iteration_bounds = array<i64: 2>, scalar_prefetch = 0 : i64, scratch_operands = 0 : i64, tpu.core_type = #tpu.core_type<tc>, window_params = [{transform_indices = @transform_0, window_bounds = array<i64: 2>}, {transform_indices = @transform_1, window_bounds = array<i64: 512, 4>}, {transform_indices = @transform_2, window_bounds = array<i64: 512, 4>}, {transform_indices = @transform_3, window_bounds = array<i64: 512, 4>}, {transform_indices = @transform_4, window_bounds = array<i64: 512, 4>}, {transform_indices = @transform_5, window_bounds = array<i64: 512, 4>}, {transform_indices = @transform_6, window_bounds = array<i64: 512, 4>}, {transform_indices = @transform_7, window_bounds = array<i64: 512, 16>}]} {
    %c0 = arith.constant 0 : index
    %0 = memref.load %arg1[%c0] : memref<2xf32, #tpu.memory_space<smem>>
    %c1 = arith.constant 1 : index
    %1 = memref.load %arg1[%c1] : memref<2xf32, #tpu.memory_space<smem>>
    %c0_0 = arith.constant 0 : index
    %c0_1 = arith.constant 0 : index
    %2 = vector.load %arg3[%c0_0, %c0_1] : memref<512x4xf32, #tpu.memory_space<vmem>>, vector<512x4xf32>
    %c0_2 = arith.constant 0 : index
    %c0_3 = arith.constant 0 : index
    %3 = vector.load %arg5[%c0_2, %c0_3] : memref<512x4xf32, #tpu.memory_space<vmem>>, vector<512x4xf32>
    %c0_4 = arith.constant 0 : index
    %c0_5 = arith.constant 0 : index
    %4 = vector.load %arg2[%c0_4, %c0_5] : memref<512x4xf32, #tpu.memory_space<vmem>>, vector<512x4xf32>
    %5 = arith.subf %4, %2 : vector<512x4xf32>
    %6 = vector.broadcast %0 : f32 to vector<512x4xf32>
    %7 = arith.mulf %6, %5 : vector<512x4xf32>
    %8 = arith.addf %2, %7 : vector<512x4xf32>
    %9 = arith.truncf %8 : vector<512x4xf32> to vector<512x4xbf16>
    %c0_6 = arith.constant 0 : index
    %c0_7 = arith.constant 0 : index
    %10 = vector.load %arg8[%c0_6, %c0_7] : memref<512x16xbf16, #tpu.memory_space<vmem>>, vector<512x4xbf16>
    tpu.vector_store %arg8[%c0_6, %c0_7], %9 {strides = array<i32>} : memref<512x16xbf16, #tpu.memory_space<vmem>>, vector<512x4xbf16>,
    %c0_8 = arith.constant 0 : index
    %c0_9 = arith.constant 0 : index
    %11 = vector.load %arg4[%c0_8, %c0_9] : memref<512x4xf32, #tpu.memory_space<vmem>>, vector<512x4xf32>
    %12 = arith.subf %11, %3 : vector<512x4xf32>
    %13 = vector.broadcast %1 : f32 to vector<512x4xf32>
    %14 = arith.mulf %13, %12 : vector<512x4xf32>
    %15 = arith.addf %3, %14 : vector<512x4xf32>
    %16 = arith.truncf %15 : vector<512x4xf32> to vector<512x4xbf16>
    %c0_10 = arith.constant 0 : index
    %c4 = arith.constant 4 : index
    %17 = vector.load %arg8[%c0_10, %c4] : memref<512x16xbf16, #tpu.memory_space<vmem>>, vector<512x4xbf16>
    tpu.vector_store %arg8[%c0_10, %c4], %16 {strides = array<i32>} : memref<512x16xbf16, #tpu.memory_space<vmem>>, vector<512x4xbf16>,
    %c0_11 = arith.constant 0 : index
    %c0_12 = arith.constant 0 : index
    %18 = vector.load %arg6[%c0_11, %c0_12] : memref<512x4xf32, #tpu.memory_space<vmem>>, vector<512x4xf32>
    %19 = arith.truncf %18 : vector<512x4xf32> to vector<512x4xbf16>
    %c0_13 = arith.constant 0 : index
    %c8 = arith.constant 8 : index
    %20 = vector.load %arg8[%c0_13, %c8] : memref<512x16xbf16, #tpu.memory_space<vmem>>, vector<512x4xbf16>
    tpu.vector_store %arg8[%c0_13, %c8], %19 {strides = array<i32>} : memref<512x16xbf16, #tpu.memory_space<vmem>>, vector<512x4xbf16>,
    %c0_14 = arith.constant 0 : index
    %c0_15 = arith.constant 0 : index
    %21 = vector.load %arg7[%c0_14, %c0_15] : memref<512x4xf32, #tpu.memory_space<vmem>>, vector<512x4xf32>
    %22 = arith.truncf %21 : vector<512x4xf32> to vector<512x4xbf16>
    %c0_16 = arith.constant 0 : index
    %c12 = arith.constant 12 : index
    %23 = vector.load %arg8[%c0_16, %c12] : memref<512x16xbf16, #tpu.memory_space<vmem>>, vector<512x4xbf16>
    tpu.vector_store %arg8[%c0_16, %c12], %22 {strides = array<i32>} : memref<512x16xbf16, #tpu.memory_space<vmem>>, vector<512x4xbf16>,
    return
  }
  func.func @transform_0(%arg0: i32) -> i32 {
    %c0_i32 = arith.constant 0 : i32
    %c0_i32_0 = arith.constant 0 : i32
    return %c0_i32 : i32
  }
  func.func @transform_1(%arg0: i32) -> (i32, i32) {
    %c0_i32 = arith.constant 0 : i32
    %c0_i32_0 = arith.constant 0 : i32
    return %arg0, %c0_i32 : i32, i32
  }
  func.func @transform_2(%arg0: i32) -> (i32, i32) {
    %c0_i32 = arith.constant 0 : i32
    %c0_i32_0 = arith.constant 0 : i32
    return %arg0, %c0_i32 : i32, i32
  }
  func.func @transform_3(%arg0: i32) -> (i32, i32) {
    %c0_i32 = arith.constant 0 : i32
    %c0_i32_0 = arith.constant 0 : i32
    return %arg0, %c0_i32 : i32, i32
  }
  func.func @transform_4(%arg0: i32) -> (i32, i32) {
    %c0_i32 = arith.constant 0 : i32
    %c0_i32_0 = arith.constant 0 : i32
    return %arg0, %c0_i32 : i32, i32
  }
  func.func @transform_5(%arg0: i32) -> (i32, i32) {
    %c0_i32 = arith.constant 0 : i32
    %c0_i32_0 = arith.constant 0 : i32
    return %arg0, %c0_i32 : i32, i32
  }
  func.func @transform_6(%arg0: i32) -> (i32, i32) {
    %c0_i32 = arith.constant 0 : i32
    %c0_i32_0 = arith.constant 0 : i32
    return %arg0, %c0_i32 : i32, i32
  }
  func.func @transform_7(%arg0: i32) -> (i32, i32) {
    %c0_i32 = arith.constant 0 : i32
    %c0_i32_0 = arith.constant 0 : i32
    return %arg0, %c0_i32 : i32, i32
  }
}

module attributes {stable_mosaic.version = 11 : i64} {
  func.func @_fused_conv_kernel(%arg0: i32, %arg1: memref<1x10x10x160xbf16, #tpu.memory_space<vmem>>, %arg2: memref<9x160x128xbf16, #tpu.memory_space<vmem>>, %arg3: memref<1x128xf32, #tpu.memory_space<vmem>>, %arg4: memref<1x128xf32, #tpu.memory_space<vmem>>, %arg5: memref<1x64x128xf32, #tpu.memory_space<vmem>>) attributes {dimension_semantics = [#tpu.dimension_semantics<parallel>], iteration_bounds = array<i64: 2>, scalar_prefetch = 0 : i64, scratch_operands = 0 : i64, tpu.core_type = #tpu.core_type<tc>, window_params = [{transform_indices = @transform_0, window_bounds = array<i64: 1, 10, 10, 160>}, {pipeline_mode = #tpu.pipeline_mode<synchronous>, transform_indices = @transform_1, window_bounds = array<i64: 9, 160, 128>}, {pipeline_mode = #tpu.pipeline_mode<synchronous>, transform_indices = @transform_2, window_bounds = array<i64: 1, 128>}, {pipeline_mode = #tpu.pipeline_mode<synchronous>, transform_indices = @transform_3, window_bounds = array<i64: 1, 128>}, {transform_indices = @transform_4, window_bounds = array<i64: 1, 64, 128>}]} {
    %c0 = arith.constant 0 : index
    %c0_0 = arith.constant 0 : index
    %c0_1 = arith.constant 0 : index
    %c0_2 = arith.constant 0 : index
    %0 = vector.load %arg1[%c0, %c0_0, %c0_1, %c0_2] : memref<1x10x10x160xbf16, #tpu.memory_space<vmem>>, vector<1x10x10x160xbf16>
    %1 = vector.shape_cast %0 : vector<1x10x10x160xbf16> to vector<10x10x160xbf16>
    %2 = vector.extract_strided_slice %1 {offsets = [0, 0, 0], sizes = [10, 8, 160], strides = [1, 1, 1]} : vector<10x10x160xbf16> to vector<10x8x160xbf16>
    %3 = vector.shape_cast %2 : vector<10x8x160xbf16> to vector<80x160xbf16>
    %4 = vector.extract_strided_slice %1 {offsets = [0, 1, 0], sizes = [10, 8, 160], strides = [1, 1, 1]} : vector<10x10x160xbf16> to vector<10x8x160xbf16>
    %5 = vector.shape_cast %4 : vector<10x8x160xbf16> to vector<80x160xbf16>
    %6 = vector.extract_strided_slice %1 {offsets = [0, 2, 0], sizes = [10, 8, 160], strides = [1, 1, 1]} : vector<10x10x160xbf16> to vector<10x8x160xbf16>
    %7 = vector.shape_cast %6 : vector<10x8x160xbf16> to vector<80x160xbf16>
    %cst = arith.constant 0.000000e+00 : f32
    %8 = vector.broadcast %cst : f32 to vector<64x128xf32>
    %9 = vector.extract_strided_slice %3 {offsets = [0, 0], sizes = [64, 160], strides = [1, 1]} : vector<80x160xbf16> to vector<64x160xbf16>
    %c0_3 = arith.constant 0 : index
    %c0_4 = arith.constant 0 : index
    %c0_5 = arith.constant 0 : index
    %10 = vector.load %arg2[%c0_3, %c0_4, %c0_5] : memref<9x160x128xbf16, #tpu.memory_space<vmem>>, vector<1x160x128xbf16>
    %11 = vector.shape_cast %10 : vector<1x160x128xbf16> to vector<160x128xbf16>
    %cst_6 = arith.constant dense<0.000000e+00> : vector<64x128xf32>
    %12 = tpu.matmul %9, %11, %cst_6 {dimension_numbers = #tpu.dot_dimension_numbers<[1], [0], [0], [1], [0, 0, 1, 1], [], []>} : vector<64x160xbf16>, vector<160x128xbf16>, vector<64x128xf32> -> vector<64x128xf32>
    %13 = arith.addf %8, %12 : vector<64x128xf32>
    %14 = vector.extract_strided_slice %5 {offsets = [0, 0], sizes = [64, 160], strides = [1, 1]} : vector<80x160xbf16> to vector<64x160xbf16>
    %c1 = arith.constant 1 : index
    %c0_7 = arith.constant 0 : index
    %c0_8 = arith.constant 0 : index
    %15 = vector.load %arg2[%c1, %c0_7, %c0_8] : memref<9x160x128xbf16, #tpu.memory_space<vmem>>, vector<1x160x128xbf16>
    %16 = vector.shape_cast %15 : vector<1x160x128xbf16> to vector<160x128xbf16>
    %cst_9 = arith.constant dense<0.000000e+00> : vector<64x128xf32>
    %17 = tpu.matmul %14, %16, %cst_9 {dimension_numbers = #tpu.dot_dimension_numbers<[1], [0], [0], [1], [0, 0, 1, 1], [], []>} : vector<64x160xbf16>, vector<160x128xbf16>, vector<64x128xf32> -> vector<64x128xf32>
    %18 = arith.addf %13, %17 : vector<64x128xf32>
    %19 = vector.extract_strided_slice %7 {offsets = [0, 0], sizes = [64, 160], strides = [1, 1]} : vector<80x160xbf16> to vector<64x160xbf16>
    %c2 = arith.constant 2 : index
    %c0_10 = arith.constant 0 : index
    %c0_11 = arith.constant 0 : index
    %20 = vector.load %arg2[%c2, %c0_10, %c0_11] : memref<9x160x128xbf16, #tpu.memory_space<vmem>>, vector<1x160x128xbf16>
    %21 = vector.shape_cast %20 : vector<1x160x128xbf16> to vector<160x128xbf16>
    %cst_12 = arith.constant dense<0.000000e+00> : vector<64x128xf32>
    %22 = tpu.matmul %19, %21, %cst_12 {dimension_numbers = #tpu.dot_dimension_numbers<[1], [0], [0], [1], [0, 0, 1, 1], [], []>} : vector<64x160xbf16>, vector<160x128xbf16>, vector<64x128xf32> -> vector<64x128xf32>
    %23 = arith.addf %18, %22 : vector<64x128xf32>
    %24 = vector.extract_strided_slice %3 {offsets = [8, 0], sizes = [64, 160], strides = [1, 1]} : vector<80x160xbf16> to vector<64x160xbf16>
    %c3 = arith.constant 3 : index
    %c0_13 = arith.constant 0 : index
    %c0_14 = arith.constant 0 : index
    %25 = vector.load %arg2[%c3, %c0_13, %c0_14] : memref<9x160x128xbf16, #tpu.memory_space<vmem>>, vector<1x160x128xbf16>
    %26 = vector.shape_cast %25 : vector<1x160x128xbf16> to vector<160x128xbf16>
    %cst_15 = arith.constant dense<0.000000e+00> : vector<64x128xf32>
    %27 = tpu.matmul %24, %26, %cst_15 {dimension_numbers = #tpu.dot_dimension_numbers<[1], [0], [0], [1], [0, 0, 1, 1], [], []>} : vector<64x160xbf16>, vector<160x128xbf16>, vector<64x128xf32> -> vector<64x128xf32>
    %28 = arith.addf %23, %27 : vector<64x128xf32>
    %29 = vector.extract_strided_slice %5 {offsets = [8, 0], sizes = [64, 160], strides = [1, 1]} : vector<80x160xbf16> to vector<64x160xbf16>
    %c4 = arith.constant 4 : index
    %c0_16 = arith.constant 0 : index
    %c0_17 = arith.constant 0 : index
    %30 = vector.load %arg2[%c4, %c0_16, %c0_17] : memref<9x160x128xbf16, #tpu.memory_space<vmem>>, vector<1x160x128xbf16>
    %31 = vector.shape_cast %30 : vector<1x160x128xbf16> to vector<160x128xbf16>
    %cst_18 = arith.constant dense<0.000000e+00> : vector<64x128xf32>
    %32 = tpu.matmul %29, %31, %cst_18 {dimension_numbers = #tpu.dot_dimension_numbers<[1], [0], [0], [1], [0, 0, 1, 1], [], []>} : vector<64x160xbf16>, vector<160x128xbf16>, vector<64x128xf32> -> vector<64x128xf32>
    %33 = arith.addf %28, %32 : vector<64x128xf32>
    %34 = vector.extract_strided_slice %7 {offsets = [8, 0], sizes = [64, 160], strides = [1, 1]} : vector<80x160xbf16> to vector<64x160xbf16>
    %c5 = arith.constant 5 : index
    %c0_19 = arith.constant 0 : index
    %c0_20 = arith.constant 0 : index
    %35 = vector.load %arg2[%c5, %c0_19, %c0_20] : memref<9x160x128xbf16, #tpu.memory_space<vmem>>, vector<1x160x128xbf16>
    %36 = vector.shape_cast %35 : vector<1x160x128xbf16> to vector<160x128xbf16>
    %cst_21 = arith.constant dense<0.000000e+00> : vector<64x128xf32>
    %37 = tpu.matmul %34, %36, %cst_21 {dimension_numbers = #tpu.dot_dimension_numbers<[1], [0], [0], [1], [0, 0, 1, 1], [], []>} : vector<64x160xbf16>, vector<160x128xbf16>, vector<64x128xf32> -> vector<64x128xf32>
    %38 = arith.addf %33, %37 : vector<64x128xf32>
    %39 = vector.extract_strided_slice %3 {offsets = [16, 0], sizes = [64, 160], strides = [1, 1]} : vector<80x160xbf16> to vector<64x160xbf16>
    %c6 = arith.constant 6 : index
    %c0_22 = arith.constant 0 : index
    %c0_23 = arith.constant 0 : index
    %40 = vector.load %arg2[%c6, %c0_22, %c0_23] : memref<9x160x128xbf16, #tpu.memory_space<vmem>>, vector<1x160x128xbf16>
    %41 = vector.shape_cast %40 : vector<1x160x128xbf16> to vector<160x128xbf16>
    %cst_24 = arith.constant dense<0.000000e+00> : vector<64x128xf32>
    %42 = tpu.matmul %39, %41, %cst_24 {dimension_numbers = #tpu.dot_dimension_numbers<[1], [0], [0], [1], [0, 0, 1, 1], [], []>} : vector<64x160xbf16>, vector<160x128xbf16>, vector<64x128xf32> -> vector<64x128xf32>
    %43 = arith.addf %38, %42 : vector<64x128xf32>
    %44 = vector.extract_strided_slice %5 {offsets = [16, 0], sizes = [64, 160], strides = [1, 1]} : vector<80x160xbf16> to vector<64x160xbf16>
    %c7 = arith.constant 7 : index
    %c0_25 = arith.constant 0 : index
    %c0_26 = arith.constant 0 : index
    %45 = vector.load %arg2[%c7, %c0_25, %c0_26] : memref<9x160x128xbf16, #tpu.memory_space<vmem>>, vector<1x160x128xbf16>
    %46 = vector.shape_cast %45 : vector<1x160x128xbf16> to vector<160x128xbf16>
    %cst_27 = arith.constant dense<0.000000e+00> : vector<64x128xf32>
    %47 = tpu.matmul %44, %46, %cst_27 {dimension_numbers = #tpu.dot_dimension_numbers<[1], [0], [0], [1], [0, 0, 1, 1], [], []>} : vector<64x160xbf16>, vector<160x128xbf16>, vector<64x128xf32> -> vector<64x128xf32>
    %48 = arith.addf %43, %47 : vector<64x128xf32>
    %49 = vector.extract_strided_slice %7 {offsets = [16, 0], sizes = [64, 160], strides = [1, 1]} : vector<80x160xbf16> to vector<64x160xbf16>
    %c8 = arith.constant 8 : index
    %c0_28 = arith.constant 0 : index
    %c0_29 = arith.constant 0 : index
    %50 = vector.load %arg2[%c8, %c0_28, %c0_29] : memref<9x160x128xbf16, #tpu.memory_space<vmem>>, vector<1x160x128xbf16>
    %51 = vector.shape_cast %50 : vector<1x160x128xbf16> to vector<160x128xbf16>
    %cst_30 = arith.constant dense<0.000000e+00> : vector<64x128xf32>
    %52 = tpu.matmul %49, %51, %cst_30 {dimension_numbers = #tpu.dot_dimension_numbers<[1], [0], [0], [1], [0, 0, 1, 1], [], []>} : vector<64x160xbf16>, vector<160x128xbf16>, vector<64x128xf32> -> vector<64x128xf32>
    %53 = arith.addf %48, %52 : vector<64x128xf32>
    %c0_31 = arith.constant 0 : index
    %c0_32 = arith.constant 0 : index
    %54 = vector.load %arg3[%c0_31, %c0_32] : memref<1x128xf32, #tpu.memory_space<vmem>>, vector<1x128xf32>
    %55 = vector.broadcast %54 : vector<1x128xf32> to vector<64x128xf32>
    %56 = arith.addf %53, %55 : vector<64x128xf32>
    %cst_33 = arith.constant 0.000000e+00 : f32
    %57 = vector.broadcast %cst_33 : f32 to vector<64x128xf32>
    %58 = arith.maximumf %56, %57 : vector<64x128xf32>
    %cst_34 = arith.constant 1.000000e+00 : f32
    %59 = vector.broadcast %cst_34 : f32 to vector<64x128xf32>
    %60 = arith.subf %56, %59 : vector<64x128xf32>
    %cst_35 = arith.constant 5.000000e-01 : f32
    %61 = vector.broadcast %cst_35 : f32 to vector<64x128xf32>
    %62 = arith.mulf %61, %60 : vector<64x128xf32>
    %cst_36 = arith.constant 0.000000e+00 : f32
    %63 = vector.broadcast %cst_36 : f32 to vector<64x128xf32>
    %64 = arith.maximumf %62, %63 : vector<64x128xf32>
    %65 = arith.addf %56, %64 : vector<64x128xf32>
    %cst_37 = arith.constant -1.000000e+00 : f32
    %66 = vector.broadcast %cst_37 : f32 to vector<64x128xf32>
    %67 = arith.subf %66, %56 : vector<64x128xf32>
    %cst_38 = arith.constant 5.000000e-01 : f32
    %68 = vector.broadcast %cst_38 : f32 to vector<64x128xf32>
    %69 = arith.mulf %68, %67 : vector<64x128xf32>
    %cst_39 = arith.constant 0.000000e+00 : f32
    %70 = vector.broadcast %cst_39 : f32 to vector<64x128xf32>
    %71 = arith.maximumf %69, %70 : vector<64x128xf32>
    %72 = arith.addf %65, %71 : vector<64x128xf32>
    %c0_40 = arith.constant 0 : index
    %c0_41 = arith.constant 0 : index
    %73 = vector.load %arg4[%c0_40, %c0_41] : memref<1x128xf32, #tpu.memory_space<vmem>>, vector<1x128xf32>
    %cst_42 = arith.constant 5.000000e-01 : f32
    %74 = vector.broadcast %cst_42 : f32 to vector<1x128xf32>
    %75 = arith.cmpf ogt, %73, %74 : vector<1x128xf32>
    %76 = vector.shape_cast %75 : vector<1x128xi1> to vector<1x128xi1>
    %77 = vector.broadcast %76 : vector<1x128xi1> to vector<64x128xi1>
    %78 = arith.select %77, %58, %72 : vector<64x128xi1>, vector<64x128xf32>
    %c0_43 = arith.constant 0 : index
    %c0_44 = arith.constant 0 : index
    %c0_45 = arith.constant 0 : index
    %79 = vector.load %arg5[%c0_43, %c0_44, %c0_45] : memref<1x64x128xf32, #tpu.memory_space<vmem>>, vector<1x64x128xf32>
    %80 = vector.shape_cast %79 : vector<1x64x128xf32> to vector<64x128xf32>
    %81 = vector.shape_cast %78 : vector<64x128xf32> to vector<1x64x128xf32>
    tpu.vector_store %arg5[%c0_43, %c0_44, %c0_45], %81 {strides = array<i32>} : memref<1x64x128xf32, #tpu.memory_space<vmem>>, vector<1x64x128xf32>,
    return
  }
  func.func @transform_0(%arg0: i32) -> (i32, i32, i32, i32) {
    %c0_i32 = arith.constant 0 : i32
    %c0_i32_0 = arith.constant 0 : i32
    %c0_i32_1 = arith.constant 0 : i32
    %c0_i32_2 = arith.constant 0 : i32
    return %arg0, %c0_i32, %c0_i32_0, %c0_i32_1 : i32, i32, i32, i32
  }
  func.func @transform_1(%arg0: i32) -> (i32, i32, i32) {
    %c0_i32 = arith.constant 0 : i32
    %c0_i32_0 = arith.constant 0 : i32
    %c0_i32_1 = arith.constant 0 : i32
    %c0_i32_2 = arith.constant 0 : i32
    return %c0_i32, %c0_i32_0, %c0_i32_1 : i32, i32, i32
  }
  func.func @transform_2(%arg0: i32) -> (i32, i32) {
    %c0_i32 = arith.constant 0 : i32
    %c0_i32_0 = arith.constant 0 : i32
    %c0_i32_1 = arith.constant 0 : i32
    return %c0_i32, %c0_i32_0 : i32, i32
  }
  func.func @transform_3(%arg0: i32) -> (i32, i32) {
    %c0_i32 = arith.constant 0 : i32
    %c0_i32_0 = arith.constant 0 : i32
    %c0_i32_1 = arith.constant 0 : i32
    return %c0_i32, %c0_i32_0 : i32, i32
  }
  func.func @transform_4(%arg0: i32) -> (i32, i32, i32) {
    %c0_i32 = arith.constant 0 : i32
    %c0_i32_0 = arith.constant 0 : i32
    %c0_i32_1 = arith.constant 0 : i32
    return %arg0, %c0_i32, %c0_i32_0 : i32, i32, i32
  }
}

</mosaic_0001>

<bundles_post_ra>
// kernel: interlacer_forward.2
= control target key start
LH: loop header
LB: loop body
LE: loop exit
PB: predicated region body
PF: predicated region fallthrough
CT: control target
= control target key end

     0   :  { %12 = vsyncpa [#allocation3], 0  ;;  %s3603_s24 = smov 0   ;;  %s5216_s0 = inlined_call_operand.vmem [shape: f32[2], index: 0, kind: input, shape index: {}]   ;;  %s5217_s1 = inlined_call_operand.vmem [shape: f32[1024,4], index: 1, kind: input, shape index: {}]   ;;  %s5218_s2 = inlined_call_operand.vmem [shape: f32[1024,4], index: 2, kind: input, shape index: {}]   ;;  %s5219_s3 = inlined_call_operand.vmem [shape: f32[1024,4], index: 3, kind: input, shape index: {}]   ;;  %s5220_s4 = inlined_call_operand.vmem [shape: f32[1024,4], index: 4, kind: input, shape index: {}]   ;;  %s5221_s5 = inlined_call_operand.vmem [shape: f32[1024,4], index: 5, kind: input, shape index: {}]   ;;  %s5222_s6 = inlined_call_operand.vmem [shape: f32[1024,4], index: 6, kind: input, shape index: {}]   ;;  %s5223_s7 = inlined_call_operand.vmem [shape: bf16[1024,16], index: 7, kind: output, shape index: {}]  }
   0x1 LB: > { %s2974_s25 = sadd.s32 4294967295, %s3557_s24   ;;  %p2976_p0 = scmp.ge.s32.totalorder %s3557_s24, 1  ;;  %s3557_s24 = sphi %s3603_s24, %s18_s24  }
   0x2   : > { %p226_p1 = scmp.lt.s32.totalorder %s3557_s24, 3  ;;  %s239_s28 = sshll.u32 %s5216_s0, 4  ;;  %s240_s28 = int_to_ptr.vmem [resolvable:$true] %s239_s28 }
   0x3   : > { %p3618_p3 = scmp.eq.s32.totalorder %s2974_s25, 0  ;;  %s3532_s8 = scalar_lea.vmem %s240_s28, 16 }
   0x4   : > { %p3614_p2 = pnand %p2976_p0, %p226_p1  ;;  %p3533_p6 = scmp.ne.s32.totalorder %s240_s28, %s3532_s8 }
   0x5   : > { %p3540_p10 = scmp.lt.s32.totalorder %s240_s28, %s240_s28  ;;  %p3541_p11 = scmp.lt.s32.totalorder %s3532_s8, %s3532_s8 }
   0x6   : > { %p3514_p4 = pneg %p3614_p2 }
   0x7   : > { %p3542_p12 = por %p3541_p11, %p3540_p10 }
   0x8   : > { %p3515_p5 = pnand %p3618_p3, %p3514_p4 }
   0xa   : > { %p3534_p7 = pneg %p3515_p5 }
   0xc   : > { %p3535_p8 = pnand %p3534_p7, %p3533_p6 }
   0xe   : > { %p3536_p9 = pneg %p3535_p8 }
  0x10   : > { %p3543_p13 = pnand %p3542_p12, %p3536_p9 }
  0x12   : > { %3546 = shalt.err (!%p3543_p13)
}
  0x13   : > { %s3559_s9 = smov [#allocation2]   ;;  %306 = sbr.rel (%p3614_p2) target bundleno = 541 (0x21d), region = 48 }
  0x14   : > { %3517 = dma.vmem_to_smem (!%p3515_p5), %s240_s28, 16, %s3559_s9, [#allocation3]  }
  0x18   : > { %3552 = dma.done.wait (%p3618_p3), [#allocation3], 16  }
  0x19   : > { %3554 = vsyncadd (%p3618_p3), [#allocation3], 4294967280 }
  0x1a   : > { %312 = sfence }
  0x1b   : > { %s2981_s10 = sshll.u32 %s2974_s25, 6  ;;  %s2995_s11 = sld [smem:[#allocation2 + $0x1]]  ;;  %vm1049_vm0 = vcmask 27648   ;;  %vm1755_vm1 = vcmask 60448   ;;  %vm2268_vm2 = vcmask 93248   ;;  %vm2781_vm3 = vcmask 126048  }
  0x1c   : > { %p365_p0 = scmp.lt.s32.totalorder %s2981_s10, 127  ;;  %s3560_s19 = smov 4  }
  0x1d   : > { %s3729_s20 = sld [smem:[#allocation2]]  ;;  %s3561_s13 = smov 8  }
  0x1e   : > { %s5227_s10 = smov (!%p365_p0, %s2981_s10), 127 }
  0x1f   : > { %s3635_s12 = sshll.u32 %s5227_s10, 3  ;;  %s2994_s28 = sshll.u32 %s5227_s10, 2 }
  0x20   : > { %s3641_s15 = scalar_lea.vmem %s5219_s3, %s3635_s12  ;;  %s3647_s18 = scalar_lea.vmem %s5220_s4, %s3635_s12 }
  0x21   : > { %v474_v0 = vld [vmem:[%s3647_s18 + $0x10] sm:$0xff]  ;;  %v3651_v2 = vstv %s2995_s11  ;;  %v472_v3 = vld [vmem:[%s3647_s18] sm:$0xff]  ;;  %v475_v6 = vld [vmem:[%s3647_s18 + $0x18] sm:$0xff]  ;;  %s4009_s23 = scalar_lea.vmem %s5217_s1, %s3635_s12  ;;  %s4015_s27 = scalar_lea.vmem %s5218_s2, %s3635_s12 }
  0x22   : > { %v1116_v1 = vld [vmem:[%s3641_s15 + $0x10] sm:$0xff]  ;;  %v1114_v5 = vld [vmem:[%s3641_s15] sm:$0xff]  ;;  %v1117_v7 = vld [vmem:[%s3641_s15 + $0x18] sm:$0xff]  ;;  %s4104_s8 = scalar_lea.vmem %s5223_s7, %s2994_s28  ;;  %s4462_s11 = scalar_lea.vmem %s5221_s5, %s3635_s12 }
  0x23   : > { %v1180_v4 = vsub.f32 %v1116_v1, %v474_v0  ;;  %v1178_v8 = vsub.f32 %v1114_v5, %v472_v3  ;;  %v1181_v9 = vsub.f32 %v1117_v7, %v475_v6  ;;  %v473_v10 = vld [vmem:[%s3647_s18 + $0x8] sm:$0xff]  ;;  %v476_v16 = vld [vmem:[%s3647_s18 + $0x20] sm:$0xff]  ;;  %v479_v22 = vld [vmem:[%s3647_s18 + $0x38] sm:$0xff]  ;;  %s4827_s16 = scalar_lea.vmem %s5222_s6, %s3635_s12  ;;  %s3562_s12 = smov 12  }
  0x24   : > { %v1115_v11 = vld [vmem:[%s3641_s15 + $0x8] sm:$0xff]  ;;  %v1118_v17 = vld [vmem:[%s3641_s15 + $0x20] sm:$0xff]  ;;  %v1121_v23 = vld [vmem:[%s3641_s15 + $0x38] sm:$0xff] }
  0x25   : > { %v477_v12 = vld [vmem:[%s3647_s18 + $0x28] sm:$0xff]  ;;  %v1245_v13 = vmul.f32 %v3651_v2, %v1180_v4  ;;  %v1179_v14 = vsub.f32 %v1115_v11, %v473_v10  ;;  %v1243_v18 = vmul.f32 %v3651_v2, %v1178_v8  ;;  %v1246_v19 = vmul.f32 %v3651_v2, %v1181_v9  ;;  %v478_v24 = vld [vmem:[%s3647_s18 + $0x30] sm:$0xff]  ;;  %v480_v38 = vld [vmem:[%s3647_s18 + $0x40] sm:$0xff] }
  0x26   : > { %v1119_v15 = vld [vmem:[%s3641_s15 + $0x28] sm:$0xff]  ;;  %v1182_v21 = vsub.f32 %v1118_v17, %v476_v16  ;;  %v1185_v27 = vsub.f32 %v1121_v23, %v479_v22  ;;  %v1120_v28 = vld [vmem:[%s3641_s15 + $0x30] sm:$0xff]  ;;  %v1122_v39 = vld [vmem:[%s3641_s15 + $0x40] sm:$0xff] }
  0x27   : > { %v1183_v20 = vsub.f32 %v1119_v15, %v477_v12  ;;  %v1309_v25 = vadd.f32 %v1245_v13, %v474_v0  ;;  %v1244_v26 = vmul.f32 %v3651_v2, %v1179_v14  ;;  %v1307_v29 = vadd.f32 %v1243_v18, %v472_v3  ;;  %v481_v33 = vld [vmem:[%s3647_s18 + $0x48] sm:$0xff]  ;;  %v483_v41 = vld [vmem:[%s3647_s18 + $0x58] sm:$0xff]  ;;  %v482_v52 = vld [vmem:[%s3647_s18 + $0x50] sm:$0xff] }
  0x28   : > { %v1310_v30 = vadd.f32 %v1246_v19, %v475_v6  ;;  %v1247_v32 = vmul.f32 %v3651_v2, %v1182_v21  ;;  %v1123_v34 = vld [vmem:[%s3641_s15 + $0x48] sm:$0xff]  ;;  %v1184_v37 = vsub.f32 %v1120_v28, %v478_v24  ;;  %v1125_v42 = vld [vmem:[%s3641_s15 + $0x58] sm:$0xff]  ;;  %v1250_v45 = vmul.f32 %v3651_v2, %v1185_v27  ;;  %v1124_v53 = vld [vmem:[%s3641_s15 + $0x50] sm:$0xff] }
  0x29   : > { %v1248_v31 = vmul.f32 %v3651_v2, %v1183_v20  ;;  %v3320_v35 = vpack.c.bf16 %v1309_v25, %v1309_v25  ;;  %v1308_v36 = vadd.f32 %v1244_v26, %v473_v10  ;;  %v3318_v40 = vpack.c.bf16 %v1307_v29, %v1307_v29  ;;  %v3686_v54 = vld [vmem:[%s3647_s18 + $0x68] sm:$0xff]  ;;  %v3692_v59 = vld [vmem:[%s3647_s18 + $0x60] sm:$0xff]  ;;  %v3698_v1 = vld [vmem:[%s3647_s18 + $0x78] sm:$0xff] }
  0x2a   : > { %v3321_v43 = vpack.c.bf16 %v1310_v30, %v1310_v30  ;;  %v1187_v46 = vsub.f32 %v1123_v34, %v481_v33  ;;  %v1311_v48 = vadd.f32 %v1247_v32, %v476_v16  ;;  %v1249_v49 = vmul.f32 %v3651_v2, %v1184_v37  ;;  %v1127_v58 = vld [vmem:[%s3641_s15 + $0x68] sm:$0xff]  ;;  %v1126_v60 = vld [vmem:[%s3641_s15 + $0x60] sm:$0xff]  ;;  %v1129_v3 = vld [vmem:[%s3641_s15 + $0x78] sm:$0xff] }
  0x2b   : > { %1567 = vrot.lane.b32.xlu1 %v3320_v35, %s3560_s19  ;;  %v1312_v44 = vadd.f32 %v1248_v31, %v477_v12  ;;  %1563 = vrot.lane.b32.xlu0 %v3318_v40, %s3560_s19  ;;  %v3319_v47 = vpack.c.bf16 %v1308_v36, %v1308_v36  ;;  %v1186_v50 = vsub.f32 %v1122_v39, %v480_v38  ;;  %v3702_v4 = vld [vmem:[%s3647_s18 + $0x70] sm:$0xff]  ;;  %v489_v6 = vld [vmem:[%s3647_s18 + $0x88] sm:$0xff] }
  0x2c   : > { %v1189_v51 = vsub.f32 %v1125_v42, %v483_v41  ;;  %v1314_v56 = vadd.f32 %v1250_v45, %v479_v22  ;;  %v1252_v57 = vmul.f32 %v3651_v2, %v1187_v46  ;;  %v3322_v61 = vpack.c.bf16 %v1311_v48, %v1311_v48  ;;  %v1128_v5 = vld [vmem:[%s3641_s15 + $0x70] sm:$0xff]  ;;  %v1131_v7 = vld [vmem:[%s3641_s15 + $0x88] sm:$0xff]  ;;  %v488_v9 = vld [vmem:[%s3647_s18 + $0x80] sm:$0xff] }
  0x2d   : > { %v3323_v55 = vpack.c.bf16 %v1312_v44, %v1312_v44  ;;  %v1313_v62 = vadd.f32 %v1249_v49, %v478_v24  ;;  %v1251_v63 = vmul.f32 %v3651_v2, %v1186_v50  ;;  %v1188_v0 = vsub.f32 %v1124_v53, %v482_v52  ;;  %v1130_v10 = vld [vmem:[%s3641_s15 + $0x80] sm:$0xff]  ;;  %v491_v11 = vld [vmem:[%s3647_s18 + $0x98] sm:$0xff]  ;;  %v490_v13 = vld [vmem:[%s3647_s18 + $0x90] sm:$0xff] }
  0x2e   : > { %v1254_v8 = vmul.f32 %v3651_v2, %v1189_v51  ;;  %v1133_v12 = vld [vmem:[%s3641_s15 + $0x98] sm:$0xff]  ;;  %v1132_v14 = vld [vmem:[%s3641_s15 + $0x90] sm:$0xff]  ;;  %v3325_v15 = vpack.c.bf16 %v1314_v56, %v1314_v56  ;;  %v1316_v16 = vadd.f32 %v1252_v57, %v481_v33  ;;  %v1191_v17 = vsub.f32 %v1127_v58, %v3686_v54  ;;  %v493_v18 = vld [vmem:[%s3647_s18 + $0xa8] sm:$0xff] }
  0x2f   : > { %1569 = vrot.lane.b32.xlu1 %v3321_v43, %s3560_s19  ;;  %1565 = vrot.lane.b32.xlu0 %v3319_v47, %s3560_s19  ;;  %v1135_v19 = vld [vmem:[%s3641_s15 + $0xa8] sm:$0xff]  ;;  %v492_v20 = vld [vmem:[%s3647_s18 + $0xa0] sm:$0xff]  ;;  %v3324_v21 = vpack.c.bf16 %v1313_v62, %v1313_v62  ;;  %v1315_v22 = vadd.f32 %v1251_v63, %v480_v38  ;;  %v1253_v23 = vmul.f32 %v3651_v2, %v1188_v0 }
  0x30   : > { %v1190_v24 = vsub.f32 %v1126_v60, %v3692_v59  ;;  %v1134_v25 = vld [vmem:[%s3641_s15 + $0xa0] sm:$0xff]  ;;  %v495_v26 = vld [vmem:[%s3647_s18 + $0xb8] sm:$0xff]  ;;  %v1318_v28 = vadd.f32 %v1254_v8, %v483_v41  ;;  %v1193_v29 = vsub.f32 %v1129_v3, %v3698_v1  ;;  %v1192_v30 = vsub.f32 %v1128_v5, %v3702_v4  ;;  %v3737_v46 = vld [vmem:[%s3647_s18 + $0xb0] sm:$0xff] }
  0x31   : > { %v1137_v27 = vld [vmem:[%s3641_s15 + $0xb8] sm:$0xff]  ;;  %v1195_v31 = vsub.f32 %v1131_v7, %v489_v6  ;;  %v1194_v32 = vsub.f32 %v1130_v10, %v488_v9  ;;  %v1197_v33 = vsub.f32 %v1133_v12, %v491_v11  ;;  %v1196_v34 = vsub.f32 %v1132_v14, %v490_v13  ;;  %v1136_v47 = vld [vmem:[%s3641_s15 + $0xb0] sm:$0xff]  ;;  %v3760_v63 = vld [vmem:[%s3647_s18 + $0xc8] sm:$0xff] }
  0x32   : > { %v1199_v35 = vsub.f32 %v1135_v19, %v493_v18  ;;  %v3327_v36 = vpack.c.bf16 %v1316_v16, %v1316_v16  ;;  %v1256_v37 = vmul.f32 %v3651_v2, %v1191_v17  ;;  %v1198_v38 = vsub.f32 %v1134_v25, %v492_v20  ;;  %v1139_v0 = vld [vmem:[%s3641_s15 + $0xc8] sm:$0xff]  ;;  %v3772_v7 = vld [vmem:[%s3647_s18 + $0xc0] sm:$0xff]  ;;  %v3781_v10 = vld [vmem:[%s3647_s18 + $0xd8] sm:$0xff] }
  0x33   : > { %1573 = vrot.lane.b32.xlu1 %v3323_v55, %s3560_s19  ;;  %1571 = vrot.lane.b32.xlu0 %v3322_v61, %s3560_s19  ;;  %v1201_v39 = vsub.f32 %v1137_v27, %v495_v26  ;;  %v3326_v40 = vpack.c.bf16 %v1315_v22, %v1315_v22  ;;  %v1317_v41 = vadd.f32 %v1253_v23, %v482_v52  ;;  %v3785_v12 = vstv %s3729_s20  ;;  %v3791_v16 = vld [vmem:[%s3647_s18 + $0xd0] sm:$0xff] }
  0x34   : > { %v1255_v42 = vmul.f32 %v3651_v2, %v1190_v24  ;;  %v1258_v43 = vmul.f32 %v3651_v2, %v1193_v29  ;;  %v1257_v44 = vmul.f32 %v3651_v2, %v1192_v30  ;;  %v1260_v45 = vmul.f32 %v3651_v2, %v1195_v31  ;;  %v3794_v17 = vld [vmem:[%s3641_s15 + $0xd0] sm:$0xff]  ;;  %v1147_v19 = vld [vmem:[%s3641_s15 + $0x108] sm:$0xff]  ;;  %v1146_v25 = vld [vmem:[%s3641_s15 + $0x100] sm:$0xff] }
  0x35   : > { %v1259_v48 = vmul.f32 %v3651_v2, %v1194_v32  ;;  %v1262_v49 = vmul.f32 %v3651_v2, %v1197_v33  ;;  %v1261_v50 = vmul.f32 %v3651_v2, %v1196_v34  ;;  %v1264_v51 = vmul.f32 %v3651_v2, %v1199_v35  ;;  %v1149_v27 = vld [vmem:[%s3641_s15 + $0x118] sm:$0xff]  ;;  %v506_v32 = vld [vmem:[%s3647_s18 + $0x110] sm:$0xff]  ;;  %v509_v34 = vld [vmem:[%s3647_s18 + $0x128] sm:$0xff] }
  0x36   : > { %v3329_v52 = vpack.c.bf16 %v1318_v28, %v1318_v28  ;;  %v1320_v53 = vadd.f32 %v1256_v37, %v3686_v54  ;;  %v1263_v55 = vmul.f32 %v3651_v2, %v1198_v38  ;;  %v1266_v56 = vmul.f32 %v3651_v2, %v1201_v39  ;;  %v1148_v33 = vld [vmem:[%s3641_s15 + $0x110] sm:$0xff]  ;;  %v1151_v39 = vld [vmem:[%s3641_s15 + $0x128] sm:$0xff] }
  0x37   : > { %1577 = vrot.lane.b32.xlu1 %v3325_v15, %s3560_s19  ;;  %1575 = vrot.lane.b32.xlu0 %v3324_v21, %s3560_s19  ;;  %v3328_v57 = vpack.c.bf16 %v1317_v41, %v1317_v41  ;;  %v1319_v58 = vadd.f32 %v1255_v42, %v3692_v59  ;;  %v1200_v60 = vsub.f32 %v1136_v47, %v3737_v46  ;;  %v1150_v41 = vld [vmem:[%s3641_s15 + $0x120] sm:$0xff]  ;;  %v511_v47 = vld [vmem:[%s3647_s18 + $0x138] sm:$0xff] }
  0x38   : > { %v3752_v61 = vadd.f32 %v1258_v43, %v3698_v1  ;;  %v3755_v54 = vadd.f32 %v1257_v44, %v3702_v4  ;;  %v3757_v62 = vadd.f32 %v1260_v45, %v489_v6  ;;  %v3763_v3 = vadd.f32 %v1259_v48, %v488_v9  ;;  %v1138_v4 = vld [vmem:[%s3641_s15 + $0xc0] sm:$0xff]  ;;  %v1153_v48 = vld [vmem:[%s3641_s15 + $0x138] sm:$0xff] }
  0x39   : > { %v3765_v5 = vadd.f32 %v1262_v49, %v491_v11  ;;  %v3767_v59 = vadd.f32 %v1261_v50, %v490_v13  ;;  %v3769_v1 = vadd.f32 %v1264_v51, %v493_v18  ;;  %v3331_v6 = vpack.c.bf16 %v1320_v53, %v1320_v53  ;;  %v1141_v11 = vld [vmem:[%s3641_s15 + $0xd8] sm:$0xff]  ;;  %v505_v18 = vld [vmem:[%s3647_s18 + $0x108] sm:$0xff] }
  0x3a   : > { %v3776_v8 = vadd.f32 %v1263_v55, %v492_v20  ;;  %v3778_v9 = vadd.f32 %v1266_v56, %v495_v26  ;;  %v3330_v13 = vpack.c.bf16 %v1319_v58, %v1319_v58  ;;  %v1265_v14 = vmul.f32 %v3651_v2, %v1200_v60  ;;  %v504_v20 = vld [vmem:[%s3647_s18 + $0x100] sm:$0xff]  ;;  %v507_v26 = vld [vmem:[%s3647_s18 + $0x118] sm:$0xff]  ;;  %v3840_v51 = vld [vmem:[%s3647_s18 + $0xe8] sm:$0xff] }
  0x3b   : > { %1581 = vrot.lane.b32.xlu1 %v3327_v36, %s3560_s19  ;;  %1579 = vrot.lane.b32.xlu0 %v3326_v40, %s3560_s19  ;;  %v1203_v15 = vsub.f32 %v1139_v0, %v3760_v63  ;;  %v3333_v21 = vpack.c.bf16 %v3752_v61, %v3752_v61  ;;  %v3332_v22 = vpack.c.bf16 %v3755_v54, %v3755_v54  ;;  %v508_v40 = vld [vmem:[%s3647_s18 + $0x120] sm:$0xff]  ;;  %v510_v61 = vld [vmem:[%s3647_s18 + $0x130] sm:$0xff] }
  0x3c   : > { %v3335_v23 = vpack.c.bf16 %v3757_v62, %v3757_v62  ;;  %v1202_v24 = vsub.f32 %v1138_v4, %v3772_v7  ;;  %v3334_v28 = vpack.c.bf16 %v3763_v3, %v3763_v3  ;;  %v3337_v29 = vpack.c.bf16 %v3765_v5, %v3765_v5  ;;  %v3847_v55 = vld [vmem:[%s3647_s18 + $0xe0] sm:$0xff]  ;;  %v1152_v54 = vld [vmem:[%s3641_s15 + $0x130] sm:$0xff] }
  0x3d   : > { %v3336_v30 = vpack.c.bf16 %v3767_v59, %v3767_v59  ;;  %v3339_v31 = vpack.c.bf16 %v3769_v1, %v3769_v1  ;;  %v3338_v35 = vpack.c.bf16 %v3776_v8, %v3776_v8  ;;  %v3341_v36 = vpack.c.bf16 %v3778_v9, %v3778_v9  ;;  %v3856_v4 = vld [vmem:[%s3641_s15 + $0xe0] sm:$0xff] }
  0x3e   : > { %v1205_v37 = vsub.f32 %v1141_v11, %v3781_v10  ;;  %v1211_v38 = vsub.f32 %v1147_v19, %v505_v18  ;;  %v3831_v42 = vadd.f32 %v1265_v14, %v3737_v46  ;;  %v1268_v43 = vmul.f32 %v3651_v2, %v1203_v15  ;;  %v3843_v46 = vld [vmem:[%s3641_s15 + $0xe8] sm:$0xff]  ;;  %v3862_v11 = vld [vmem:[%s3641_s15 + $0xf8] sm:$0xff] }
  0x3f   : > { %1585 = vrot.lane.b32.xlu1 %v3329_v52, %s3560_s19  ;;  %1583 = vrot.lane.b32.xlu0 %v3328_v57, %s3560_s19  ;;  %v1210_v44 = vsub.f32 %v1146_v25, %v504_v20  ;;  %v1213_v45 = vsub.f32 %v1149_v27, %v507_v26  ;;  %v1267_v49 = vmul.f32 %v3651_v2, %v1202_v24  ;;  %v513_v25 = vld [vmem:[%s3647_s18 + $0x148] sm:$0xff]  ;;  %v512_v27 = vld [vmem:[%s3647_s18 + $0x140] sm:$0xff] }
  0x40   : > { %v1204_v50 = vsub.f32 %v3794_v17, %v3791_v16  ;;  %v1276_v52 = vmul.f32 %v3651_v2, %v1211_v38  ;;  %v1212_v53 = vsub.f32 %v1148_v33, %v506_v32  ;;  %v1215_v58 = vsub.f32 %v1151_v39, %v509_v34  ;;  %v515_v38 = vld [vmem:[%s3647_s18 + $0x158] sm:$0xff] }
  0x41   : > { %v1275_v56 = vmul.f32 %v3651_v2, %v1210_v44  ;;  %v1278_v57 = vmul.f32 %v3651_v2, %v1213_v45  ;;  %v1214_v60 = vsub.f32 %v1150_v41, %v508_v40  ;;  %v1270_v0 = vmul.f32 %v3651_v2, %v1205_v37  ;;  %v1157_v39 = vld [vmem:[%s3641_s15 + $0x158] sm:$0xff] }
  0x42   : > { %v1277_v14 = vmul.f32 %v3651_v2, %v1212_v53  ;;  %v1217_v15 = vsub.f32 %v1153_v48, %v511_v47  ;;  %v1207_v33 = vsub.f32 %v3843_v46, %v3840_v51  ;;  %v3340_v41 = vpack.c.bf16 %v3831_v42, %v3831_v42  ;;  %v1156_v46 = vld [vmem:[%s3641_s15 + $0x150] sm:$0xff] }
  0x43   : > { %1589 = vrot.lane.b32.xlu1 %v3331_v6, %s3560_s19  ;;  %1587 = vrot.lane.b32.xlu0 %v3330_v13, %s3560_s19  ;;  %v3859_v6 = vld [vmem:[%s3647_s18 + $0xf8] sm:$0xff]  ;;  %v3864_v13 = vadd.f32 %v1276_v52, %v505_v18  ;;  %v3868_v17 = vadd.f32 %v1275_v56, %v504_v20  ;;  %v3870_v19 = vadd.f32 %v1278_v57, %v507_v26  ;;  %v1155_v18 = vld [vmem:[%s3641_s15 + $0x148] sm:$0xff] }
  0x44   : > { %v1279_v24 = vmul.f32 %v3651_v2, %v1214_v60  ;;  %v3879_v37 = vadd.f32 %v1277_v14, %v506_v32  ;;  %v1282_v20 = vmul.f32 %v3651_v2, %v1217_v15  ;;  %v1154_v26 = vld [vmem:[%s3641_s15 + $0x140] sm:$0xff]  ;;  %v1206_v44 = vsub.f32 %v3856_v4, %v3847_v55  ;;  %v514_v32 = vld [vmem:[%s3647_s18 + $0x150] sm:$0xff]  ;;  %v517_v52 = vld [vmem:[%s3647_s18 + $0x168] sm:$0xff] }
  0x45   : > { %v3901_v53 = vadd.f32 %v1268_v43, %v3760_v63  ;;  %v1219_v57 = vsub.f32 %v1155_v18, %v513_v25  ;;  %v1158_v60 = vld [vmem:[%s3641_s15 + $0x160] sm:$0xff]  ;;  %v1269_v62 = vmul.f32 %v3651_v2, %v1204_v50  ;;  %v1209_v63 = vsub.f32 %v3862_v11, %v3859_v6  ;;  %v1160_v18 = vld [vmem:[%s3641_s15 + $0x170] sm:$0xff] }
  0x46   : > { %v3891_v48 = vadd.f32 %v1279_v24, %v508_v40  ;;  %v3903_v56 = vadd.f32 %v1282_v20, %v511_v47  ;;  %v1159_v40 = vld [vmem:[%s3641_s15 + $0x168] sm:$0xff]  ;;  %v1221_v43 = vsub.f32 %v1157_v39, %v515_v38  ;;  %v519_v47 = vld [vmem:[%s3647_s18 + $0x178] sm:$0xff]  ;;  %v3919_v4 = vadd.f32 %v1267_v49, %v3772_v7  ;;  %v518_v24 = vld [vmem:[%s3647_s18 + $0x170] sm:$0xff] }
  0x47   : > { %1593 = vrot.lane.b32.xlu1 %v3333_v21, %s3560_s19  ;;  %1591 = vrot.lane.b32.xlu0 %v3332_v22, %s3560_s19  ;;  %v1280_v21 = vmul.f32 %v3651_v2, %v1215_v58  ;;  %v1216_v22 = vsub.f32 %v1152_v54, %v510_v61  ;;  %v516_v58 = vld [vmem:[%s3647_s18 + $0x160] sm:$0xff]  ;;  %v1161_v54 = vld [vmem:[%s3641_s15 + $0x178] sm:$0xff]  ;;  %v1284_v3 = vmul.f32 %v3651_v2, %v1219_v57 }
  0x48   : > { %v1286_v50 = vmul.f32 %v3651_v2, %v1221_v43  ;;  %v1222_v11 = vsub.f32 %v1158_v60, %v516_v58  ;;  %v3933_v7 = vadd.f32 %v1270_v0, %v3781_v10  ;;  %v3936_v49 = vld [vmem:[%s3647_s18 + $0xf0] sm:$0xff]  ;;  %v1163_v39 = vld [vmem:[%s3641_s15 + $0x188] sm:$0xff]  ;;  %v3343_v60 = vpack.c.bf16 %v3901_v53, %v3901_v53 }
  0x49   : > { %v3889_v45 = vadd.f32 %v1280_v21, %v509_v34  ;;  %v1281_v34 = vmul.f32 %v3651_v2, %v1216_v22  ;;  %v1223_v21 = vsub.f32 %v1159_v40, %v517_v52  ;;  %v3941_v20 = vadd.f32 %v1284_v3, %v513_v25  ;;  %v521_v25 = vld [vmem:[%s3647_s18 + $0x188] sm:$0xff]  ;;  %v1165_v40 = vld [vmem:[%s3641_s15 + $0x198] sm:$0xff] }
  0x4a   : > { %v3950_v10 = vadd.f32 %v1286_v50, %v515_v38  ;;  %v1287_v0 = vmul.f32 %v3651_v2, %v1222_v11  ;;  %v523_v38 = vld [vmem:[%s3647_s18 + $0x198] sm:$0xff]  ;;  %v525_v3 = vld [vmem:[%s3647_s18 + $0x1a8] sm:$0xff]  ;;  %v1166_v50 = vld [vmem:[%s3641_s15 + $0x1a0] sm:$0xff]  ;;  %v1274_v1 = vmul.f32 %v3651_v2, %v1209_v63  ;;  %v3342_v11 = vpack.c.bf16 %v3919_v4, %v3919_v4 }
  0x4b   : > { %1597 = vrot.lane.b32.xlu1 %v3335_v23, %s3560_s19  ;;  %1595 = vrot.lane.b32.xlu0 %v3334_v28, %s3560_s19  ;;  %v1218_v23 = vsub.f32 %v1154_v26, %v512_v27  ;;  %v3921_v14 = vadd.f32 %v1281_v34, %v510_v61  ;;  %v1220_v28 = vsub.f32 %v1156_v46, %v514_v32  ;;  %v3939_v61 = vld [vmem:[%s3641_s15 + $0xf0] sm:$0xff]  ;;  %v520_v46 = vld [vmem:[%s3647_s18 + $0x180] sm:$0xff] }
  0x4c   : > { %v1225_v26 = vsub.f32 %v1161_v54, %v519_v47  ;;  %v1272_v34 = vmul.f32 %v3651_v2, %v1207_v33  ;;  %v3969_v54 = vadd.f32 %v1287_v0, %v516_v58  ;;  %v522_v33 = vld [vmem:[%s3647_s18 + $0x190] sm:$0xff]  ;;  %v1167_v58 = vld [vmem:[%s3641_s15 + $0x1a8] sm:$0xff] }
  0x4d   : > { %v1283_v15 = vmul.f32 %v3651_v2, %v1218_v23  ;;  %v1285_v22 = vmul.f32 %v3651_v2, %v1220_v28  ;;  %v1271_v23 = vmul.f32 %v3651_v2, %v1206_v44  ;;  %v3979_v28 = vadd.f32 %v1269_v62, %v3791_v16  ;;  %v1168_v0 = vld [vmem:[%s3641_s15 + $0x1b0] sm:$0xff] }
  0x4e   : > { %v1290_v59 = vmul.f32 %v3651_v2, %v1225_v26  ;;  %v1208_v16 = vsub.f32 %v3939_v61, %v3936_v49  ;;  %v1229_v62 = vsub.f32 %v1165_v40, %v523_v38  ;;  %v1231_v26 = vsub.f32 %v1167_v58, %v525_v3 }
  0x4f   : > { %1601 = vrot.lane.b32.xlu1 %v3337_v29, %s3560_s19  ;;  %1599 = vrot.lane.b32.xlu0 %v3336_v30, %s3560_s19  ;;  %v3948_v5 = vadd.f32 %v1283_v15, %v512_v27  ;;  %v1288_v29 = vmul.f32 %v3651_v2, %v1223_v21  ;;  %v3958_v57 = vadd.f32 %v1285_v22, %v514_v32  ;;  %v1162_v27 = vld [vmem:[%s3641_s15 + $0x180] sm:$0xff]  ;;  %v1164_v32 = vld [vmem:[%s3641_s15 + $0x190] sm:$0xff] }
  0x50   : > { %v1224_v30 = vsub.f32 %v1160_v18, %v518_v24  ;;  %v3981_v53 = vadd.f32 %v1290_v59, %v519_v47  ;;  %v524_v15 = vld [vmem:[%s3647_s18 + $0x1a0] sm:$0xff]  ;;  %v527_v47 = vld [vmem:[%s3647_s18 + $0x1b8] sm:$0xff]  ;;  %v1294_v63 = vmul.f32 %v3651_v2, %v1229_v62  ;;  %v4022_v4 = vadd.f32 %v1272_v34, %v3840_v51  ;;  %v1171_v34 = vld [vmem:[%s3641_s15 + $0x1c8] sm:$0xff] }
  0x51   : > { %v3967_v43 = vadd.f32 %v1288_v29, %v517_v52  ;;  %v1227_v52 = vsub.f32 %v1163_v39, %v521_v25  ;;  %v1169_v21 = vld [vmem:[%s3641_s15 + $0x1b8] sm:$0xff]  ;;  %v1230_v61 = vsub.f32 %v1166_v50, %v524_v15  ;;  %v526_v29 = vld [vmem:[%s3647_s18 + $0x1b0] sm:$0xff]  ;;  %v1273_v40 = vmul.f32 %v3651_v2, %v1208_v16  ;;  %v408_v16 = vld [vmem:[%s4015_s27] sm:$0xff] }
  0x52   : > { %v1289_v44 = vmul.f32 %v3651_v2, %v1224_v30  ;;  %v1233_v59 = vsub.f32 %v1169_v21, %v527_v47  ;;  %v4033_v9 = vadd.f32 %v1294_v63, %v523_v38  ;;  %v410_v38 = vld [vmem:[%s4015_s27 + $0x10] sm:$0xff]  ;;  %v4050_v58 = vadd.f32 %v1271_v23, %v3847_v55  ;;  %v531_v62 = vld [vmem:[%s3647_s18 + $0x1d8] sm:$0xff] }
  0x53   : > { %1605 = vrot.lane.b32.xlu1 %v3339_v31, %s3560_s19  ;;  %1603 = vrot.lane.b32.xlu0 %v3338_v35, %s3560_s19  ;;  %v1226_v31 = vsub.f32 %v1162_v27, %v520_v46  ;;  %v1292_v8 = vmul.f32 %v3651_v2, %v1227_v52  ;;  %v1228_v35 = vsub.f32 %v1164_v32, %v522_v33  ;;  %v528_v27 = vld [vmem:[%s3647_s18 + $0x1c0] sm:$0xff]  ;;  %v1173_v23 = vld [vmem:[%s3641_s15 + $0x1d8] sm:$0xff] }
  0x54   : > { %v3998_v18 = vadd.f32 %v1289_v44, %v518_v24  ;;  %v1295_v51 = vmul.f32 %v3651_v2, %v1230_v61  ;;  %v1298_v42 = vmul.f32 %v3651_v2, %v1233_v59  ;;  %v538_v44 = vld [vmem:[%s4009_s23 + $0x10] sm:$0xff]  ;;  %v3345_v52 = vpack.c.bf16 %v3933_v7, %v3933_v7  ;;  %v539_v63 = vld [vmem:[%s4009_s23 + $0x18] sm:$0xff]  ;;  %v409_v59 = vld [vmem:[%s4015_s27 + $0x8] sm:$0xff] }
  0x55   : > { %v1291_v22 = vmul.f32 %v3651_v2, %v1226_v31  ;;  %v4024_v24 = vadd.f32 %v1292_v8, %v521_v25  ;;  %v1293_v39 = vmul.f32 %v3651_v2, %v1228_v35  ;;  %v529_v25 = vld [vmem:[%s3647_s18 + $0x1c8] sm:$0xff]  ;;  %v536_v31 = vld [vmem:[%s4009_s23] sm:$0xff]  ;;  %v3344_v21 = vpack.c.bf16 %v3979_v28, %v3979_v28 }
  0x56   : > { %v4062_v8 = vadd.f32 %v1298_v42, %v527_v47  ;;  %v1235_v55 = vsub.f32 %v1171_v34, %v529_v25  ;;  %v3347_v35 = vpack.c.bf16 %v4022_v4, %v4022_v4  ;;  %v602_v47 = vsub.f32 %v538_v44, %v410_v38  ;;  %v533_v44 = vld [vmem:[%s3647_s18 + $0x1e8] sm:$0xff] }
  0x57   : > { %1609 = vrot.lane.b32.xlu1 %v3341_v36, %s3560_s19  ;;  %1607 = vrot.lane.b32.xlu0 %v3340_v41, %s3560_s19  ;;  %v4031_v30 = vadd.f32 %v1291_v22, %v520_v46  ;;  %v1296_v36 = vmul.f32 %v3651_v2, %v1231_v26  ;;  %v4041_v32 = vadd.f32 %v1293_v39, %v522_v33  ;;  %v1170_v46 = vld [vmem:[%s3641_s15 + $0x1c0] sm:$0xff]  ;;  %v411_v22 = vld [vmem:[%s4015_s27 + $0x18] sm:$0xff] }
  0x58   : > { %v1232_v41 = vsub.f32 %v1168_v0, %v526_v29  ;;  %v4054_v33 = vadd.f32 %v1295_v51, %v524_v15  ;;  %v1172_v15 = vld [vmem:[%s3641_s15 + $0x1d0] sm:$0xff]  ;;  %v1234_v28 = vsub.f32 %v1170_v46, %v528_v27  ;;  %v4077_v26 = vadd.f32 %v1273_v40, %v3936_v49 }
  0x59   : > { %v4052_v50 = vadd.f32 %v1296_v36, %v525_v3  ;;  %v530_v3 = vld [vmem:[%s3647_s18 + $0x1d0] sm:$0xff]  ;;  %v1300_v0 = vmul.f32 %v3651_v2, %v1235_v55  ;;  %v667_v4 = vmul.f32 %v3785_v12, %v602_v47  ;;  %v537_v36 = vld [vmem:[%s4009_s23 + $0x8] sm:$0xff]  ;;  %v3346_v49 = vpack.c.bf16 %v4050_v58, %v4050_v58 }
  0x5a   : > { %v1297_v7 = vmul.f32 %v3651_v2, %v1232_v41  ;;  %v1299_v39 = vmul.f32 %v3651_v2, %v1234_v28  ;;  %v603_v34 = vsub.f32 %v539_v63, %v411_v22  ;;  %v541_v55 = vld [vmem:[%s4009_s23 + $0x28] sm:$0xff]  ;;  %v535_v63 = vld [vmem:[%s3647_s18 + $0x1f8] sm:$0xff] }
  0x5b   : > { %1613 = vrot.lane.b32.xlu1 %v3343_v60, %s3560_s19  ;;  %1611 = vrot.lane.b32.xlu0 %v3342_v11, %s3560_s19  ;;  %v4072_v60 = vadd.f32 %v1274_v1, %v3859_v6  ;;  %v600_v11 = vsub.f32 %v536_v31, %v408_v16  ;;  %v1237_v6 = vsub.f32 %v1173_v23, %v531_v62 }
  0x5c   : > { %v4079_v61 = vadd.f32 %v1297_v7, %v526_v29  ;;  %v1236_v1 = vsub.f32 %v1172_v15, %v530_v3  ;;  %v4090_v29 = vadd.f32 %v1300_v0, %v529_v25  ;;  %v4094_v40 = vadd.f32 %v1299_v39, %v528_v27  ;;  %v1175_v25 = vld [vmem:[%s3641_s15 + $0x1e8] sm:$0xff] }
  0x5d   : > { %v665_v51 = vmul.f32 %v3785_v12, %v600_v11  ;;  %v731_v42 = vadd.f32 %v667_v4, %v410_v38  ;;  %v1302_v41 = vmul.f32 %v3651_v2, %v1237_v6  ;;  %v3349_v27 = vpack.c.bf16 %v4072_v60, %v4072_v60  ;;  %v413_v7 = vld [vmem:[%s4015_s27 + $0x28] sm:$0xff]  ;;  %v412_v60 = vld [vmem:[%s4015_s27 + $0x20] sm:$0xff]  ;;  %v534_v6 = vld [vmem:[%s3647_s18 + $0x1f0] sm:$0xff] }
  0x5e   : > { %v1301_v46 = vmul.f32 %v3651_v2, %v1236_v1  ;;  %v668_v38 = vmul.f32 %v3785_v12, %v603_v34  ;;  %v601_v31 = vsub.f32 %v537_v36, %v409_v59  ;;  %v3348_v23 = vpack.c.bf16 %v4077_v26, %v4077_v26  ;;  %v1177_v26 = vld [vmem:[%s3641_s15 + $0x1f8] sm:$0xff] }
  0x5f   : > { %1617 = vrot.lane.b32.xlu1 %v3345_v52, %s3560_s19  ;;  %1615 = vrot.lane.b32.xlu0 %v3344_v21, %s3560_s19  ;;  %v532_v52 = vld [vmem:[%s3647_s18 + $0x1e0] sm:$0xff]  ;;  %v729_v58 = vadd.f32 %v665_v51, %v408_v16  ;;  %v3256_v15 = vpack.c.bf16 %v731_v42, %v731_v42  ;;  %v4114_v28 = vadd.f32 %v1302_v41, %v531_v62  ;;  %v1176_v62 = vld [vmem:[%s3641_s15 + $0x1f0] sm:$0xff] }
  0x60   : > { %v1174_v21 = vld [vmem:[%s3641_s15 + $0x1e0] sm:$0xff]  ;;  %v4116_v47 = vadd.f32 %v1301_v46, %v530_v3  ;;  %v732_v11 = vadd.f32 %v668_v38, %v411_v22  ;;  %v666_v39 = vmul.f32 %v3785_v12, %v601_v31  ;;  %v1239_v4 = vsub.f32 %v1175_v25, %v533_v44  ;;  %v415_v36 = vld [vmem:[%s4015_s27 + $0x38] sm:$0xff]  ;;  %v542_v38 = vld [vmem:[%s4009_s23 + $0x30] sm:$0xff] }
  0x61   : > { %v540_v16 = vld [vmem:[%s4009_s23 + $0x20] sm:$0xff]  ;;  %v3254_v0 = vpack.c.bf16 %v729_v58, %v729_v58  ;;  %v3351_v3 = vpack.c.bf16 %v3864_v13, %v3864_v13  ;;  %v3350_v1 = vpack.c.bf16 %v3868_v17, %v3868_v17  ;;  %1052 = vst.msk [vmem:[%s4104_s8 + $0x8] sm:$0xf] %vm1049_vm0, %v3256_v15  ;;  %v605_v22 = vsub.f32 %v541_v55, %v413_v7  ;;  %v543_v51 = vld [vmem:[%s4009_s23 + $0x38] sm:$0xff]  ;;  %v414_v58 = vld [vmem:[%s4015_s27 + $0x30] sm:$0xff] }
  0x62   : > { %v3257_v34 = vpack.c.bf16 %v732_v11, %v732_v11  ;;  %v730_v42 = vadd.f32 %v666_v39, %v409_v59  ;;  %v604_v41 = vsub.f32 %v540_v16, %v412_v60  ;;  %v1241_v17 = vsub.f32 %v1177_v26, %v535_v63  ;;  %v545_v26 = vld [vmem:[%s4009_s23 + $0x48] sm:$0xff] }
  0x63   : > { %1621 = vrot.lane.b32.xlu1 %v3347_v35, %s3560_s19  ;;  %1619 = vrot.lane.b32.xlu0 %v3346_v49, %s3560_s19  ;;  %v1238_v35 = vsub.f32 %v1174_v21, %v532_v52  ;;  %1050 = vst.msk [vmem:[%s4104_s8] sm:$0xf] %vm1049_vm0, %v3254_v0  ;;  %v1304_v49 = vmul.f32 %v3651_v2, %v1239_v4  ;;  %v417_v4 = vld [vmem:[%s4015_s27 + $0x48] sm:$0xff] }
  0x64   : > { %v670_v46 = vmul.f32 %v3785_v12, %v605_v22  ;;  %v1240_v25 = vsub.f32 %v1176_v62, %v534_v6  ;;  %1053 = vst.msk [vmem:[%s4104_s8 + $0xc] sm:$0xf] %vm1049_vm0, %v3257_v34  ;;  %v3255_v31 = vpack.c.bf16 %v730_v42, %v730_v42  ;;  %v669_v21 = vmul.f32 %v3785_v12, %v604_v41  ;;  %v416_v62 = vld [vmem:[%s4015_s27 + $0x40] sm:$0xff]  ;;  %v547_v42 = vld [vmem:[%s4009_s23 + $0x58] sm:$0xff] }
  0x65   : > { %v1303_v13 = vmul.f32 %v3651_v2, %v1238_v35  ;;  %v4145_v59 = vadd.f32 %v1304_v49, %v533_v44  ;;  %v607_v55 = vsub.f32 %v543_v51, %v415_v36  ;;  %v1306_v0 = vmul.f32 %v3651_v2, %v1241_v17  ;;  %v419_v35 = vld [vmem:[%s4015_s27 + $0x58] sm:$0xff] }
  0x66   : > { %v734_v16 = vadd.f32 %v670_v46, %v413_v7  ;;  %1051 = vst.msk [vmem:[%s4104_s8 + $0x4] sm:$0xf] %vm1049_vm0, %v3255_v31  ;;  %v733_v11 = vadd.f32 %v669_v21, %v412_v60  ;;  %v606_v39 = vsub.f32 %v542_v38, %v414_v58  ;;  %v3353_v60 = vpack.c.bf16 %v3870_v19, %v3870_v19  ;;  %v549_v46 = vld [vmem:[%s4009_s23 + $0x68] sm:$0xff]  ;;  %v420_v38 = vld [vmem:[%s4015_s27 + $0x60] sm:$0xff] }
  0x67   : > { %1625 = vrot.lane.b32.xlu1 %v3349_v27, %s3560_s19  ;;  %1623 = vrot.lane.b32.xlu0 %v3348_v23, %s3560_s19  ;;  %v4149_v15 = vadd.f32 %v1303_v13, %v532_v52  ;;  %v1305_v27 = vmul.f32 %v3651_v2, %v1240_v25  ;;  %v672_v44 = vmul.f32 %v3785_v12, %v607_v55  ;;  %v544_v2 = vld [vmem:[%s4009_s23 + $0x40] sm:$0xff]  ;;  %v421_v13 = vld [vmem:[%s4015_s27 + $0x68] sm:$0xff] }
  0x68   : > { %v3259_v23 = vpack.c.bf16 %v734_v16, %v734_v16  ;;  %v4158_v52 = vadd.f32 %v1306_v0, %v535_v63  ;;  %v3258_v22 = vpack.c.bf16 %v733_v11, %v733_v11  ;;  %v671_v34 = vmul.f32 %v3785_v12, %v606_v39  ;;  %v418_v63 = vld [vmem:[%s4015_s27 + $0x50] sm:$0xff]  ;;  %v423_v16 = vld [vmem:[%s4015_s27 + $0x78] sm:$0xff] }
  0x69   : > { %v4160_v7 = vadd.f32 %v1305_v27, %v534_v6  ;;  %v736_v51 = vadd.f32 %v672_v44, %v415_v36  ;;  %v546_v6 = vld [vmem:[%s4009_s23 + $0x50] sm:$0xff]  ;;  %v3352_v49 = vpack.c.bf16 %v3879_v37, %v3879_v37  ;;  %v608_v41 = vsub.f32 %v544_v2, %v416_v62  ;;  %v548_v37 = vld [vmem:[%s4009_s23 + $0x60] sm:$0xff]  ;;  %v551_v39 = vld [vmem:[%s4009_s23 + $0x78] sm:$0xff] }
  0x6a   : > { %1055 = vst.msk [vmem:[%s4104_s8 + $0x14] sm:$0xf] %vm1049_vm0, %v3259_v23  ;;  %1054 = vst.msk [vmem:[%s4104_s8 + $0x10] sm:$0xf] %vm1049_vm0, %v3258_v22  ;;  %v735_v36 = vadd.f32 %v671_v34, %v414_v58  ;;  %v611_v25 = vsub.f32 %v547_v42, %v419_v35  ;;  %v3355_v31 = vpack.c.bf16 %v3889_v45, %v3889_v45  ;;  %v422_v45 = vld [vmem:[%s4015_s27 + $0x70] sm:$0xff]  ;;  %v425_v34 = vld [vmem:[%s4015_s27 + $0x88] sm:$0xff] }
  0x6b   : > { %1629 = vrot.lane.b32.xlu1 %v3351_v3, %s3560_s19  ;;  %1627 = vrot.lane.b32.xlu0 %v3350_v1, %s3560_s19  ;;  %v609_v3 = vsub.f32 %v545_v26, %v417_v4  ;;  %v3261_v19 = vpack.c.bf16 %v736_v51, %v736_v51  ;;  %v610_v1 = vsub.f32 %v546_v6, %v418_v63  ;;  %v550_v26 = vld [vmem:[%s4009_s23 + $0x70] sm:$0xff] }
  0x6c   : > { %v3354_v58 = vpack.c.bf16 %v3891_v48, %v3891_v48  ;;  %v3260_v21 = vpack.c.bf16 %v735_v36, %v735_v36  ;;  %v673_v55 = vmul.f32 %v3785_v12, %v608_v41  ;;  %v676_v27 = vmul.f32 %v3785_v12, %v611_v25 }
  0x6d   : > { %v674_v17 = vmul.f32 %v3785_v12, %v609_v3  ;;  %1057 = vst.msk [vmem:[%s4104_s8 + $0x1c] sm:$0xf] %vm1049_vm0, %v3261_v19  ;;  %v675_v11 = vmul.f32 %v3785_v12, %v610_v1  ;;  %v613_v44 = vsub.f32 %v549_v46, %v421_v13  ;;  %v3357_v48 = vpack.c.bf16 %v3903_v56, %v3903_v56  ;;  %v424_v3 = vld [vmem:[%s4015_s27 + $0x80] sm:$0xff]  ;;  %v427_v46 = vld [vmem:[%s4015_s27 + $0x98] sm:$0xff] }
  0x6e   : > { %1056 = vst.msk [vmem:[%s4104_s8 + $0x18] sm:$0xf] %vm1049_vm0, %v3260_v21  ;;  %v737_v23 = vadd.f32 %v673_v55, %v416_v62  ;;  %v612_v2 = vsub.f32 %v548_v37, %v420_v38  ;;  %v615_v56 = vsub.f32 %v551_v39, %v423_v16  ;;  %v553_v62 = vld [vmem:[%s4009_s23 + $0x88] sm:$0xff]  ;;  %v552_v19 = vld [vmem:[%s4009_s23 + $0x80] sm:$0xff]  ;;  %v555_v37 = vld [vmem:[%s4009_s23 + $0x98] sm:$0xff]  ;;  %v3358_v55 = vpack.c.bf16 %v3948_v5, %v3948_v5 }
  0x6f   : > { %1633 = vrot.lane.b32.xlu1 %v3353_v60, %s3560_s19  ;;  %1631 = vrot.lane.b32.xlu0 %v3352_v49, %s3560_s19  ;;  %v738_v0 = vadd.f32 %v674_v17, %v417_v4  ;;  %v740_v60 = vadd.f32 %v676_v27, %v419_v35  ;;  %v739_v22 = vadd.f32 %v675_v11, %v418_v63  ;;  %v429_v11 = vld [vmem:[%s4015_s27 + $0xa8] sm:$0xff]  ;;  %v428_v5 = vld [vmem:[%s4015_s27 + $0xa0] sm:$0xff] }
  0x70   : > { %v678_v51 = vmul.f32 %v3785_v12, %v613_v44  ;;  %v3262_v42 = vpack.c.bf16 %v737_v23, %v737_v23  ;;  %v677_v6 = vmul.f32 %v3785_v12, %v612_v2  ;;  %v614_v49 = vsub.f32 %v550_v26, %v422_v45  ;;  %v557_v23 = vld [vmem:[%s4009_s23 + $0xa8] sm:$0xff]  ;;  %v556_v2 = vld [vmem:[%s4009_s23 + $0xa0] sm:$0xff] }
  0x71   : > { %v3263_v4 = vpack.c.bf16 %v738_v0, %v738_v0  ;;  %v3356_v35 = vpack.c.bf16 %v3921_v14, %v3921_v14  ;;  %v3265_v63 = vpack.c.bf16 %v740_v60, %v740_v60  ;;  %v3264_v36 = vpack.c.bf16 %v739_v22, %v739_v22 }
  0x72   : > { %v742_v41 = vadd.f32 %v678_v51, %v421_v13  ;;  %1058 = vst.msk [vmem:[%s4104_s8 + $0x20] sm:$0xf] %vm1049_vm0, %v3262_v42  ;;  %v741_v17 = vadd.f32 %v677_v6, %v420_v38  ;;  %v680_v25 = vmul.f32 %v3785_v12, %v615_v56  ;;  %v679_v1 = vmul.f32 %v3785_v12, %v614_v49  ;;  %v559_v6 = vld [vmem:[%s4009_s23 + $0xb8] sm:$0xff]  ;;  %v430_v56 = vld [vmem:[%s4015_s27 + $0xb0] sm:$0xff] }
  0x73   : > { %1637 = vrot.lane.b32.xlu1 %v3355_v31, %s3560_s19  ;;  %1635 = vrot.lane.b32.xlu0 %v3354_v58, %s3560_s19  ;;  %1059 = vst.msk [vmem:[%s4104_s8 + $0x24] sm:$0xf] %vm1049_vm0, %v3263_v4  ;;  %v426_v31 = vld [vmem:[%s4015_s27 + $0x90] sm:$0xff]  ;;  %v3359_v14 = vpack.c.bf16 %v3941_v20, %v3941_v20  ;;  %v617_v38 = vsub.f32 %v553_v62, %v425_v34 }
  0x74   : > { %v554_v58 = vld [vmem:[%s4009_s23 + $0x90] sm:$0xff]  ;;  %1061 = vst.msk [vmem:[%s4104_s8 + $0x2c] sm:$0xf] %vm1049_vm0, %v3265_v63  ;;  %1060 = vst.msk [vmem:[%s4104_s8 + $0x28] sm:$0xf] %vm1049_vm0, %v3264_v36  ;;  %v3267_v13 = vpack.c.bf16 %v742_v41, %v742_v41  ;;  %v616_v21 = vsub.f32 %v552_v19, %v424_v3  ;;  %v3266_v0 = vpack.c.bf16 %v741_v17, %v741_v17  ;;  %v431_v4 = vld [vmem:[%s4015_s27 + $0xb8] sm:$0xff] }
  0x75   : > { %v744_v27 = vadd.f32 %v680_v25, %v423_v16  ;;  %v743_v20 = vadd.f32 %v679_v1, %v422_v45  ;;  %v682_v44 = vmul.f32 %v3785_v12, %v617_v38  ;;  %v619_v26 = vsub.f32 %v555_v37, %v427_v46  ;;  %v558_v49 = vld [vmem:[%s4009_s23 + $0xb0] sm:$0xff]  ;;  %v433_v41 = vld [vmem:[%s4015_s27 + $0xc8] sm:$0xff]  ;;  %v435_v38 = vld [vmem:[%s4015_s27 + $0xd8] sm:$0xff] }
  0x76   : > { %1063 = vst.msk [vmem:[%s4104_s8 + $0x34] sm:$0xf] %vm1049_vm0, %v3267_v13  ;;  %v681_v39 = vmul.f32 %v3785_v12, %v616_v21  ;;  %1062 = vst.msk [vmem:[%s4104_s8 + $0x30] sm:$0xf] %vm1049_vm0, %v3266_v0  ;;  %v3361_v62 = vpack.c.bf16 %v3950_v10, %v3950_v10  ;;  %v3360_v19 = vpack.c.bf16 %v3958_v57, %v3958_v57  ;;  %v561_v37 = vld [vmem:[%s4009_s23 + $0xc8] sm:$0xff] }
  0x77   : > { %1641 = vrot.lane.b32.xlu1 %v3357_v48, %s3560_s19  ;;  %1639 = vrot.lane.b32.xlu0 %v3356_v35, %s3560_s19  ;;  %v618_v48 = vsub.f32 %v554_v58, %v426_v31  ;;  %v3269_v16 = vpack.c.bf16 %v744_v27, %v744_v27  ;;  %v3268_v45 = vpack.c.bf16 %v743_v20, %v743_v20  ;;  %v432_v58 = vld [vmem:[%s4015_s27 + $0xc0] sm:$0xff]  ;;  %v563_v20 = vld [vmem:[%s4009_s23 + $0xd8] sm:$0xff] }
  0x78   : > { %v746_v60 = vadd.f32 %v682_v44, %v425_v34  ;;  %v745_v22 = vadd.f32 %v681_v39, %v424_v3  ;;  %v684_v51 = vmul.f32 %v3785_v12, %v619_v26  ;;  %v621_v34 = vsub.f32 %v557_v23, %v429_v11  ;;  %v562_v44 = vld [vmem:[%s4009_s23 + $0xd0] sm:$0xff] }
  0x79   : > { %v683_v42 = vmul.f32 %v3785_v12, %v618_v48  ;;  %1065 = vst.msk [vmem:[%s4104_s8 + $0x3c] sm:$0xf] %vm1049_vm0, %v3269_v16  ;;  %1064 = vst.msk [vmem:[%s4104_s8 + $0x38] sm:$0xf] %vm1049_vm0, %v3268_v45  ;;  %v620_v3 = vsub.f32 %v556_v2, %v428_v5  ;;  %v623_v25 = vsub.f32 %v559_v6, %v431_v4  ;;  %v437_v16 = vld [vmem:[%s4015_s27 + $0xe8] sm:$0xff]  ;;  %v564_v6 = vld [vmem:[%s4009_s23 + $0xe0] sm:$0xff] }
  0x7a   : > { %v3271_v35 = vpack.c.bf16 %v746_v60, %v746_v60  ;;  %v3270_v63 = vpack.c.bf16 %v745_v22, %v745_v22  ;;  %v748_v10 = vadd.f32 %v684_v51, %v427_v46  ;;  %v686_v57 = vmul.f32 %v3785_v12, %v621_v34  ;;  %v565_v51 = vld [vmem:[%s4009_s23 + $0xe8] sm:$0xff] }
  0x7b   : > { %1645 = vrot.lane.b32.xlu1 %v3359_v14, %s3560_s19  ;;  %1643 = vrot.lane.b32.xlu0 %v3358_v55, %s3560_s19  ;;  %v747_v36 = vadd.f32 %v683_v42, %v426_v31  ;;  %v685_v17 = vmul.f32 %v3785_v12, %v620_v3  ;;  %v622_v1 = vsub.f32 %v558_v49, %v430_v56  ;;  %v560_v14 = vld [vmem:[%s4009_s23 + $0xc0] sm:$0xff] }
  0x7c   : > { %v3363_v13 = vpack.c.bf16 %v3967_v43, %v3967_v43  ;;  %1067 = vst.msk [vmem:[%s4104_s8 + $0x44] sm:$0xf] %vm1049_vm0, %v3271_v35  ;;  %1066 = vst.msk [vmem:[%s4104_s8 + $0x40] sm:$0xf] %vm1049_vm0, %v3270_v63  ;;  %v3273_v46 = vpack.c.bf16 %v748_v10, %v748_v10  ;;  %v750_v21 = vadd.f32 %v686_v57, %v429_v11  ;;  %v434_v43 = vld [vmem:[%s4015_s27 + $0xd0] sm:$0xff]  ;;  %v436_v42 = vld [vmem:[%s4015_s27 + $0xe0] sm:$0xff] }
  0x7d   : > { %v3272_v31 = vpack.c.bf16 %v747_v36, %v747_v36  ;;  %v749_v55 = vadd.f32 %v685_v17, %v428_v5  ;;  %v688_v0 = vmul.f32 %v3785_v12, %v623_v25  ;;  %v687_v27 = vmul.f32 %v3785_v12, %v622_v1  ;;  %v567_v63 = vld [vmem:[%s4009_s23 + $0xf8] sm:$0xff]  ;;  %v438_v10 = vld [vmem:[%s4015_s27 + $0xf0] sm:$0xff] }
  0x7e   : > { %v3362_v39 = vpack.c.bf16 %v3969_v54, %v3969_v54  ;;  %1069 = vst.msk [vmem:[%s4104_s8 + $0x4c] sm:$0xf] %vm1049_vm0, %v3273_v46  ;;  %v625_v11 = vsub.f32 %v561_v37, %v433_v41  ;;  %v624_v26 = vsub.f32 %v560_v14, %v432_v58  ;;  %v3275_v48 = vpack.c.bf16 %v750_v21, %v750_v21  ;;  %v440_v21 = vld [vmem:[%s4015_s27 + $0x100] sm:$0xff] }
  0x7f   : > { %1649 = vrot.lane.b32.xlu1 %v3361_v62, %s3560_s19  ;;  %1647 = vrot.lane.b32.xlu0 %v3360_v19, %s3560_s19  ;;  %1068 = vst.msk [vmem:[%s4104_s8 + $0x48] sm:$0xf] %vm1049_vm0, %v3272_v31  ;;  %v3274_v23 = vpack.c.bf16 %v749_v55, %v749_v55  ;;  %v752_v5 = vadd.f32 %v688_v0, %v431_v4  ;;  %v439_v19 = vld [vmem:[%s4015_s27 + $0xf8] sm:$0xff] }
  0x80   : > { %v751_v2 = vadd.f32 %v687_v27, %v430_v56  ;;  %v690_v45 = vmul.f32 %v3785_v12, %v625_v11  ;;  %v689_v60 = vmul.f32 %v3785_v12, %v624_v26  ;;  %v627_v54 = vsub.f32 %v563_v20, %v435_v38  ;;  %1071 = vst.msk [vmem:[%s4104_s8 + $0x54] sm:$0xf] %vm1049_vm0, %v3275_v48  ;;  %v569_v31 = vld [vmem:[%s4009_s23 + $0x108] sm:$0xff]  ;;  %v568_v55 = vld [vmem:[%s4009_s23 + $0x100] sm:$0xff]  ;;  %v443_v20 = vld [vmem:[%s4015_s27 + $0x118] sm:$0xff] }
  0x81   : > { %v626_v22 = vsub.f32 %v562_v44, %v434_v43  ;;  %v3365_v4 = vpack.c.bf16 %v3981_v53, %v3981_v53  ;;  %v3364_v56 = vpack.c.bf16 %v3998_v18, %v3998_v18  ;;  %1070 = vst.msk [vmem:[%s4104_s8 + $0x50] sm:$0xf] %vm1049_vm0, %v3274_v23  ;;  %v3277_v49 = vpack.c.bf16 %v752_v5, %v752_v5  ;;  %v566_v18 = vld [vmem:[%s4009_s23 + $0xf0] sm:$0xff]  ;;  %v571_v26 = vld [vmem:[%s4009_s23 + $0x118] sm:$0xff] }
  0x82   : > { %v3276_v62 = vpack.c.bf16 %v751_v2, %v751_v2  ;;  %v754_v34 = vadd.f32 %v690_v45, %v433_v41  ;;  %v753_v3 = vadd.f32 %v689_v60, %v432_v58  ;;  %v692_v35 = vmul.f32 %v3785_v12, %v627_v54  ;;  %v441_v58 = vld [vmem:[%s4015_s27 + $0x108] sm:$0xff]  ;;  %v442_v48 = vld [vmem:[%s4015_s27 + $0x110] sm:$0xff] }
  0x83   : > { %1653 = vrot.lane.b32.xlu1 %v3363_v13, %s3560_s19  ;;  %1651 = vrot.lane.b32.xlu0 %v3362_v39, %s3560_s19  ;;  %v691_v53 = vmul.f32 %v3785_v12, %v626_v22  ;;  %v3367_v36 = vpack.c.bf16 %v4024_v24, %v4024_v24  ;;  %1073 = vst.msk [vmem:[%s4104_s8 + $0x5c] sm:$0xf] %vm1049_vm0, %v3277_v49  ;;  %v570_v23 = vld [vmem:[%s4009_s23 + $0x110] sm:$0xff] }
  0x84   : > { %1072 = vst.msk [vmem:[%s4104_s8 + $0x58] sm:$0xf] %vm1049_vm0, %v3276_v62  ;;  %v629_v41 = vsub.f32 %v565_v51, %v437_v16  ;;  %v628_v57 = vsub.f32 %v564_v6, %v436_v42  ;;  %v3279_v17 = vpack.c.bf16 %v754_v34, %v754_v34  ;;  %v3278_v25 = vpack.c.bf16 %v753_v3, %v753_v3  ;;  %v445_v22 = vld [vmem:[%s4015_s27 + $0x128] sm:$0xff]  ;;  %v572_v49 = vld [vmem:[%s4009_s23 + $0x120] sm:$0xff]  ;;  %v447_v34 = vld [vmem:[%s4015_s27 + $0x138] sm:$0xff] }
  0x85   : > { %v756_v1 = vadd.f32 %v692_v35, %v435_v38  ;;  %v755_v37 = vadd.f32 %v691_v53, %v434_v43  ;;  %v631_v13 = vsub.f32 %v567_v63, %v439_v19  ;;  %v630_v46 = vsub.f32 %v566_v18, %v438_v10  ;;  %v446_v18 = vld [vmem:[%s4015_s27 + $0x130] sm:$0xff] }
  0x86   : > { %v694_v24 = vmul.f32 %v3785_v12, %v629_v41  ;;  %v693_v14 = vmul.f32 %v3785_v12, %v628_v57  ;;  %v3366_v38 = vpack.c.bf16 %v4031_v30, %v4031_v30  ;;  %1075 = vst.msk [vmem:[%s4104_s8 + $0x64] sm:$0xf] %vm1049_vm0, %v3279_v17  ;;  %1074 = vst.msk [vmem:[%s4104_s8 + $0x60] sm:$0xf] %vm1049_vm0, %v3278_v25 }
  0x87   : > { %1657 = vrot.lane.b32.xlu1 %v3365_v4, %s3560_s19  ;;  %1655 = vrot.lane.b32.xlu0 %v3364_v56, %s3560_s19  ;;  %v3281_v0 = vpack.c.bf16 %v756_v1, %v756_v1  ;;  %v3280_v27 = vpack.c.bf16 %v755_v37, %v755_v37  ;;  %v696_v39 = vmul.f32 %v3785_v12, %v631_v13  ;;  %v573_v4 = vld [vmem:[%s4009_s23 + $0x128] sm:$0xff]  ;;  %v444_v56 = vld [vmem:[%s4015_s27 + $0x120] sm:$0xff] }
  0x88   : > { %v758_v43 = vadd.f32 %v694_v24, %v437_v16  ;;  %v757_v44 = vadd.f32 %v693_v14, %v436_v42  ;;  %v695_v11 = vmul.f32 %v3785_v12, %v630_v46  ;;  %v3369_v30 = vpack.c.bf16 %v4033_v9, %v4033_v9  ;;  %v449_v24 = vld [vmem:[%s4015_s27 + $0x148] sm:$0xff] }
  0x89   : > { %v3368_v5 = vpack.c.bf16 %v4041_v32, %v4041_v32  ;;  %1077 = vst.msk [vmem:[%s4104_s8 + $0x6c] sm:$0xf] %vm1049_vm0, %v3281_v0  ;;  %1076 = vst.msk [vmem:[%s4104_s8 + $0x68] sm:$0xf] %vm1049_vm0, %v3280_v27  ;;  %v633_v2 = vsub.f32 %v569_v31, %v441_v58  ;;  %v632_v16 = vsub.f32 %v568_v55, %v440_v21  ;;  %v577_v31 = vld [vmem:[%s4009_s23 + $0x148] sm:$0xff]  ;;  %v576_v55 = vld [vmem:[%s4009_s23 + $0x140] sm:$0xff] }
  0x8a   : > { %v3283_v45 = vpack.c.bf16 %v758_v43, %v758_v43  ;;  %v3282_v60 = vpack.c.bf16 %v757_v44, %v757_v44  ;;  %v760_v9 = vadd.f32 %v696_v39, %v439_v19  ;;  %v759_v54 = vadd.f32 %v695_v11, %v438_v10  ;;  %v575_v10 = vld [vmem:[%s4009_s23 + $0x138] sm:$0xff] }
  0x8b   : > { %1661 = vrot.lane.b32.xlu1 %v3367_v36, %s3560_s19  ;;  %1659 = vrot.lane.b32.xlu0 %v3366_v38, %s3560_s19  ;;  %v698_v32 = vmul.f32 %v3785_v12, %v633_v2  ;;  %v697_v51 = vmul.f32 %v3785_v12, %v632_v16  ;;  %v635_v42 = vsub.f32 %v571_v26, %v443_v20  ;;  %v574_v36 = vld [vmem:[%s4009_s23 + $0x130] sm:$0xff]  ;;  %v579_v26 = vld [vmem:[%s4009_s23 + $0x158] sm:$0xff] }
  0x8c   : > { %v634_v6 = vsub.f32 %v570_v23, %v442_v48  ;;  %1079 = vst.msk [vmem:[%s4104_s8 + $0x74] sm:$0xf] %vm1049_vm0, %v3283_v45  ;;  %1078 = vst.msk [vmem:[%s4104_s8 + $0x70] sm:$0xf] %vm1049_vm0, %v3282_v60  ;;  %v3285_v62 = vpack.c.bf16 %v760_v9, %v760_v9  ;;  %v3284_v19 = vpack.c.bf16 %v759_v54, %v759_v54  ;;  %v453_v9 = vld [vmem:[%s4015_s27 + $0x168] sm:$0xff] }
  0x8d   : > { %v762_v3 = vadd.f32 %v698_v32, %v441_v58  ;;  %v761_v35 = vadd.f32 %v697_v51, %v440_v21  ;;  %v700_v53 = vmul.f32 %v3785_v12, %v635_v42  ;;  %v3371_v41 = vpack.c.bf16 %v4052_v50, %v4052_v50  ;;  %v448_v21 = vld [vmem:[%s4015_s27 + $0x140] sm:$0xff]  ;;  %v581_v51 = vld [vmem:[%s4009_s23 + $0x168] sm:$0xff] }
  0x8e   : > { %v699_v63 = vmul.f32 %v3785_v12, %v634_v6  ;;  %v3370_v57 = vpack.c.bf16 %v4054_v33, %v4054_v33  ;;  %1081 = vst.msk [vmem:[%s4104_s8 + $0x7c] sm:$0xf] %vm1049_vm0, %v3285_v62  ;;  %1080 = vst.msk [vmem:[%s4104_s8 + $0x78] sm:$0xf] %vm1049_vm0, %v3284_v19  ;;  %v637_v17 = vsub.f32 %v573_v4, %v445_v22  ;;  %v452_v42 = vld [vmem:[%s4015_s27 + $0x160] sm:$0xff]  ;;  %v455_v19 = vld [vmem:[%s4015_s27 + $0x178] sm:$0xff] }
  0x8f   : > { %1665 = vrot.lane.b32.xlu1 %v3369_v30, %s3560_s19  ;;  %v636_v25 = vsub.f32 %v572_v49, %v444_v56  ;;  %1663 = vrot.lane.b32.xlu0 %v3368_v5, %s3560_s19  ;;  %v3287_v1 = vpack.c.bf16 %v762_v3, %v762_v3  ;;  %v3286_v37 = vpack.c.bf16 %v761_v35, %v761_v35  ;;  %v580_v6 = vld [vmem:[%s4009_s23 + $0x160] sm:$0xff] }
  0x90   : > { %v764_v50 = vadd.f32 %v700_v53, %v443_v20  ;;  %v763_v58 = vadd.f32 %v699_v63, %v442_v48  ;;  %v702_v33 = vmul.f32 %v3785_v12, %v637_v17  ;;  %v639_v13 = vsub.f32 %v575_v10, %v447_v34  ;;  %v451_v20 = vld [vmem:[%s4015_s27 + $0x158] sm:$0xff]  ;;  %v578_v48 = vld [vmem:[%s4009_s23 + $0x150] sm:$0xff] }
  0x91   : > { %v701_v14 = vmul.f32 %v3785_v12, %v636_v25  ;;  %v638_v46 = vsub.f32 %v574_v36, %v446_v18  ;;  %v3373_v38 = vpack.c.bf16 %v4062_v8, %v4062_v8  ;;  %1083 = vst.msk [vmem:[%s4104_s8 + $0x84] sm:$0xf] %vm1049_vm0, %v3287_v1  ;;  %1082 = vst.msk [vmem:[%s4104_s8 + $0x80] sm:$0xf] %vm1049_vm0, %v3286_v37  ;;  %v450_v8 = vld [vmem:[%s4015_s27 + $0x150] sm:$0xff]  ;;  %v583_v53 = vld [vmem:[%s4009_s23 + $0x178] sm:$0xff] }
  0x92   : > { %v3289_v0 = vpack.c.bf16 %v764_v50, %v764_v50  ;;  %v3288_v27 = vpack.c.bf16 %v763_v58, %v763_v58  ;;  %v766_v43 = vadd.f32 %v702_v33, %v445_v22  ;;  %v704_v39 = vmul.f32 %v3785_v12, %v639_v13  ;;  %v582_v63 = vld [vmem:[%s4009_s23 + $0x170] sm:$0xff]  ;;  %v457_v1 = vld [vmem:[%s4015_s27 + $0x188] sm:$0xff]  ;;  %v456_v33 = vld [vmem:[%s4015_s27 + $0x180] sm:$0xff] }
  0x93   : > { %1669 = vrot.lane.b32.xlu1 %v3371_v41, %s3560_s19  ;;  %v765_v44 = vadd.f32 %v701_v14, %v444_v56  ;;  %v703_v11 = vmul.f32 %v3785_v12, %v638_v46  ;;  %1667 = vrot.lane.b32.xlu0 %v3370_v57, %s3560_s19  ;;  %v3372_v23 = vpack.c.bf16 %v4079_v61, %v4079_v61  ;;  %v584_v14 = vld [vmem:[%s4009_s23 + $0x180] sm:$0xff] }
  0x94   : > { %1085 = vst.msk [vmem:[%s4104_s8 + $0x8c] sm:$0xf] %vm1049_vm0, %v3289_v0  ;;  %1084 = vst.msk [vmem:[%s4104_s8 + $0x88] sm:$0xf] %vm1049_vm0, %v3288_v27  ;;  %v641_v30 = vsub.f32 %v577_v31, %v449_v24  ;;  %v640_v5 = vsub.f32 %v576_v55, %v448_v21  ;;  %v3291_v2 = vpack.c.bf16 %v766_v43, %v766_v43  ;;  %v587_v43 = vld [vmem:[%s4009_s23 + $0x198] sm:$0xff] }
  0x95   : > { %v3290_v16 = vpack.c.bf16 %v765_v44, %v765_v44  ;;  %v768_v45 = vadd.f32 %v704_v39, %v447_v34  ;;  %v767_v60 = vadd.f32 %v703_v11, %v446_v18  ;;  %v643_v61 = vsub.f32 %v579_v26, %v451_v20  ;;  %v458_v44 = vld [vmem:[%s4015_s27 + $0x190] sm:$0xff] }
  0x96   : > { %v706_v54 = vmul.f32 %v3785_v12, %v641_v30  ;;  %v705_v22 = vmul.f32 %v3785_v12, %v640_v5  ;;  %v642_v32 = vsub.f32 %v578_v48, %v450_v8  ;;  %v3375_v4 = vpack.c.bf16 %v4090_v29, %v4090_v29  ;;  %1087 = vst.msk [vmem:[%s4104_s8 + $0x94] sm:$0xf] %vm1049_vm0, %v3291_v2 }
  0x97   : > { %1673 = vrot.lane.b32.xlu1 %v3373_v38, %s3560_s19  ;;  %v3374_v56 = vpack.c.bf16 %v4094_v40, %v4094_v40  ;;  %1086 = vst.msk [vmem:[%s4104_s8 + $0x90] sm:$0xf] %vm1049_vm0, %v3290_v16  ;;  %v3293_v49 = vpack.c.bf16 %v768_v45, %v768_v45  ;;  %v3292_v62 = vpack.c.bf16 %v767_v60, %v767_v60  ;;  %v454_v40 = vld [vmem:[%s4015_s27 + $0x170] sm:$0xff] }
  0x98   : > { %1671 = vrot.lane.b32.xlu0 %v3372_v23, %s3560_s19  ;;  %v770_v34 = vadd.f32 %v706_v54, %v449_v24  ;;  %v769_v3 = vadd.f32 %v705_v22, %v448_v21  ;;  %v708_v35 = vmul.f32 %v3785_v12, %v643_v61  ;;  %v707_v29 = vmul.f32 %v3785_v12, %v642_v32  ;;  %v585_v24 = vld [vmem:[%s4009_s23 + $0x188] sm:$0xff]  ;;  %v459_v21 = vld [vmem:[%s4015_s27 + $0x198] sm:$0xff]  ;;  %v460_v54 = vld [vmem:[%s4015_s27 + $0x1a0] sm:$0xff] }
  0x99   : > { %v3377_v10 = vpack.c.bf16 %v4114_v28, %v4114_v28  ;;  %1089 = vst.msk [vmem:[%s4104_s8 + $0x9c] sm:$0xf] %vm1049_vm0, %v3293_v49  ;;  %1088 = vst.msk [vmem:[%s4104_s8 + $0x98] sm:$0xf] %vm1049_vm0, %v3292_v62  ;;  %v645_v18 = vsub.f32 %v581_v51, %v453_v9  ;;  %v644_v36 = vsub.f32 %v580_v6, %v452_v42  ;;  %v588_v22 = vld [vmem:[%s4009_s23 + $0x1a0] sm:$0xff] }
  0x9a   : > { %v3295_v41 = vpack.c.bf16 %v770_v34, %v770_v34  ;;  %v3294_v57 = vpack.c.bf16 %v769_v3, %v769_v3  ;;  %v772_v17 = vadd.f32 %v708_v35, %v451_v20  ;;  %v771_v25 = vadd.f32 %v707_v29, %v450_v8  ;;  %v462_v34 = vld [vmem:[%s4015_s27 + $0x1b0] sm:$0xff] }
  0x9b   : > { %1677 = vrot.lane.b32.xlu1 %v3375_v4, %s3560_s19  ;;  %v710_v28 = vmul.f32 %v3785_v12, %v645_v18  ;;  %v709_v37 = vmul.f32 %v3785_v12, %v644_v36  ;;  %v647_v50 = vsub.f32 %v583_v53, %v455_v19  ;;  %v646_v58 = vsub.f32 %v582_v63, %v454_v40  ;;  %v590_v3 = vld [vmem:[%s4009_s23 + $0x1b0] sm:$0xff]  ;;  %v4491_v53 = vld [vmem:[%s4462_s11 + $0x8] sm:$0xff] }
  0x9c   : > { %1675 = vrot.lane.b32.xlu0 %v3374_v56, %s3560_s19  ;;  %v3376_v13 = vpack.c.bf16 %v4116_v47, %v4116_v47  ;;  %1091 = vst.msk [vmem:[%s4104_s8 + $0xa4] sm:$0xf] %vm1049_vm0, %v3295_v41  ;;  %1090 = vst.msk [vmem:[%s4104_s8 + $0xa0] sm:$0xf] %vm1049_vm0, %v3294_v57  ;;  %v3297_v46 = vpack.c.bf16 %v772_v17, %v772_v17  ;;  %v3296_v31 = vpack.c.bf16 %v771_v25, %v771_v25  ;;  %v586_v47 = vld [vmem:[%s4009_s23 + $0x190] sm:$0xff] }
  0x9d   : > { %v1568_v55 = vpop.permute.xlu1 %1567  ;;  %v774_v38 = vadd.f32 %v710_v28, %v453_v9  ;;  %v773_v0 = vadd.f32 %v709_v37, %v452_v42  ;;  %v712_v27 = vmul.f32 %v3785_v12, %v647_v50  ;;  %v711_v20 = vmul.f32 %v3785_v12, %v646_v58  ;;  %v1564_v39 = vpop.permute.xlu0 %1563  ;;  %v589_v9 = vld [vmem:[%s4009_s23 + $0x1a8] sm:$0xff]  ;;  %v4474_v42 = vld [vmem:[%s4015_s27 + $0x1b8] sm:$0xff]  ;;  %v464_v50 = vld [vmem:[%s4015_s27 + $0x1c0] sm:$0xff] }
  0x9e   : > { %1758 = vst.msk [vmem:[%s4104_s8 + $0x8] sm:$0xf] %vm1755_vm1, %v1568_v55  ;;  %v3379_v11 = vpack.c.bf16 %v4145_v59, %v4145_v59  ;;  %v3378_v26 = vpack.c.bf16 %v4149_v15, %v4149_v15  ;;  %v649_v8 = vsub.f32 %v585_v24, %v457_v1  ;;  %v648_v48 = vsub.f32 %v584_v14, %v456_v33  ;;  %v461_v15 = vld [vmem:[%s4015_s27 + $0x1a8] sm:$0xff]  ;;  %v592_v58 = vld [vmem:[%s4009_s23 + $0x1c0] sm:$0xff] }
  0x9f   : > { %1093 = vst.msk [vmem:[%s4104_s8 + $0xac] sm:$0xf] %vm1049_vm0, %v3297_v46  ;;  %1092 = vst.msk [vmem:[%s4104_s8 + $0xa8] sm:$0xf] %vm1049_vm0, %v3296_v31  ;;  %1681 = vrot.lane.b32.xlu1 %v3377_v10, %s3560_s19  ;;  %v3299_v23 = vpack.c.bf16 %v774_v38, %v774_v38  ;;  %v3298_v59 = vpack.c.bf16 %v773_v0, %v773_v0  ;;  %v776_v30 = vadd.f32 %v712_v27, %v455_v19  ;;  %v591_v19 = vld [vmem:[%s4009_s23 + $0x1b8] sm:$0xff] }
  0xa0   : > { %1756 = vst.msk [vmem:[%s4104_s8] sm:$0xf] %vm1755_vm1, %v1564_v39  ;;  %v775_v5 = vadd.f32 %v711_v20, %v454_v40  ;;  %1679 = vrot.lane.b32.xlu0 %v3376_v13, %s3560_s19  ;;  %v714_v2 = vmul.f32 %v3785_v12, %v649_v8  ;;  %v713_v16 = vmul.f32 %v3785_v12, %v648_v48  ;;  %v4499_v10 = vld [vmem:[%s4462_s11] sm:$0xff]  ;;  %v465_v41 = vld [vmem:[%s4015_s27 + $0x1c8] sm:$0xff] }
  0xa1   : > { %v651_v45 = vsub.f32 %v587_v43, %v459_v21  ;;  %v650_v60 = vsub.f32 %v586_v47, %v458_v44  ;;  %v1570_v61 = vpop.permute.xlu1 %1569  ;;  %1095 = vst.msk [vmem:[%s4104_s8 + $0xb4] sm:$0xf] %vm1049_vm0, %v3299_v23  ;;  %1094 = vst.msk [vmem:[%s4104_s8 + $0xb0] sm:$0xf] %vm1049_vm0, %v3298_v59  ;;  %v3301_v32 = vpack.c.bf16 %v776_v30, %v776_v30  ;;  %v1566_v6 = vpop.permute.xlu0 %1565  ;;  %v593_v37 = vld [vmem:[%s4009_s23 + $0x1c8] sm:$0xff]  ;;  %v4517_v46 = vld [vmem:[%s4015_s27 + $0x1d8] sm:$0xff] }
  0xa2   : > { %v3300_v51 = vpack.c.bf16 %v775_v5, %v775_v5  ;;  %1759 = vst.msk [vmem:[%s4104_s8 + $0xc] sm:$0xf] %vm1755_vm1, %v1570_v61  ;;  %v778_v4 = vadd.f32 %v714_v2, %v457_v1  ;;  %v777_v56 = vadd.f32 %v713_v16, %v456_v33  ;;  %1757 = vst.msk [vmem:[%s4104_s8 + $0x4] sm:$0xf] %vm1755_vm1, %v1566_v6  ;;  %v595_v0 = vld [vmem:[%s4009_s23 + $0x1d8] sm:$0xff]  ;;  %v466_v27 = vld [vmem:[%s4015_s27 + $0x1d0] sm:$0xff] }
  0xa3   : > { %v716_v49 = vmul.f32 %v3785_v12, %v651_v45  ;;  %v715_v62 = vmul.f32 %v3785_v12, %v650_v60  ;;  %1685 = vrot.lane.b32.xlu1 %v3379_v11, %s3560_s19  ;;  %v3381_v35 = vpack.c.bf16 %v4158_v52, %v4158_v52  ;;  %v3380_v29 = vpack.c.bf16 %v4160_v7, %v4160_v7  ;;  %v594_v20 = vld [vmem:[%s4009_s23 + $0x1d0] sm:$0xff]  ;;  %v4537_v8 = vld [vmem:[%s4462_s11 + $0x28] sm:$0xff]  ;;  %v471_v6 = vld [vmem:[%s4015_s27 + $0x1f8] sm:$0xff] }
  0xa4   : > { %1097 = vst.msk [vmem:[%s4104_s8 + $0xbc] sm:$0xf] %vm1049_vm0, %v3301_v32  ;;  %1096 = vst.msk [vmem:[%s4104_s8 + $0xb8] sm:$0xf] %vm1049_vm0, %v3300_v51  ;;  %v653_v40 = vsub.f32 %v589_v9, %v461_v15  ;;  %v652_v63 = vsub.f32 %v588_v22, %v460_v54  ;;  %1683 = vrot.lane.b32.xlu0 %v3378_v26, %s3560_s19  ;;  %v3303_v52 = vpack.c.bf16 %v778_v4, %v778_v4  ;;  %v1822_v47 = vld [vmem:[%s4462_s11 + $0x10] sm:$0xff] }
  0xa5   : > { %v3302_v18 = vpack.c.bf16 %v777_v56, %v777_v56  ;;  %v780_v7 = vadd.f32 %v716_v49, %v459_v21  ;;  %v779_v36 = vadd.f32 %v715_v62, %v458_v44  ;;  %v1574_v57 = vpop.permute.xlu1 %1573  ;;  %v655_v1 = vsub.f32 %v591_v19, %v4474_v42  ;;  %v1572_v24 = vpop.permute.xlu0 %1571  ;;  %v1823_v44 = vld [vmem:[%s4462_s11 + $0x18] sm:$0xff]  ;;  %v469_v5 = vld [vmem:[%s4015_s27 + $0x1e8] sm:$0xff]  ;;  %v596_v22 = vld [vmem:[%s4009_s23 + $0x1e0] sm:$0xff] }
  0xa6   : > { %v718_v17 = vmul.f32 %v3785_v12, %v653_v40  ;;  %v717_v25 = vmul.f32 %v3785_v12, %v652_v63  ;;  %v654_v28 = vsub.f32 %v590_v3, %v462_v34  ;;  %1761 = vst.msk [vmem:[%s4104_s8 + $0x14] sm:$0xf] %vm1755_vm1, %v1574_v57  ;;  %v3383_v33 = vpack.c.bf16 %v4491_v53, %v4491_v53  ;;  %v597_v9 = vld [vmem:[%s4009_s23 + $0x1e8] sm:$0xff]  ;;  %v599_v19 = vld [vmem:[%s4009_s23 + $0x1f8] sm:$0xff]  ;;  %v598_v3 = vld [vmem:[%s4009_s23 + $0x1f0] sm:$0xff] }
  0xa7   : > { %1099 = vst.msk [vmem:[%s4104_s8 + $0xc4] sm:$0xf] %vm1049_vm0, %v3303_v52  ;;  %1098 = vst.msk [vmem:[%s4104_s8 + $0xc0] sm:$0xf] %vm1049_vm0, %v3302_v18  ;;  %v3305_v14 = vpack.c.bf16 %v780_v7, %v780_v7  ;;  %v3304_v13 = vpack.c.bf16 %v779_v36, %v779_v36  ;;  %1689 = vrot.lane.b32.xlu1 %v3381_v35, %s3560_s19  ;;  %v720_v55 = vmul.f32 %v3785_v12, %v655_v1  ;;  %v1824_v53 = vld [vmem:[%s4462_s11 + $0x20] sm:$0xff] }
  0xa8   : > { %1760 = vst.msk [vmem:[%s4104_s8 + $0x10] sm:$0xf] %vm1755_vm1, %v1572_v24  ;;  %v782_v31 = vadd.f32 %v718_v17, %v461_v15  ;;  %v781_v21 = vadd.f32 %v717_v25, %v460_v54  ;;  %v719_v38 = vmul.f32 %v3785_v12, %v654_v28  ;;  %1687 = vrot.lane.b32.xlu0 %v3380_v29, %s3560_s19  ;;  %v468_v54 = vld [vmem:[%s4015_s27 + $0x1e0] sm:$0xff]  ;;  %v1826_v24 = vld [vmem:[%s4462_s11 + $0x30] sm:$0xff] }
  0xa9   : > { %v3382_v43 = vpack.c.bf16 %v4499_v10, %v4499_v10  ;;  %1101 = vst.msk [vmem:[%s4104_s8 + $0xcc] sm:$0xf] %vm1049_vm0, %v3305_v14  ;;  %1100 = vst.msk [vmem:[%s4104_s8 + $0xc8] sm:$0xf] %vm1049_vm0, %v3304_v13  ;;  %v657_v39 = vsub.f32 %v593_v37, %v465_v41  ;;  %v656_v11 = vsub.f32 %v592_v58, %v464_v50  ;;  %v1578_v26 = vpop.permute.xlu1 %1577  ;;  %v1576_v15 = vpop.permute.xlu0 %1575 }
  0xaa   : > { %v3307_v48 = vpack.c.bf16 %v782_v31, %v782_v31  ;;  %v3306_v23 = vpack.c.bf16 %v781_v21, %v781_v21  ;;  %v784_v59 = vadd.f32 %v720_v55, %v4474_v42  ;;  %v783_v30 = vadd.f32 %v719_v38, %v462_v34  ;;  %1763 = vst.msk [vmem:[%s4104_s8 + $0x1c] sm:$0xf] %vm1755_vm1, %v1578_v26  ;;  %v470_v34 = vld [vmem:[%s4015_s27 + $0x1f0] sm:$0xff] }
  0xab   : > { %v722_v2 = vmul.f32 %v3785_v12, %v657_v39  ;;  %v721_v16 = vmul.f32 %v3785_v12, %v656_v11  ;;  %v659_v45 = vsub.f32 %v595_v0, %v4517_v46  ;;  %v658_v60 = vsub.f32 %v594_v20, %v466_v27  ;;  %1762 = vst.msk [vmem:[%s4104_s8 + $0x18] sm:$0xf] %vm1755_vm1, %v1576_v15  ;;  %v1829_v20 = vld [vmem:[%s4462_s11 + $0x48] sm:$0xff] }
  0xac   : > { %2078 = vrot.lane.b32.xlu1 %v3383_v33, %s3561_s13  ;;  %v3385_v61 = vpack.c.bf16 %v1823_v44, %v1823_v44  ;;  %v3384_v32 = vpack.c.bf16 %v1822_v47, %v1822_v47  ;;  %1103 = vst.msk [vmem:[%s4104_s8 + $0xd4] sm:$0xf] %vm1049_vm0, %v3307_v48  ;;  %1102 = vst.msk [vmem:[%s4104_s8 + $0xd0] sm:$0xf] %vm1049_vm0, %v3306_v23  ;;  %v3309_v51 = vpack.c.bf16 %v784_v59, %v784_v59  ;;  %v1828_v44 = vld [vmem:[%s4462_s11 + $0x40] sm:$0xff] }
  0xad   : > { %v3308_v42 = vpack.c.bf16 %v783_v30, %v783_v30  ;;  %2076 = vrot.lane.b32.xlu0 %v3382_v43, %s3561_s13  ;;  %v786_v4 = vadd.f32 %v722_v2, %v465_v41  ;;  %v785_v56 = vadd.f32 %v721_v16, %v464_v50  ;;  %v724_v49 = vmul.f32 %v3785_v12, %v659_v45  ;;  %v1582_v35 = vpop.permute.xlu1 %1581  ;;  %v1580_v10 = vpop.permute.xlu0 %1579  ;;  %v1827_v41 = vld [vmem:[%s4462_s11 + $0x38] sm:$0xff]  ;;  %v1830_v59 = vld [vmem:[%s4462_s11 + $0x50] sm:$0xff]  ;;  %v1833_v2 = vld [vmem:[%s4462_s11 + $0x68] sm:$0xff] }
  0xae   : > { %v723_v62 = vmul.f32 %v3785_v12, %v658_v60  ;;  %v3387_v29 = vpack.c.bf16 %v4537_v8, %v4537_v8  ;;  %1105 = vst.msk [vmem:[%s4104_s8 + $0xdc] sm:$0xf] %vm1049_vm0, %v3309_v51  ;;  %v661_v40 = vsub.f32 %v597_v9, %v469_v5  ;;  %v660_v63 = vsub.f32 %v596_v22, %v468_v54  ;;  %v1831_v48 = vld [vmem:[%s4462_s11 + $0x58] sm:$0xff]  ;;  %v1832_v45 = vld [vmem:[%s4462_s11 + $0x60] sm:$0xff] }
  0xaf   : > { %1104 = vst.msk [vmem:[%s4104_s8 + $0xd8] sm:$0xf] %vm1049_vm0, %v3308_v42  ;;  %v3311_v52 = vpack.c.bf16 %v786_v4, %v786_v4  ;;  %v3310_v18 = vpack.c.bf16 %v785_v56, %v785_v56  ;;  %v788_v7 = vadd.f32 %v724_v49, %v4517_v46  ;;  %v663_v25 = vsub.f32 %v599_v19, %v471_v6  ;;  %v1835_v22 = vld [vmem:[%s4462_s11 + $0x78] sm:$0xff]  ;;  %v1837_v4 = vld [vmem:[%s4462_s11 + $0x88] sm:$0xff]  ;;  %v1836_v49 = vld [vmem:[%s4462_s11 + $0x80] sm:$0xff] }
  0xb0   : > { %1765 = vst.msk [vmem:[%s4104_s8 + $0x24] sm:$0xf] %vm1755_vm1, %v1582_v35  ;;  %v787_v36 = vadd.f32 %v723_v62, %v466_v27  ;;  %1764 = vst.msk [vmem:[%s4104_s8 + $0x20] sm:$0xf] %vm1755_vm1, %v1580_v10  ;;  %2082 = vrot.lane.b32.xlu1 %v3385_v61, %s3561_s13  ;;  %v726_v57 = vmul.f32 %v3785_v12, %v661_v40  ;;  %v725_v17 = vmul.f32 %v3785_v12, %v660_v63  ;;  %v1841_v10 = vld [vmem:[%s4462_s11 + $0xa8] sm:$0xff] }
  0xb1   : > { %v662_v1 = vsub.f32 %v598_v3, %v470_v34  ;;  %2080 = vrot.lane.b32.xlu0 %v3384_v32, %s3561_s13  ;;  %v3386_v28 = vpack.c.bf16 %v1824_v53, %v1824_v53  ;;  %1107 = vst.msk [vmem:[%s4104_s8 + $0xe4] sm:$0xf] %vm1049_vm0, %v3311_v52  ;;  %1106 = vst.msk [vmem:[%s4104_s8 + $0xe0] sm:$0xf] %vm1049_vm0, %v3310_v18  ;;  %v3313_v37 = vpack.c.bf16 %v788_v7, %v788_v7  ;;  %v1586_v58 = vpop.permute.xlu1 %1585  ;;  %v1584_v31 = vpop.permute.xlu0 %1583  ;;  %v1834_v32 = vld [vmem:[%s4462_s11 + $0x70] sm:$0xff] }
  0xb2   : > { %v3312_v50 = vpack.c.bf16 %v787_v36, %v787_v36  ;;  %v790_v33 = vadd.f32 %v726_v57, %v469_v5  ;;  %v789_v14 = vadd.f32 %v725_v17, %v468_v54  ;;  %v728_v13 = vmul.f32 %v3785_v12, %v663_v25  ;;  %1767 = vst.msk [vmem:[%s4104_s8 + $0x2c] sm:$0xf] %vm1755_vm1, %v1586_v58  ;;  %v1839_v3 = vld [vmem:[%s4462_s11 + $0x98] sm:$0xff]  ;;  %v1840_v18 = vld [vmem:[%s4462_s11 + $0xa0] sm:$0xff]  ;;  %v1842_v25 = vld [vmem:[%s4462_s11 + $0xb0] sm:$0xff] }
  0xb3   : > { %v727_v46 = vmul.f32 %v3785_v12, %v662_v1  ;;  %v3389_v21 = vpack.c.bf16 %v1827_v41, %v1827_v41  ;;  %1109 = vst.msk [vmem:[%s4104_s8 + $0xec] sm:$0xf] %vm1049_vm0, %v3313_v37  ;;  %v3388_v27 = vpack.c.bf16 %v1826_v24, %v1826_v24  ;;  %v3391_v26 = vpack.c.bf16 %v1829_v20, %v1829_v20  ;;  %v1843_v57 = vld [vmem:[%s4462_s11 + $0xb8] sm:$0xff]  ;;  %v1844_v24 = vld [vmem:[%s4462_s11 + $0xc0] sm:$0xff] }
  0xb4   : > { %1108 = vst.msk [vmem:[%s4104_s8 + $0xe8] sm:$0xf] %vm1049_vm0, %v3312_v50  ;;  %2086 = vrot.lane.b32.xlu1 %v3387_v29, %s3561_s13  ;;  %v3315_v55 = vpack.c.bf16 %v790_v33, %v790_v33  ;;  %v3314_v38 = vpack.c.bf16 %v789_v14, %v789_v14  ;;  %v792_v12 = vadd.f32 %v728_v13, %v471_v6  ;;  %v1838_v29 = vld [vmem:[%s4462_s11 + $0x90] sm:$0xff]  ;;  %v1845_v50 = vld [vmem:[%s4462_s11 + $0xc8] sm:$0xff] }
  0xb5   : > { %1766 = vst.msk [vmem:[%s4104_s8 + $0x28] sm:$0xf] %vm1755_vm1, %v1584_v31  ;;  %v791_v0 = vadd.f32 %v727_v46, %v470_v34  ;;  %2084 = vrot.lane.b32.xlu0 %v3386_v28, %s3561_s13  ;;  %v1590_v43 = vpop.permute.xlu1 %1589  ;;  %v1588_v11 = vpop.permute.xlu0 %1587  ;;  %v3390_v8 = vpack.c.bf16 %v1828_v44, %v1828_v44  ;;  %v3393_v5 = vpack.c.bf16 %v1831_v48, %v1831_v48  ;;  %v1847_v46 = vld [vmem:[%s4462_s11 + $0xd8] sm:$0xff]  ;;  %v1848_v20 = vld [vmem:[%s4462_s11 + $0xe0] sm:$0xff] }
  0xb6   : > { %1111 = vst.msk [vmem:[%s4104_s8 + $0xf4] sm:$0xf] %vm1049_vm0, %v3315_v55  ;;  %1110 = vst.msk [vmem:[%s4104_s8 + $0xf0] sm:$0xf] %vm1049_vm0, %v3314_v38  ;;  %v3317_v47 = vpack.c.bf16 %v792_v12, %v792_v12  ;;  %v3392_v15 = vpack.c.bf16 %v1830_v59, %v1830_v59  ;;  %v3395_v9 = vpack.c.bf16 %v1833_v2, %v1833_v2  ;;  %v1853_v59 = vld [vmem:[%s4462_s11 + $0x108] sm:$0xff] }
  0xb7   : > { %v3316_v39 = vpack.c.bf16 %v791_v0, %v791_v0  ;;  %1769 = vst.msk [vmem:[%s4104_s8 + $0x34] sm:$0xf] %vm1755_vm1, %v1590_v43  ;;  %1768 = vst.msk [vmem:[%s4104_s8 + $0x30] sm:$0xf] %vm1755_vm1, %v1588_v11  ;;  %v3394_v54 = vpack.c.bf16 %v1832_v45, %v1832_v45  ;;  %v3397_v42 = vpack.c.bf16 %v1835_v22, %v1835_v22  ;;  %v1849_v0 = vld [vmem:[%s4462_s11 + $0xe8] sm:$0xff]  ;;  %v1855_v45 = vld [vmem:[%s4462_s11 + $0x118] sm:$0xff] }
  0xb8   : > { %2090 = vrot.lane.b32.xlu1 %v3389_v21, %s3561_s13  ;;  %1113 = vst.msk [vmem:[%s4104_s8 + $0xfc] sm:$0xf] %vm1049_vm0, %v3317_v47  ;;  %v3396_v6 = vpack.c.bf16 %v1834_v32, %v1834_v32  ;;  %v3399_v19 = vpack.c.bf16 %v1837_v4, %v1837_v4  ;;  %v3398_v34 = vpack.c.bf16 %v1836_v49, %v1836_v49  ;;  %v1846_v21 = vld [vmem:[%s4462_s11 + $0xd0] sm:$0xff]  ;;  %v1857_v32 = vld [vmem:[%s4462_s11 + $0x128] sm:$0xff] }
  0xb9   : > { %1112 = vst.msk [vmem:[%s4104_s8 + $0xf8] sm:$0xf] %vm1049_vm0, %v3316_v39  ;;  %2088 = vrot.lane.b32.xlu0 %v3388_v27, %s3561_s13  ;;  %v1594_v23 = vpop.permute.xlu1 %1593  ;;  %v1592_v30 = vpop.permute.xlu0 %1591  ;;  %v3401_v40 = vpack.c.bf16 %v1839_v3, %v1839_v3  ;;  %v3400_v63 = vpack.c.bf16 %v1838_v29, %v1838_v29  ;;  %v3403_v36 = vpack.c.bf16 %v1841_v10, %v1841_v10  ;;  %v1851_v39 = vld [vmem:[%s4462_s11 + $0xf8] sm:$0xff]  ;;  %v1861_v29 = vld [vmem:[%s4462_s11 + $0x148] sm:$0xff] }
  0xba   : > { %1771 = vst.msk [vmem:[%s4104_s8 + $0x3c] sm:$0xf] %vm1755_vm1, %v1594_v23  ;;  %1770 = vst.msk [vmem:[%s4104_s8 + $0x38] sm:$0xf] %vm1755_vm1, %v1592_v30  ;;  %v3402_v41 = vpack.c.bf16 %v1840_v18, %v1840_v18  ;;  %v3405_v28 = vpack.c.bf16 %v1843_v57, %v1843_v57  ;;  %v3404_v37 = vpack.c.bf16 %v1842_v25, %v1842_v25  ;;  %v1859_v49 = vld [vmem:[%s4462_s11 + $0x138] sm:$0xff]  ;;  %v1865_v25 = vld [vmem:[%s4462_s11 + $0x168] sm:$0xff] }
  0xbb   : > { %v3407_v14 = vpack.c.bf16 %v1845_v50, %v1845_v50  ;;  %v3406_v13 = vpack.c.bf16 %v1844_v24, %v1844_v24  ;;  %v3409_v38 = vpack.c.bf16 %v1847_v46, %v1847_v46  ;;  %v3408_v12 = vpack.c.bf16 %v1846_v21, %v1846_v21  ;;  %v1863_v18 = vld [vmem:[%s4462_s11 + $0x158] sm:$0xff]  ;;  %v1869_v21 = vld [vmem:[%s4462_s11 + $0x188] sm:$0xff] }
  0xbc   : > { %2094 = vrot.lane.b32.xlu1 %v3391_v26, %s3561_s13  ;;  %v3411_v44 = vpack.c.bf16 %v1849_v0, %v1849_v0  ;;  %v3410_v47 = vpack.c.bf16 %v1848_v20, %v1848_v20  ;;  %v1850_v26 = vld [vmem:[%s4462_s11 + $0xf0] sm:$0xff]  ;;  %v3413_v48 = vpack.c.bf16 %v1851_v39, %v1851_v39  ;;  %v3415_v2 = vpack.c.bf16 %v1853_v59, %v1853_v59  ;;  %v1867_v24 = vld [vmem:[%s4462_s11 + $0x178] sm:$0xff] }
  0xbd   : > { %2092 = vrot.lane.b32.xlu0 %v3390_v8, %s3561_s13  ;;  %v1598_v16 = vpop.permute.xlu1 %1597  ;;  %v1596_v60 = vpop.permute.xlu0 %1595  ;;  %v3412_v23 = vpack.c.bf16 %v1850_v26, %v1850_v26  ;;  %v3417_v22 = vpack.c.bf16 %v1855_v45, %v1855_v45  ;;  %v3419_v4 = vpack.c.bf16 %v1857_v32, %v1857_v32  ;;  %v3421_v3 = vpack.c.bf16 %v1859_v49, %v1859_v49  ;;  %v1871_v20 = vld [vmem:[%s4462_s11 + $0x198] sm:$0xff]  ;;  %v1873_v26 = vld [vmem:[%s4462_s11 + $0x1a8] sm:$0xff] }
  0xbe   : > { %1773 = vst.msk [vmem:[%s4104_s8 + $0x44] sm:$0xf] %vm1755_vm1, %v1598_v16  ;;  %1772 = vst.msk [vmem:[%s4104_s8 + $0x40] sm:$0xf] %vm1755_vm1, %v1596_v60  ;;  %v3423_v10 = vpack.c.bf16 %v1861_v29, %v1861_v29  ;;  %v3425_v57 = vpack.c.bf16 %v1863_v18, %v1863_v18  ;;  %v3427_v50 = vpack.c.bf16 %v1865_v25, %v1865_v25 }
  0xbf   : > { %v3429_v46 = vpack.c.bf16 %v1867_v24, %v1867_v24  ;;  %v3431_v0 = vpack.c.bf16 %v1869_v21, %v1869_v21  ;;  %v3433_v39 = vpack.c.bf16 %v1871_v20, %v1871_v20  ;;  %v3435_v59 = vpack.c.bf16 %v1873_v26, %v1873_v26 }
  0xc0   : > { %2098 = vrot.lane.b32.xlu1 %v3393_v5, %s3561_s13  ;;  %v1852_v5 = vld [vmem:[%s4462_s11 + $0x100] sm:$0xff] }
  0xc1   : > { %2096 = vrot.lane.b32.xlu0 %v3392_v15, %s3561_s13  ;;  %v1602_v61 = vpop.permute.xlu1 %1601  ;;  %v1600_v51 = vpop.permute.xlu0 %1599  ;;  %v3414_v16 = vpack.c.bf16 %v1852_v5, %v1852_v5  ;;  %v1875_v5 = vld [vmem:[%s4462_s11 + $0x1b8] sm:$0xff] }
  0xc2   : > { %1775 = vst.msk [vmem:[%s4104_s8 + $0x4c] sm:$0xf] %vm1755_vm1, %v1602_v61  ;;  %1774 = vst.msk [vmem:[%s4104_s8 + $0x48] sm:$0xf] %vm1755_vm1, %v1600_v51  ;;  %v3437_v45 = vpack.c.bf16 %v1875_v5, %v1875_v5 }
  0xc4   : > { %2102 = vrot.lane.b32.xlu1 %v3395_v9, %s3561_s13  ;;  %v1854_v9 = vld [vmem:[%s4462_s11 + $0x110] sm:$0xff] }
  0xc5   : > { %2100 = vrot.lane.b32.xlu0 %v3394_v54, %s3561_s13  ;;  %v1606_v56 = vpop.permute.xlu1 %1605  ;;  %v1604_v62 = vpop.permute.xlu0 %1603  ;;  %v3416_v61 = vpack.c.bf16 %v1854_v9, %v1854_v9  ;;  %v1877_v9 = vld [vmem:[%s4462_s11 + $0x1c8] sm:$0xff] }
  0xc6   : > { %1777 = vst.msk [vmem:[%s4104_s8 + $0x54] sm:$0xf] %vm1755_vm1, %v1606_v56  ;;  %1776 = vst.msk [vmem:[%s4104_s8 + $0x50] sm:$0xf] %vm1755_vm1, %v1604_v62  ;;  %v3439_v32 = vpack.c.bf16 %v1877_v9, %v1877_v9 }
  0xc8   : > { %2106 = vrot.lane.b32.xlu1 %v3397_v42, %s3561_s13  ;;  %v1856_v42 = vld [vmem:[%s4462_s11 + $0x120] sm:$0xff] }
  0xc9   : > { %2104 = vrot.lane.b32.xlu0 %v3396_v6, %s3561_s13  ;;  %v1610_v35 = vpop.permute.xlu1 %1609  ;;  %v1608_v53 = vpop.permute.xlu0 %1607  ;;  %v3418_v56 = vpack.c.bf16 %v1856_v42, %v1856_v42  ;;  %v1879_v42 = vld [vmem:[%s4462_s11 + $0x1d8] sm:$0xff] }
  0xca   : > { %1779 = vst.msk [vmem:[%s4104_s8 + $0x5c] sm:$0xf] %vm1755_vm1, %v1610_v35  ;;  %1778 = vst.msk [vmem:[%s4104_s8 + $0x58] sm:$0xf] %vm1755_vm1, %v1608_v53  ;;  %v3441_v49 = vpack.c.bf16 %v1879_v42, %v1879_v42 }
  0xcc   : > { %2110 = vrot.lane.b32.xlu1 %v3399_v19, %s3561_s13  ;;  %v1858_v19 = vld [vmem:[%s4462_s11 + $0x130] sm:$0xff] }
  0xcd   : > { %2108 = vrot.lane.b32.xlu0 %v3398_v34, %s3561_s13  ;;  %v1614_v52 = vpop.permute.xlu1 %1613  ;;  %v1612_v7 = vpop.permute.xlu0 %1611  ;;  %v3420_v35 = vpack.c.bf16 %v1858_v19, %v1858_v19  ;;  %v1881_v19 = vld [vmem:[%s4462_s11 + $0x1e8] sm:$0xff] }
  0xce   : > { %1781 = vst.msk [vmem:[%s4104_s8 + $0x64] sm:$0xf] %vm1755_vm1, %v1614_v52  ;;  %1780 = vst.msk [vmem:[%s4104_s8 + $0x60] sm:$0xf] %vm1755_vm1, %v1612_v7  ;;  %v3443_v29 = vpack.c.bf16 %v1881_v19, %v1881_v19 }
  0xd0   : > { %2114 = vrot.lane.b32.xlu1 %v3401_v40, %s3561_s13  ;;  %v1860_v40 = vld [vmem:[%s4462_s11 + $0x140] sm:$0xff] }
  0xd1   : > { %2112 = vrot.lane.b32.xlu0 %v3400_v63, %s3561_s13  ;;  %v1618_v17 = vpop.permute.xlu1 %1617  ;;  %v1616_v1 = vpop.permute.xlu0 %1615  ;;  %v3422_v52 = vpack.c.bf16 %v1860_v40, %v1860_v40  ;;  %v1883_v40 = vld [vmem:[%s4462_s11 + $0x1f8] sm:$0xff] }
  0xd2   : > { %1783 = vst.msk [vmem:[%s4104_s8 + $0x6c] sm:$0xf] %vm1755_vm1, %v1618_v17  ;;  %1782 = vst.msk [vmem:[%s4104_s8 + $0x68] sm:$0xf] %vm1755_vm1, %v1616_v1  ;;  %v3445_v18 = vpack.c.bf16 %v1883_v40, %v1883_v40 }
  0xd4   : > { %2118 = vrot.lane.b32.xlu1 %v3403_v36, %s3561_s13  ;;  %v1862_v36 = vld [vmem:[%s4462_s11 + $0x150] sm:$0xff] }
  0xd5   : > { %2116 = vrot.lane.b32.xlu0 %v3402_v41, %s3561_s13  ;;  %v1622_v58 = vpop.permute.xlu1 %1621  ;;  %v1620_v33 = vpop.permute.xlu0 %1619  ;;  %v3424_v17 = vpack.c.bf16 %v1862_v36, %v1862_v36  ;;  %v2334_v36 = vld [vmem:[%s4827_s16 + $0x8] sm:$0xff] }
  0xd6   : > { %1785 = vst.msk [vmem:[%s4104_s8 + $0x74] sm:$0xf] %vm1755_vm1, %v1622_v58  ;;  %1784 = vst.msk [vmem:[%s4104_s8 + $0x70] sm:$0xf] %vm1755_vm1, %v1620_v33  ;;  %v3447_v25 = vpack.c.bf16 %v2334_v36, %v2334_v36 }
  0xd8   : > { %2122 = vrot.lane.b32.xlu1 %v3405_v28, %s3561_s13  ;;  %v1864_v28 = vld [vmem:[%s4462_s11 + $0x160] sm:$0xff] }
  0xd9   : > { %2120 = vrot.lane.b32.xlu0 %v3404_v37, %s3561_s13  ;;  %v1626_v31 = vpop.permute.xlu1 %1625  ;;  %v1624_v55 = vpop.permute.xlu0 %1623  ;;  %v3426_v58 = vpack.c.bf16 %v1864_v28, %v1864_v28  ;;  %v2336_v28 = vld [vmem:[%s4827_s16 + $0x18] sm:$0xff] }
  0xda   : > { %1787 = vst.msk [vmem:[%s4104_s8 + $0x7c] sm:$0xf] %vm1755_vm1, %v1626_v31  ;;  %1786 = vst.msk [vmem:[%s4104_s8 + $0x78] sm:$0xf] %vm1755_vm1, %v1624_v55  ;;  %v3449_v24 = vpack.c.bf16 %v2336_v28, %v2336_v28 }
  0xdc   : > { %2126 = vrot.lane.b32.xlu1 %v3407_v14, %s3561_s13  ;;  %v1866_v14 = vld [vmem:[%s4462_s11 + $0x170] sm:$0xff] }
  0xdd   : > { %2124 = vrot.lane.b32.xlu0 %v3406_v13, %s3561_s13  ;;  %v1630_v27 = vpop.permute.xlu1 %1629  ;;  %v1628_v43 = vpop.permute.xlu0 %1627  ;;  %v3428_v31 = vpack.c.bf16 %v1866_v14, %v1866_v14  ;;  %v2338_v14 = vld [vmem:[%s4827_s16 + $0x28] sm:$0xff] }
  0xde   : > { %1789 = vst.msk [vmem:[%s4104_s8 + $0x84] sm:$0xf] %vm1755_vm1, %v1630_v27  ;;  %1788 = vst.msk [vmem:[%s4104_s8 + $0x80] sm:$0xf] %vm1755_vm1, %v1628_v43  ;;  %v3451_v21 = vpack.c.bf16 %v2338_v14, %v2338_v14 }
  0xe0   : > { %2130 = vrot.lane.b32.xlu1 %v3409_v38, %s3561_s13  ;;  %v1868_v38 = vld [vmem:[%s4462_s11 + $0x180] sm:$0xff] }
  0xe1   : > { %2128 = vrot.lane.b32.xlu0 %v3408_v12, %s3561_s13  ;;  %v1634_v11 = vpop.permute.xlu1 %1633  ;;  %v1632_v8 = vpop.permute.xlu0 %1631  ;;  %v3430_v27 = vpack.c.bf16 %v1868_v38, %v1868_v38  ;;  %v2340_v38 = vld [vmem:[%s4827_s16 + $0x38] sm:$0xff] }
  0xe2   : > { %1791 = vst.msk [vmem:[%s4104_s8 + $0x8c] sm:$0xf] %vm1755_vm1, %v1634_v11  ;;  %1790 = vst.msk [vmem:[%s4104_s8 + $0x88] sm:$0xf] %vm1755_vm1, %v1632_v8  ;;  %v3453_v20 = vpack.c.bf16 %v2340_v38, %v2340_v38 }
  0xe4   : > { %2134 = vrot.lane.b32.xlu1 %v3411_v44, %s3561_s13  ;;  %v1870_v44 = vld [vmem:[%s4462_s11 + $0x190] sm:$0xff] }
  0xe5   : > { %2132 = vrot.lane.b32.xlu0 %v3410_v47, %s3561_s13  ;;  %v1638_v30 = vpop.permute.xlu1 %1637  ;;  %v1636_v15 = vpop.permute.xlu0 %1635  ;;  %v3432_v11 = vpack.c.bf16 %v1870_v44, %v1870_v44  ;;  %v2342_v44 = vld [vmem:[%s4827_s16 + $0x48] sm:$0xff] }
  0xe6   : > { %1793 = vst.msk [vmem:[%s4104_s8 + $0x94] sm:$0xf] %vm1755_vm1, %v1638_v30  ;;  %1792 = vst.msk [vmem:[%s4104_s8 + $0x90] sm:$0xf] %vm1755_vm1, %v1636_v15  ;;  %v3455_v26 = vpack.c.bf16 %v2342_v44, %v2342_v44 }
  0xe8   : > { %2138 = vrot.lane.b32.xlu1 %v3413_v48, %s3561_s13  ;;  %v1872_v48 = vld [vmem:[%s4462_s11 + $0x1a0] sm:$0xff] }
  0xe9   : > { %2136 = vrot.lane.b32.xlu0 %v3412_v23, %s3561_s13  ;;  %v1642_v60 = vpop.permute.xlu1 %1641  ;;  %v1640_v54 = vpop.permute.xlu0 %1639  ;;  %v3434_v30 = vpack.c.bf16 %v1872_v48, %v1872_v48  ;;  %v2344_v48 = vld [vmem:[%s4827_s16 + $0x58] sm:$0xff] }
  0xea   : > { %1795 = vst.msk [vmem:[%s4104_s8 + $0x9c] sm:$0xf] %vm1755_vm1, %v1642_v60  ;;  %1794 = vst.msk [vmem:[%s4104_s8 + $0x98] sm:$0xf] %vm1755_vm1, %v1640_v54  ;;  %v3457_v5 = vpack.c.bf16 %v2344_v48, %v2344_v48 }
  0xec   : > { %2142 = vrot.lane.b32.xlu1 %v3415_v2, %s3561_s13  ;;  %v1874_v2 = vld [vmem:[%s4462_s11 + $0x1b0] sm:$0xff] }
  0xed   : > { %2140 = vrot.lane.b32.xlu0 %v3414_v16, %s3561_s13  ;;  %v1646_v51 = vpop.permute.xlu1 %1645  ;;  %v1644_v6 = vpop.permute.xlu0 %1643  ;;  %v3436_v60 = vpack.c.bf16 %v1874_v2, %v1874_v2  ;;  %v2346_v2 = vld [vmem:[%s4827_s16 + $0x68] sm:$0xff] }
  0xee   : > { %1797 = vst.msk [vmem:[%s4104_s8 + $0xa4] sm:$0xf] %vm1755_vm1, %v1646_v51  ;;  %1796 = vst.msk [vmem:[%s4104_s8 + $0xa0] sm:$0xf] %vm1755_vm1, %v1644_v6  ;;  %v3459_v9 = vpack.c.bf16 %v2346_v2, %v2346_v2 }
  0xf0   : > { %2146 = vrot.lane.b32.xlu1 %v3417_v22, %s3561_s13  ;;  %v1876_v22 = vld [vmem:[%s4462_s11 + $0x1c0] sm:$0xff] }
  0xf1   : > { %2144 = vrot.lane.b32.xlu0 %v3416_v61, %s3561_s13  ;;  %v1650_v62 = vpop.permute.xlu1 %1649  ;;  %v1648_v34 = vpop.permute.xlu0 %1647  ;;  %v3438_v51 = vpack.c.bf16 %v1876_v22, %v1876_v22  ;;  %v2348_v22 = vld [vmem:[%s4827_s16 + $0x78] sm:$0xff] }
  0xf2   : > { %1799 = vst.msk [vmem:[%s4104_s8 + $0xac] sm:$0xf] %vm1755_vm1, %v1650_v62  ;;  %1798 = vst.msk [vmem:[%s4104_s8 + $0xa8] sm:$0xf] %vm1755_vm1, %v1648_v34  ;;  %v3461_v42 = vpack.c.bf16 %v2348_v22, %v2348_v22 }
  0xf4   : > { %2150 = vrot.lane.b32.xlu1 %v3419_v4, %s3561_s13  ;;  %v1878_v4 = vld [vmem:[%s4462_s11 + $0x1d0] sm:$0xff] }
  0xf5   : > { %2148 = vrot.lane.b32.xlu0 %v3418_v56, %s3561_s13  ;;  %v1654_v53 = vpop.permute.xlu1 %1653  ;;  %v1652_v63 = vpop.permute.xlu0 %1651  ;;  %v3440_v62 = vpack.c.bf16 %v1878_v4, %v1878_v4  ;;  %v2350_v4 = vld [vmem:[%s4827_s16 + $0x88] sm:$0xff] }
  0xf6   : > { %1801 = vst.msk [vmem:[%s4104_s8 + $0xb4] sm:$0xf] %vm1755_vm1, %v1654_v53  ;;  %1800 = vst.msk [vmem:[%s4104_s8 + $0xb0] sm:$0xf] %vm1755_vm1, %v1652_v63  ;;  %v3463_v19 = vpack.c.bf16 %v2350_v4, %v2350_v4 }
  0xf8   : > { %2154 = vrot.lane.b32.xlu1 %v3421_v3, %s3561_s13  ;;  %v1880_v3 = vld [vmem:[%s4462_s11 + $0x1e0] sm:$0xff] }
  0xf9   : > { %2152 = vrot.lane.b32.xlu0 %v3420_v35, %s3561_s13  ;;  %v1658_v7 = vpop.permute.xlu1 %1657  ;;  %v1656_v41 = vpop.permute.xlu0 %1655  ;;  %v3442_v53 = vpack.c.bf16 %v1880_v3, %v1880_v3  ;;  %v2352_v3 = vld [vmem:[%s4827_s16 + $0x98] sm:$0xff] }
  0xfa   : > { %1803 = vst.msk [vmem:[%s4104_s8 + $0xbc] sm:$0xf] %vm1755_vm1, %v1658_v7  ;;  %1802 = vst.msk [vmem:[%s4104_s8 + $0xb8] sm:$0xf] %vm1755_vm1, %v1656_v41  ;;  %v3465_v40 = vpack.c.bf16 %v2352_v3, %v2352_v3 }
  0xfc   : > { %2158 = vrot.lane.b32.xlu1 %v3423_v10, %s3561_s13  ;;  %v1882_v10 = vld [vmem:[%s4462_s11 + $0x1f0] sm:$0xff] }
  0xfd   : > { %2156 = vrot.lane.b32.xlu0 %v3422_v52, %s3561_s13  ;;  %v1662_v1 = vpop.permute.xlu1 %1661  ;;  %v1660_v37 = vpop.permute.xlu0 %1659  ;;  %v3444_v7 = vpack.c.bf16 %v1882_v10, %v1882_v10  ;;  %v2354_v10 = vld [vmem:[%s4827_s16 + $0xa8] sm:$0xff] }
  0xfe   : > { %1805 = vst.msk [vmem:[%s4104_s8 + $0xc4] sm:$0xf] %vm1755_vm1, %v1662_v1  ;;  %1804 = vst.msk [vmem:[%s4104_s8 + $0xc0] sm:$0xf] %vm1755_vm1, %v1660_v37  ;;  %v3467_v36 = vpack.c.bf16 %v2354_v10, %v2354_v10 }
 0x100   : > { %2162 = vrot.lane.b32.xlu1 %v3425_v57, %s3561_s13  ;;  %v2333_v57 = vld [vmem:[%s4827_s16] sm:$0xff] }
 0x101   : > { %2160 = vrot.lane.b32.xlu0 %v3424_v17, %s3561_s13  ;;  %v1666_v33 = vpop.permute.xlu1 %1665  ;;  %v1664_v13 = vpop.permute.xlu0 %1663  ;;  %v3446_v1 = vpack.c.bf16 %v2333_v57, %v2333_v57  ;;  %v2356_v57 = vld [vmem:[%s4827_s16 + $0xb8] sm:$0xff] }
 0x102   : > { %1807 = vst.msk [vmem:[%s4104_s8 + $0xcc] sm:$0xf] %vm1755_vm1, %v1666_v33  ;;  %1806 = vst.msk [vmem:[%s4104_s8 + $0xc8] sm:$0xf] %vm1755_vm1, %v1664_v13  ;;  %v3469_v28 = vpack.c.bf16 %v2356_v57, %v2356_v57 }
 0x104   : > { %2166 = vrot.lane.b32.xlu1 %v3427_v50, %s3561_s13  ;;  %v2335_v50 = vld [vmem:[%s4827_s16 + $0x10] sm:$0xff] }
 0x105   : > { %2164 = vrot.lane.b32.xlu0 %v3426_v58, %s3561_s13  ;;  %v1670_v55 = vpop.permute.xlu1 %1669  ;;  %v1668_v12 = vpop.permute.xlu0 %1667  ;;  %v3448_v33 = vpack.c.bf16 %v2335_v50, %v2335_v50  ;;  %v2358_v50 = vld [vmem:[%s4827_s16 + $0xc8] sm:$0xff] }
 0x106   : > { %1809 = vst.msk [vmem:[%s4104_s8 + $0xd4] sm:$0xf] %vm1755_vm1, %v1670_v55  ;;  %1808 = vst.msk [vmem:[%s4104_s8 + $0xd0] sm:$0xf] %vm1755_vm1, %v1668_v12  ;;  %v3471_v14 = vpack.c.bf16 %v2358_v50, %v2358_v50 }
 0x108   : > { %2170 = vrot.lane.b32.xlu1 %v3429_v46, %s3561_s13  ;;  %v2337_v46 = vld [vmem:[%s4827_s16 + $0x20] sm:$0xff] }
 0x109   : > { %2168 = vrot.lane.b32.xlu0 %v3428_v31, %s3561_s13  ;;  %v1674_v43 = vpop.permute.xlu1 %1673  ;;  %v3450_v55 = vpack.c.bf16 %v2337_v46, %v2337_v46  ;;  %v2360_v46 = vld [vmem:[%s4827_s16 + $0xd8] sm:$0xff] }
 0x10a   : > { %1811 = vst.msk [vmem:[%s4104_s8 + $0xdc] sm:$0xf] %vm1755_vm1, %v1674_v43  ;;  %v1672_v47 = vpop.permute.xlu0 %1671  ;;  %v3473_v38 = vpack.c.bf16 %v2360_v46, %v2360_v46 }
 0x10b   : > { %1810 = vst.msk [vmem:[%s4104_s8 + $0xd8] sm:$0xf] %vm1755_vm1, %v1672_v47 }
 0x10c   : > { %2174 = vrot.lane.b32.xlu1 %v3431_v0, %s3561_s13  ;;  %v2339_v0 = vld [vmem:[%s4827_s16 + $0x30] sm:$0xff] }
 0x10d   : > { %2172 = vrot.lane.b32.xlu0 %v3430_v27, %s3561_s13  ;;  %v1678_v8 = vpop.permute.xlu1 %1677  ;;  %v3452_v43 = vpack.c.bf16 %v2339_v0, %v2339_v0  ;;  %v2362_v0 = vld [vmem:[%s4827_s16 + $0xe8] sm:$0xff] }
 0x10e   : > { %1813 = vst.msk [vmem:[%s4104_s8 + $0xe4] sm:$0xf] %vm1755_vm1, %v1678_v8  ;;  %v1676_v23 = vpop.permute.xlu0 %1675  ;;  %v3475_v44 = vpack.c.bf16 %v2362_v0, %v2362_v0 }
 0x10f   : > { %1812 = vst.msk [vmem:[%s4104_s8 + $0xe0] sm:$0xf] %vm1755_vm1, %v1676_v23 }
 0x110   : > { %2178 = vrot.lane.b32.xlu1 %v3433_v39, %s3561_s13  ;;  %v2341_v39 = vld [vmem:[%s4827_s16 + $0x40] sm:$0xff] }
 0x111   : > { %2176 = vrot.lane.b32.xlu0 %v3432_v11, %s3561_s13  ;;  %v1682_v15 = vpop.permute.xlu1 %1681  ;;  %v3454_v8 = vpack.c.bf16 %v2341_v39, %v2341_v39  ;;  %v2364_v39 = vld [vmem:[%s4827_s16 + $0xf8] sm:$0xff] }
 0x112   : > { %1815 = vst.msk [vmem:[%s4104_s8 + $0xec] sm:$0xf] %vm1755_vm1, %v1682_v15  ;;  %v1680_v16 = vpop.permute.xlu0 %1679  ;;  %v3477_v48 = vpack.c.bf16 %v2364_v39, %v2364_v39 }
 0x113   : > { %1814 = vst.msk [vmem:[%s4104_s8 + $0xe8] sm:$0xf] %vm1755_vm1, %v1680_v16 }
 0x114   : > { %2182 = vrot.lane.b32.xlu1 %v3435_v59, %s3561_s13  ;;  %v2343_v59 = vld [vmem:[%s4827_s16 + $0x50] sm:$0xff] }
 0x115   : > { %2180 = vrot.lane.b32.xlu0 %v3434_v30, %s3561_s13  ;;  %v1686_v54 = vpop.permute.xlu1 %1685  ;;  %v3456_v15 = vpack.c.bf16 %v2343_v59, %v2343_v59  ;;  %v2366_v59 = vld [vmem:[%s4827_s16 + $0x108] sm:$0xff] }
 0x116   : > { %1817 = vst.msk [vmem:[%s4104_s8 + $0xf4] sm:$0xf] %vm1755_vm1, %v1686_v54  ;;  %v1684_v61 = vpop.permute.xlu0 %1683  ;;  %v3479_v2 = vpack.c.bf16 %v2366_v59, %v2366_v59 }
 0x117   : > { %1816 = vst.msk [vmem:[%s4104_s8 + $0xf0] sm:$0xf] %vm1755_vm1, %v1684_v61 }
 0x118   : > { %2186 = vrot.lane.b32.xlu1 %v3437_v45, %s3561_s13  ;;  %v2345_v45 = vld [vmem:[%s4827_s16 + $0x60] sm:$0xff] }
 0x119   : > { %2184 = vrot.lane.b32.xlu0 %v3436_v60, %s3561_s13  ;;  %v1690_v6 = vpop.permute.xlu1 %1689  ;;  %v3458_v54 = vpack.c.bf16 %v2345_v45, %v2345_v45  ;;  %v2368_v45 = vld [vmem:[%s4827_s16 + $0x118] sm:$0xff] }
 0x11a   : > { %1819 = vst.msk [vmem:[%s4104_s8 + $0xfc] sm:$0xf] %vm1755_vm1, %v1690_v6  ;;  %v1688_v56 = vpop.permute.xlu0 %1687  ;;  %v3481_v22 = vpack.c.bf16 %v2368_v45, %v2368_v45 }
 0x11b   : > { %1818 = vst.msk [vmem:[%s4104_s8 + $0xf8] sm:$0xf] %vm1755_vm1, %v1688_v56 }
 0x11c   : > { %2190 = vrot.lane.b32.xlu1 %v3439_v32, %s3561_s13  ;;  %v2347_v32 = vld [vmem:[%s4827_s16 + $0x70] sm:$0xff] }
 0x11d   : > { %2188 = vrot.lane.b32.xlu0 %v3438_v51, %s3561_s13  ;;  %v3460_v6 = vpack.c.bf16 %v2347_v32, %v2347_v32  ;;  %v2370_v32 = vld [vmem:[%s4827_s16 + $0x128] sm:$0xff] }
 0x11e   : > { %v2079_v34 = vpop.permute.xlu1 %2078  ;;  %v3483_v4 = vpack.c.bf16 %v2370_v32, %v2370_v32 }
 0x11f   : > { %2270 = vst.msk [vmem:[%s4104_s8 + $0x4] sm:$0xf] %vm2268_vm2, %v2079_v34  ;;  %v2077_v35 = vpop.permute.xlu0 %2076 }
 0x120   : > { %2269 = vst.msk [vmem:[%s4104_s8] sm:$0xf] %vm2268_vm2, %v2077_v35  ;;  %2194 = vrot.lane.b32.xlu1 %v3441_v49, %s3561_s13  ;;  %v2349_v49 = vld [vmem:[%s4827_s16 + $0x80] sm:$0xff] }
 0x121   : > { %2192 = vrot.lane.b32.xlu0 %v3440_v62, %s3561_s13  ;;  %v3462_v34 = vpack.c.bf16 %v2349_v49, %v2349_v49  ;;  %v2372_v49 = vld [vmem:[%s4827_s16 + $0x138] sm:$0xff] }
 0x122   : > { %v2083_v63 = vpop.permute.xlu1 %2082  ;;  %v3485_v3 = vpack.c.bf16 %v2372_v49, %v2372_v49 }
 0x123   : > { %2272 = vst.msk [vmem:[%s4104_s8 + $0xc] sm:$0xf] %vm2268_vm2, %v2083_v63  ;;  %v2081_v52 = vpop.permute.xlu0 %2080 }
 0x124   : > { %2271 = vst.msk [vmem:[%s4104_s8 + $0x8] sm:$0xf] %vm2268_vm2, %v2081_v52  ;;  %2198 = vrot.lane.b32.xlu1 %v3443_v29, %s3561_s13  ;;  %v2351_v29 = vld [vmem:[%s4827_s16 + $0x90] sm:$0xff] }
 0x125   : > { %2196 = vrot.lane.b32.xlu0 %v3442_v53, %s3561_s13  ;;  %v3464_v63 = vpack.c.bf16 %v2351_v29, %v2351_v29  ;;  %v2374_v29 = vld [vmem:[%s4827_s16 + $0x148] sm:$0xff] }
 0x126   : > { %v2087_v41 = vpop.permute.xlu1 %2086  ;;  %v3487_v10 = vpack.c.bf16 %v2374_v29, %v2374_v29 }
 0x127   : > { %2274 = vst.msk [vmem:[%s4104_s8 + $0x14] sm:$0xf] %vm2268_vm2, %v2087_v41  ;;  %v2085_v17 = vpop.permute.xlu0 %2084 }
 0x128   : > { %2273 = vst.msk [vmem:[%s4104_s8 + $0x10] sm:$0xf] %vm2268_vm2, %v2085_v17  ;;  %2202 = vrot.lane.b32.xlu1 %v3445_v18, %s3561_s13  ;;  %v2353_v18 = vld [vmem:[%s4827_s16 + $0xa0] sm:$0xff] }
 0x129   : > { %2200 = vrot.lane.b32.xlu0 %v3444_v7, %s3561_s13  ;;  %v3466_v41 = vpack.c.bf16 %v2353_v18, %v2353_v18  ;;  %v2376_v18 = vld [vmem:[%s4827_s16 + $0x158] sm:$0xff] }
 0x12a   : > { %v2091_v37 = vpop.permute.xlu1 %2090  ;;  %v3489_v57 = vpack.c.bf16 %v2376_v18, %v2376_v18 }
 0x12b   : > { %2276 = vst.msk [vmem:[%s4104_s8 + $0x1c] sm:$0xf] %vm2268_vm2, %v2091_v37  ;;  %v2089_v58 = vpop.permute.xlu0 %2088 }
 0x12c   : > { %2275 = vst.msk [vmem:[%s4104_s8 + $0x18] sm:$0xf] %vm2268_vm2, %v2089_v58  ;;  %2591 = vrot.lane.b32.xlu1 %v3447_v25, %s3562_s12  ;;  %v2355_v25 = vld [vmem:[%s4827_s16 + $0xb0] sm:$0xff] }
 0x12d   : > { %2589 = vrot.lane.b32.xlu0 %v3446_v1, %s3562_s12  ;;  %v3468_v37 = vpack.c.bf16 %v2355_v25, %v2355_v25  ;;  %v2378_v25 = vld [vmem:[%s4827_s16 + $0x168] sm:$0xff] }
 0x12e   : > { %v2095_v13 = vpop.permute.xlu1 %2094  ;;  %v3491_v50 = vpack.c.bf16 %v2378_v25, %v2378_v25 }
 0x12f   : > { %2278 = vst.msk [vmem:[%s4104_s8 + $0x24] sm:$0xf] %vm2268_vm2, %v2095_v13  ;;  %v2093_v31 = vpop.permute.xlu0 %2092 }
 0x130   : > { %2277 = vst.msk [vmem:[%s4104_s8 + $0x20] sm:$0xf] %vm2268_vm2, %v2093_v31  ;;  %2595 = vrot.lane.b32.xlu1 %v3449_v24, %s3562_s12  ;;  %v2357_v24 = vld [vmem:[%s4827_s16 + $0xc0] sm:$0xff] }
 0x131   : > { %2593 = vrot.lane.b32.xlu0 %v3448_v33, %s3562_s12  ;;  %v3470_v13 = vpack.c.bf16 %v2357_v24, %v2357_v24  ;;  %v2380_v24 = vld [vmem:[%s4827_s16 + $0x178] sm:$0xff] }
 0x132   : > { %v2099_v12 = vpop.permute.xlu1 %2098  ;;  %v3493_v46 = vpack.c.bf16 %v2380_v24, %v2380_v24 }
 0x133   : > { %2280 = vst.msk [vmem:[%s4104_s8 + $0x2c] sm:$0xf] %vm2268_vm2, %v2099_v12  ;;  %v2097_v27 = vpop.permute.xlu0 %2096 }
 0x134   : > { %2279 = vst.msk [vmem:[%s4104_s8 + $0x28] sm:$0xf] %vm2268_vm2, %v2097_v27  ;;  %2599 = vrot.lane.b32.xlu1 %v3451_v21, %s3562_s12  ;;  %v2359_v21 = vld [vmem:[%s4827_s16 + $0xd0] sm:$0xff] }
 0x135   : > { %2597 = vrot.lane.b32.xlu0 %v3450_v55, %s3562_s12  ;;  %v3472_v12 = vpack.c.bf16 %v2359_v21, %v2359_v21  ;;  %v2382_v21 = vld [vmem:[%s4827_s16 + $0x188] sm:$0xff] }
 0x136   : > { %v2103_v47 = vpop.permute.xlu1 %2102  ;;  %v3495_v0 = vpack.c.bf16 %v2382_v21, %v2382_v21 }
 0x137   : > { %2282 = vst.msk [vmem:[%s4104_s8 + $0x34] sm:$0xf] %vm2268_vm2, %v2103_v47  ;;  %v2101_v11 = vpop.permute.xlu0 %2100 }
 0x138   : > { %2281 = vst.msk [vmem:[%s4104_s8 + $0x30] sm:$0xf] %vm2268_vm2, %v2101_v11  ;;  %2603 = vrot.lane.b32.xlu1 %v3453_v20, %s3562_s12  ;;  %v2361_v20 = vld [vmem:[%s4827_s16 + $0xe0] sm:$0xff] }
 0x139   : > { %2601 = vrot.lane.b32.xlu0 %v3452_v43, %s3562_s12  ;;  %v3474_v47 = vpack.c.bf16 %v2361_v20, %v2361_v20  ;;  %v2384_v20 = vld [vmem:[%s4827_s16 + $0x198] sm:$0xff] }
 0x13a   : > { %v2107_v23 = vpop.permute.xlu1 %2106  ;;  %v3497_v39 = vpack.c.bf16 %v2384_v20, %v2384_v20 }
 0x13b   : > { %2284 = vst.msk [vmem:[%s4104_s8 + $0x3c] sm:$0xf] %vm2268_vm2, %v2107_v23  ;;  %v2105_v30 = vpop.permute.xlu0 %2104 }
 0x13c   : > { %2283 = vst.msk [vmem:[%s4104_s8 + $0x38] sm:$0xf] %vm2268_vm2, %v2105_v30  ;;  %2607 = vrot.lane.b32.xlu1 %v3455_v26, %s3562_s12  ;;  %v2363_v26 = vld [vmem:[%s4827_s16 + $0xf0] sm:$0xff] }
 0x13d   : > { %2605 = vrot.lane.b32.xlu0 %v3454_v8, %s3562_s12  ;;  %v3476_v23 = vpack.c.bf16 %v2363_v26, %v2363_v26  ;;  %v2386_v26 = vld [vmem:[%s4827_s16 + $0x1a8] sm:$0xff] }
 0x13e   : > { %v2111_v16 = vpop.permute.xlu1 %2110  ;;  %v3499_v59 = vpack.c.bf16 %v2386_v26, %v2386_v26 }
 0x13f   : > { %2286 = vst.msk [vmem:[%s4104_s8 + $0x44] sm:$0xf] %vm2268_vm2, %v2111_v16  ;;  %v2109_v60 = vpop.permute.xlu0 %2108 }
 0x140   : > { %2285 = vst.msk [vmem:[%s4104_s8 + $0x40] sm:$0xf] %vm2268_vm2, %v2109_v60  ;;  %2611 = vrot.lane.b32.xlu1 %v3457_v5, %s3562_s12  ;;  %v2365_v5 = vld [vmem:[%s4827_s16 + $0x100] sm:$0xff] }
 0x141   : > { %2609 = vrot.lane.b32.xlu0 %v3456_v15, %s3562_s12  ;;  %v3478_v16 = vpack.c.bf16 %v2365_v5, %v2365_v5  ;;  %v2388_v5 = vld [vmem:[%s4827_s16 + $0x1b8] sm:$0xff] }
 0x142   : > { %v2115_v61 = vpop.permute.xlu1 %2114  ;;  %v3501_v45 = vpack.c.bf16 %v2388_v5, %v2388_v5 }
 0x143   : > { %2288 = vst.msk [vmem:[%s4104_s8 + $0x4c] sm:$0xf] %vm2268_vm2, %v2115_v61  ;;  %v2113_v51 = vpop.permute.xlu0 %2112 }
 0x144   : > { %2287 = vst.msk [vmem:[%s4104_s8 + $0x48] sm:$0xf] %vm2268_vm2, %v2113_v51  ;;  %2615 = vrot.lane.b32.xlu1 %v3459_v9, %s3562_s12  ;;  %v2367_v9 = vld [vmem:[%s4827_s16 + $0x110] sm:$0xff] }
 0x145   : > { %2613 = vrot.lane.b32.xlu0 %v3458_v54, %s3562_s12  ;;  %v3480_v61 = vpack.c.bf16 %v2367_v9, %v2367_v9  ;;  %v2390_v9 = vld [vmem:[%s4827_s16 + $0x1c8] sm:$0xff] }
 0x146   : > { %v2119_v56 = vpop.permute.xlu1 %2118  ;;  %v3503_v32 = vpack.c.bf16 %v2390_v9, %v2390_v9 }
 0x147   : > { %2290 = vst.msk [vmem:[%s4104_s8 + $0x54] sm:$0xf] %vm2268_vm2, %v2119_v56  ;;  %v2117_v62 = vpop.permute.xlu0 %2116 }
 0x148   : > { %2289 = vst.msk [vmem:[%s4104_s8 + $0x50] sm:$0xf] %vm2268_vm2, %v2117_v62  ;;  %2619 = vrot.lane.b32.xlu1 %v3461_v42, %s3562_s12  ;;  %v2369_v42 = vld [vmem:[%s4827_s16 + $0x120] sm:$0xff] }
 0x149   : > { %2617 = vrot.lane.b32.xlu0 %v3460_v6, %s3562_s12  ;;  %v3482_v56 = vpack.c.bf16 %v2369_v42, %v2369_v42  ;;  %v2392_v42 = vld [vmem:[%s4827_s16 + $0x1d8] sm:$0xff] }
 0x14a   : > { %v2123_v35 = vpop.permute.xlu1 %2122  ;;  %v3505_v49 = vpack.c.bf16 %v2392_v42, %v2392_v42 }
 0x14b   : > { %2292 = vst.msk [vmem:[%s4104_s8 + $0x5c] sm:$0xf] %vm2268_vm2, %v2123_v35  ;;  %v2121_v53 = vpop.permute.xlu0 %2120 }
 0x14c   : > { %2291 = vst.msk [vmem:[%s4104_s8 + $0x58] sm:$0xf] %vm2268_vm2, %v2121_v53  ;;  %2623 = vrot.lane.b32.xlu1 %v3463_v19, %s3562_s12  ;;  %v2371_v19 = vld [vmem:[%s4827_s16 + $0x130] sm:$0xff] }
 0x14d   : > { %2621 = vrot.lane.b32.xlu0 %v3462_v34, %s3562_s12  ;;  %v3484_v35 = vpack.c.bf16 %v2371_v19, %v2371_v19  ;;  %v2394_v19 = vld [vmem:[%s4827_s16 + $0x1e8] sm:$0xff] }
 0x14e   : > { %v2127_v52 = vpop.permute.xlu1 %2126  ;;  %v3507_v29 = vpack.c.bf16 %v2394_v19, %v2394_v19 }
 0x14f   : > { %2294 = vst.msk [vmem:[%s4104_s8 + $0x64] sm:$0xf] %vm2268_vm2, %v2127_v52  ;;  %v2125_v7 = vpop.permute.xlu0 %2124 }
 0x150   : > { %2293 = vst.msk [vmem:[%s4104_s8 + $0x60] sm:$0xf] %vm2268_vm2, %v2125_v7  ;;  %2627 = vrot.lane.b32.xlu1 %v3465_v40, %s3562_s12  ;;  %v2373_v40 = vld [vmem:[%s4827_s16 + $0x140] sm:$0xff] }
 0x151   : > { %2625 = vrot.lane.b32.xlu0 %v3464_v63, %s3562_s12  ;;  %v3486_v52 = vpack.c.bf16 %v2373_v40, %v2373_v40  ;;  %v2396_v40 = vld [vmem:[%s4827_s16 + $0x1f8] sm:$0xff] }
 0x152   : > { %v2131_v17 = vpop.permute.xlu1 %2130  ;;  %v3509_v18 = vpack.c.bf16 %v2396_v40, %v2396_v40 }
 0x153   : > { %2296 = vst.msk [vmem:[%s4104_s8 + $0x6c] sm:$0xf] %vm2268_vm2, %v2131_v17  ;;  %v2129_v1 = vpop.permute.xlu0 %2128 }
 0x154   : > { %2295 = vst.msk [vmem:[%s4104_s8 + $0x68] sm:$0xf] %vm2268_vm2, %v2129_v1  ;;  %2631 = vrot.lane.b32.xlu1 %v3467_v36, %s3562_s12  ;;  %v2375_v36 = vld [vmem:[%s4827_s16 + $0x150] sm:$0xff] }
 0x155   : > { %2629 = vrot.lane.b32.xlu0 %v3466_v41, %s3562_s12  ;;  %v3488_v17 = vpack.c.bf16 %v2375_v36, %v2375_v36 }
 0x156   : > { %v2135_v58 = vpop.permute.xlu1 %2134 }
 0x157   : > { %2298 = vst.msk [vmem:[%s4104_s8 + $0x74] sm:$0xf] %vm2268_vm2, %v2135_v58  ;;  %v2133_v33 = vpop.permute.xlu0 %2132 }
 0x158   : > { %2297 = vst.msk [vmem:[%s4104_s8 + $0x70] sm:$0xf] %vm2268_vm2, %v2133_v33  ;;  %2635 = vrot.lane.b32.xlu1 %v3469_v28, %s3562_s12  ;;  %v2377_v28 = vld [vmem:[%s4827_s16 + $0x160] sm:$0xff] }
 0x159   : > { %2633 = vrot.lane.b32.xlu0 %v3468_v37, %s3562_s12  ;;  %v3490_v58 = vpack.c.bf16 %v2377_v28, %v2377_v28 }
 0x15a   : > { %v2139_v31 = vpop.permute.xlu1 %2138 }
 0x15b   : > { %2300 = vst.msk [vmem:[%s4104_s8 + $0x7c] sm:$0xf] %vm2268_vm2, %v2139_v31  ;;  %v2137_v55 = vpop.permute.xlu0 %2136 }
 0x15c   : > { %2299 = vst.msk [vmem:[%s4104_s8 + $0x78] sm:$0xf] %vm2268_vm2, %v2137_v55  ;;  %2639 = vrot.lane.b32.xlu1 %v3471_v14, %s3562_s12  ;;  %v2379_v14 = vld [vmem:[%s4827_s16 + $0x170] sm:$0xff] }
 0x15d   : > { %2637 = vrot.lane.b32.xlu0 %v3470_v13, %s3562_s12  ;;  %v3492_v31 = vpack.c.bf16 %v2379_v14, %v2379_v14 }
 0x15e   : > { %v2143_v27 = vpop.permute.xlu1 %2142 }
 0x15f   : > { %2302 = vst.msk [vmem:[%s4104_s8 + $0x84] sm:$0xf] %vm2268_vm2, %v2143_v27  ;;  %v2141_v43 = vpop.permute.xlu0 %2140 }
 0x160   : > { %2301 = vst.msk [vmem:[%s4104_s8 + $0x80] sm:$0xf] %vm2268_vm2, %v2141_v43  ;;  %2643 = vrot.lane.b32.xlu1 %v3473_v38, %s3562_s12  ;;  %v2381_v38 = vld [vmem:[%s4827_s16 + $0x180] sm:$0xff] }
 0x161   : > { %2641 = vrot.lane.b32.xlu0 %v3472_v12, %s3562_s12  ;;  %v3494_v27 = vpack.c.bf16 %v2381_v38, %v2381_v38 }
 0x162   : > { %v2147_v11 = vpop.permute.xlu1 %2146 }
 0x163   : > { %2304 = vst.msk [vmem:[%s4104_s8 + $0x8c] sm:$0xf] %vm2268_vm2, %v2147_v11  ;;  %v2145_v8 = vpop.permute.xlu0 %2144 }
 0x164   : > { %2303 = vst.msk [vmem:[%s4104_s8 + $0x88] sm:$0xf] %vm2268_vm2, %v2145_v8  ;;  %2647 = vrot.lane.b32.xlu1 %v3475_v44, %s3562_s12  ;;  %v2383_v44 = vld [vmem:[%s4827_s16 + $0x190] sm:$0xff] }
 0x165   : > { %2645 = vrot.lane.b32.xlu0 %v3474_v47, %s3562_s12  ;;  %v3496_v11 = vpack.c.bf16 %v2383_v44, %v2383_v44 }
 0x166   : > { %v2151_v30 = vpop.permute.xlu1 %2150 }
 0x167   : > { %2306 = vst.msk [vmem:[%s4104_s8 + $0x94] sm:$0xf] %vm2268_vm2, %v2151_v30  ;;  %v2149_v15 = vpop.permute.xlu0 %2148 }
 0x168   : > { %2305 = vst.msk [vmem:[%s4104_s8 + $0x90] sm:$0xf] %vm2268_vm2, %v2149_v15  ;;  %2651 = vrot.lane.b32.xlu1 %v3477_v48, %s3562_s12  ;;  %v2385_v48 = vld [vmem:[%s4827_s16 + $0x1a0] sm:$0xff] }
 0x169   : > { %2649 = vrot.lane.b32.xlu0 %v3476_v23, %s3562_s12  ;;  %v3498_v30 = vpack.c.bf16 %v2385_v48, %v2385_v48 }
 0x16a   : > { %v2155_v60 = vpop.permute.xlu1 %2154 }
 0x16b   : > { %2308 = vst.msk [vmem:[%s4104_s8 + $0x9c] sm:$0xf] %vm2268_vm2, %v2155_v60  ;;  %v2153_v54 = vpop.permute.xlu0 %2152 }
 0x16c   : > { %2307 = vst.msk [vmem:[%s4104_s8 + $0x98] sm:$0xf] %vm2268_vm2, %v2153_v54  ;;  %2655 = vrot.lane.b32.xlu1 %v3479_v2, %s3562_s12  ;;  %v2387_v2 = vld [vmem:[%s4827_s16 + $0x1b0] sm:$0xff] }
 0x16d   : > { %2653 = vrot.lane.b32.xlu0 %v3478_v16, %s3562_s12  ;;  %v3500_v60 = vpack.c.bf16 %v2387_v2, %v2387_v2 }
 0x16e   : > { %v2159_v51 = vpop.permute.xlu1 %2158 }
 0x16f   : > { %2310 = vst.msk [vmem:[%s4104_s8 + $0xa4] sm:$0xf] %vm2268_vm2, %v2159_v51  ;;  %v2157_v6 = vpop.permute.xlu0 %2156 }
 0x170   : > { %2309 = vst.msk [vmem:[%s4104_s8 + $0xa0] sm:$0xf] %vm2268_vm2, %v2157_v6  ;;  %2659 = vrot.lane.b32.xlu1 %v3481_v22, %s3562_s12  ;;  %v2389_v22 = vld [vmem:[%s4827_s16 + $0x1c0] sm:$0xff] }
 0x171   : > { %2657 = vrot.lane.b32.xlu0 %v3480_v61, %s3562_s12  ;;  %v3502_v51 = vpack.c.bf16 %v2389_v22, %v2389_v22 }
 0x172   : > { %v2163_v62 = vpop.permute.xlu1 %2162 }
 0x173   : > { %2312 = vst.msk [vmem:[%s4104_s8 + $0xac] sm:$0xf] %vm2268_vm2, %v2163_v62  ;;  %v2161_v34 = vpop.permute.xlu0 %2160 }
 0x174   : > { %2311 = vst.msk [vmem:[%s4104_s8 + $0xa8] sm:$0xf] %vm2268_vm2, %v2161_v34  ;;  %2663 = vrot.lane.b32.xlu1 %v3483_v4, %s3562_s12  ;;  %v2391_v4 = vld [vmem:[%s4827_s16 + $0x1d0] sm:$0xff] }
 0x175   : > { %2661 = vrot.lane.b32.xlu0 %v3482_v56, %s3562_s12  ;;  %v3504_v62 = vpack.c.bf16 %v2391_v4, %v2391_v4 }
 0x176   : > { %v2167_v53 = vpop.permute.xlu1 %2166 }
 0x177   : > { %2314 = vst.msk [vmem:[%s4104_s8 + $0xb4] sm:$0xf] %vm2268_vm2, %v2167_v53  ;;  %v2165_v63 = vpop.permute.xlu0 %2164 }
 0x178   : > { %2313 = vst.msk [vmem:[%s4104_s8 + $0xb0] sm:$0xf] %vm2268_vm2, %v2165_v63  ;;  %2667 = vrot.lane.b32.xlu1 %v3485_v3, %s3562_s12  ;;  %v2393_v3 = vld [vmem:[%s4827_s16 + $0x1e0] sm:$0xff] }
 0x179   : > { %2665 = vrot.lane.b32.xlu0 %v3484_v35, %s3562_s12  ;;  %v3506_v53 = vpack.c.bf16 %v2393_v3, %v2393_v3 }
 0x17a   : > { %v2171_v7 = vpop.permute.xlu1 %2170 }
 0x17b   : > { %2316 = vst.msk [vmem:[%s4104_s8 + $0xbc] sm:$0xf] %vm2268_vm2, %v2171_v7  ;;  %v2169_v41 = vpop.permute.xlu0 %2168 }
 0x17c   : > { %2315 = vst.msk [vmem:[%s4104_s8 + $0xb8] sm:$0xf] %vm2268_vm2, %v2169_v41  ;;  %2671 = vrot.lane.b32.xlu1 %v3487_v10, %s3562_s12  ;;  %v2395_v10 = vld [vmem:[%s4827_s16 + $0x1f0] sm:$0xff] }
 0x17d   : > { %2669 = vrot.lane.b32.xlu0 %v3486_v52, %s3562_s12  ;;  %v3508_v7 = vpack.c.bf16 %v2395_v10, %v2395_v10 }
 0x17e   : > { %v2175_v1 = vpop.permute.xlu1 %2174 }
 0x17f   : > { %2318 = vst.msk [vmem:[%s4104_s8 + $0xc4] sm:$0xf] %vm2268_vm2, %v2175_v1  ;;  %v2173_v37 = vpop.permute.xlu0 %2172 }
 0x180   : > { %2317 = vst.msk [vmem:[%s4104_s8 + $0xc0] sm:$0xf] %vm2268_vm2, %v2173_v37  ;;  %2675 = vrot.lane.b32.xlu1 %v3489_v57, %s3562_s12 }
 0x181   : > { %2673 = vrot.lane.b32.xlu0 %v3488_v17, %s3562_s12 }
 0x182   : > { %v2179_v33 = vpop.permute.xlu1 %2178 }
 0x183   : > { %2320 = vst.msk [vmem:[%s4104_s8 + $0xcc] sm:$0xf] %vm2268_vm2, %v2179_v33  ;;  %v2177_v13 = vpop.permute.xlu0 %2176 }
 0x184   : > { %2319 = vst.msk [vmem:[%s4104_s8 + $0xc8] sm:$0xf] %vm2268_vm2, %v2177_v13  ;;  %2679 = vrot.lane.b32.xlu1 %v3491_v50, %s3562_s12 }
 0x185   : > { %2677 = vrot.lane.b32.xlu0 %v3490_v58, %s3562_s12 }
 0x186   : > { %v2183_v55 = vpop.permute.xlu1 %2182 }
 0x187   : > { %2322 = vst.msk [vmem:[%s4104_s8 + $0xd4] sm:$0xf] %vm2268_vm2, %v2183_v55  ;;  %v2181_v12 = vpop.permute.xlu0 %2180 }
 0x188   : > { %2321 = vst.msk [vmem:[%s4104_s8 + $0xd0] sm:$0xf] %vm2268_vm2, %v2181_v12  ;;  %2683 = vrot.lane.b32.xlu1 %v3493_v46, %s3562_s12 }
 0x189   : > { %2681 = vrot.lane.b32.xlu0 %v3492_v31, %s3562_s12 }
 0x18a   : > { %v2187_v43 = vpop.permute.xlu1 %2186 }
 0x18b   : > { %2324 = vst.msk [vmem:[%s4104_s8 + $0xdc] sm:$0xf] %vm2268_vm2, %v2187_v43  ;;  %v2185_v47 = vpop.permute.xlu0 %2184 }
 0x18c   : > { %2323 = vst.msk [vmem:[%s4104_s8 + $0xd8] sm:$0xf] %vm2268_vm2, %v2185_v47  ;;  %2687 = vrot.lane.b32.xlu1 %v3495_v0, %s3562_s12 }
 0x18d   : > { %2685 = vrot.lane.b32.xlu0 %v3494_v27, %s3562_s12 }
 0x18e   : > { %v2191_v8 = vpop.permute.xlu1 %2190 }
 0x18f   : > { %2326 = vst.msk [vmem:[%s4104_s8 + $0xe4] sm:$0xf] %vm2268_vm2, %v2191_v8  ;;  %v2189_v23 = vpop.permute.xlu0 %2188 }
 0x190   : > { %2325 = vst.msk [vmem:[%s4104_s8 + $0xe0] sm:$0xf] %vm2268_vm2, %v2189_v23  ;;  %2691 = vrot.lane.b32.xlu1 %v3497_v39, %s3562_s12 }
 0x191   : > { %2689 = vrot.lane.b32.xlu0 %v3496_v11, %s3562_s12 }
 0x192   : > { %v2195_v15 = vpop.permute.xlu1 %2194 }
 0x193   : > { %2328 = vst.msk [vmem:[%s4104_s8 + $0xec] sm:$0xf] %vm2268_vm2, %v2195_v15  ;;  %v2193_v16 = vpop.permute.xlu0 %2192 }
 0x194   : > { %2327 = vst.msk [vmem:[%s4104_s8 + $0xe8] sm:$0xf] %vm2268_vm2, %v2193_v16  ;;  %2695 = vrot.lane.b32.xlu1 %v3499_v59, %s3562_s12 }
 0x195   : > { %2693 = vrot.lane.b32.xlu0 %v3498_v30, %s3562_s12 }
 0x196   : > { %v2199_v54 = vpop.permute.xlu1 %2198 }
 0x197   : > { %2330 = vst.msk [vmem:[%s4104_s8 + $0xf4] sm:$0xf] %vm2268_vm2, %v2199_v54  ;;  %v2197_v61 = vpop.permute.xlu0 %2196 }
 0x198   : > { %2329 = vst.msk [vmem:[%s4104_s8 + $0xf0] sm:$0xf] %vm2268_vm2, %v2197_v61  ;;  %2699 = vrot.lane.b32.xlu1 %v3501_v45, %s3562_s12 }
 0x199   : > { %2697 = vrot.lane.b32.xlu0 %v3500_v60, %s3562_s12 }
 0x19a   : > { %v2203_v6 = vpop.permute.xlu1 %2202 }
 0x19b   : > { %2332 = vst.msk [vmem:[%s4104_s8 + $0xfc] sm:$0xf] %vm2268_vm2, %v2203_v6  ;;  %v2201_v56 = vpop.permute.xlu0 %2200 }
 0x19c   : > { %2331 = vst.msk [vmem:[%s4104_s8 + $0xf8] sm:$0xf] %vm2268_vm2, %v2201_v56  ;;  %2703 = vrot.lane.b32.xlu1 %v3503_v32, %s3562_s12 }
 0x19d   : > { %2701 = vrot.lane.b32.xlu0 %v3502_v51, %s3562_s12 }
 0x19e   : > { %v2592_v34 = vpop.permute.xlu1 %2591 }
 0x19f   : > { %2783 = vst.msk [vmem:[%s4104_s8 + $0x4] sm:$0xf] %vm2781_vm3, %v2592_v34  ;;  %v2590_v35 = vpop.permute.xlu0 %2589 }
 0x1a0   : > { %2782 = vst.msk [vmem:[%s4104_s8] sm:$0xf] %vm2781_vm3, %v2590_v35  ;;  %2707 = vrot.lane.b32.xlu1 %v3505_v49, %s3562_s12 }
 0x1a1   : > { %2705 = vrot.lane.b32.xlu0 %v3504_v62, %s3562_s12 }
 0x1a2   : > { %v2596_v63 = vpop.permute.xlu1 %2595 }
 0x1a3   : > { %2785 = vst.msk [vmem:[%s4104_s8 + $0xc] sm:$0xf] %vm2781_vm3, %v2596_v63  ;;  %v2594_v52 = vpop.permute.xlu0 %2593 }
 0x1a4   : > { %2784 = vst.msk [vmem:[%s4104_s8 + $0x8] sm:$0xf] %vm2781_vm3, %v2594_v52  ;;  %2711 = vrot.lane.b32.xlu1 %v3507_v29, %s3562_s12 }
 0x1a5   : > { %2709 = vrot.lane.b32.xlu0 %v3506_v53, %s3562_s12 }
 0x1a6   : > { %v2600_v36 = vpop.permute.xlu1 %2599 }
 0x1a7   : > { %2787 = vst.msk [vmem:[%s4104_s8 + $0x14] sm:$0xf] %vm2781_vm3, %v2600_v36  ;;  %v2598_v41 = vpop.permute.xlu0 %2597 }
 0x1a8   : > { %2786 = vst.msk [vmem:[%s4104_s8 + $0x10] sm:$0xf] %vm2781_vm3, %v2598_v41  ;;  %2715 = vrot.lane.b32.xlu1 %v3509_v18, %s3562_s12 }
 0x1a9   : > { %2713 = vrot.lane.b32.xlu0 %v3508_v7, %s3562_s12 }
 0x1aa   : > { %v2604_v57 = vpop.permute.xlu1 %2603 }
 0x1ab   : > { %2789 = vst.msk [vmem:[%s4104_s8 + $0x1c] sm:$0xf] %vm2781_vm3, %v2604_v57  ;;  %v2602_v17 = vpop.permute.xlu0 %2601 }
 0x1ac   : > { %2788 = vst.msk [vmem:[%s4104_s8 + $0x18] sm:$0xf] %vm2781_vm3, %v2602_v17 }
 0x1ae   : > { %v2608_v25 = vpop.permute.xlu1 %2607 }
 0x1af   : > { %2791 = vst.msk [vmem:[%s4104_s8 + $0x24] sm:$0xf] %vm2781_vm3, %v2608_v25  ;;  %v2606_v1 = vpop.permute.xlu0 %2605 }
 0x1b0   : > { %2790 = vst.msk [vmem:[%s4104_s8 + $0x20] sm:$0xf] %vm2781_vm3, %v2606_v1 }
 0x1b2   : > { %v2612_v28 = vpop.permute.xlu1 %2611 }
 0x1b3   : > { %2793 = vst.msk [vmem:[%s4104_s8 + $0x2c] sm:$0xf] %vm2781_vm3, %v2612_v28  ;;  %v2610_v37 = vpop.permute.xlu0 %2609 }
 0x1b4   : > { %2792 = vst.msk [vmem:[%s4104_s8 + $0x28] sm:$0xf] %vm2781_vm3, %v2610_v37 }
 0x1b6   : > { %v2616_v50 = vpop.permute.xlu1 %2615 }
 0x1b7   : > { %2795 = vst.msk [vmem:[%s4104_s8 + $0x34] sm:$0xf] %vm2781_vm3, %v2616_v50  ;;  %v2614_v58 = vpop.permute.xlu0 %2613 }
 0x1b8   : > { %2794 = vst.msk [vmem:[%s4104_s8 + $0x30] sm:$0xf] %vm2781_vm3, %v2614_v58 }
 0x1ba   : > { %v2620_v24 = vpop.permute.xlu1 %2619 }
 0x1bb   : > { %2797 = vst.msk [vmem:[%s4104_s8 + $0x3c] sm:$0xf] %vm2781_vm3, %v2620_v24  ;;  %v2618_v33 = vpop.permute.xlu0 %2617 }
 0x1bc   : > { %2796 = vst.msk [vmem:[%s4104_s8 + $0x38] sm:$0xf] %vm2781_vm3, %v2618_v33 }
 0x1be   : > { %v2624_v14 = vpop.permute.xlu1 %2623 }
 0x1bf   : > { %2799 = vst.msk [vmem:[%s4104_s8 + $0x44] sm:$0xf] %vm2781_vm3, %v2624_v14  ;;  %v2622_v13 = vpop.permute.xlu0 %2621 }
 0x1c0   : > { %2798 = vst.msk [vmem:[%s4104_s8 + $0x40] sm:$0xf] %vm2781_vm3, %v2622_v13 }
 0x1c2   : > { %v2628_v46 = vpop.permute.xlu1 %2627 }
 0x1c3   : > { %2801 = vst.msk [vmem:[%s4104_s8 + $0x4c] sm:$0xf] %vm2781_vm3, %v2628_v46  ;;  %v2626_v31 = vpop.permute.xlu0 %2625 }
 0x1c4   : > { %2800 = vst.msk [vmem:[%s4104_s8 + $0x48] sm:$0xf] %vm2781_vm3, %v2626_v31 }
 0x1c6   : > { %v2632_v21 = vpop.permute.xlu1 %2631 }
 0x1c7   : > { %2803 = vst.msk [vmem:[%s4104_s8 + $0x54] sm:$0xf] %vm2781_vm3, %v2632_v21  ;;  %v2630_v55 = vpop.permute.xlu0 %2629 }
 0x1c8   : > { %2802 = vst.msk [vmem:[%s4104_s8 + $0x50] sm:$0xf] %vm2781_vm3, %v2630_v55 }
 0x1ca   : > { %v2636_v38 = vpop.permute.xlu1 %2635 }
 0x1cb   : > { %2805 = vst.msk [vmem:[%s4104_s8 + $0x5c] sm:$0xf] %vm2781_vm3, %v2636_v38  ;;  %v2634_v12 = vpop.permute.xlu0 %2633 }
 0x1cc   : > { %2804 = vst.msk [vmem:[%s4104_s8 + $0x58] sm:$0xf] %vm2781_vm3, %v2634_v12 }
 0x1ce   : > { %v2640_v0 = vpop.permute.xlu1 %2639 }
 0x1cf   : > { %2807 = vst.msk [vmem:[%s4104_s8 + $0x64] sm:$0xf] %vm2781_vm3, %v2640_v0  ;;  %v2638_v27 = vpop.permute.xlu0 %2637 }
 0x1d0   : > { %2806 = vst.msk [vmem:[%s4104_s8 + $0x60] sm:$0xf] %vm2781_vm3, %v2638_v27 }
 0x1d2   : > { %v2644_v20 = vpop.permute.xlu1 %2643 }
 0x1d3   : > { %2809 = vst.msk [vmem:[%s4104_s8 + $0x6c] sm:$0xf] %vm2781_vm3, %v2644_v20  ;;  %v2642_v43 = vpop.permute.xlu0 %2641 }
 0x1d4   : > { %2808 = vst.msk [vmem:[%s4104_s8 + $0x68] sm:$0xf] %vm2781_vm3, %v2642_v43 }
 0x1d6   : > { %v2648_v44 = vpop.permute.xlu1 %2647 }
 0x1d7   : > { %2811 = vst.msk [vmem:[%s4104_s8 + $0x74] sm:$0xf] %vm2781_vm3, %v2648_v44  ;;  %v2646_v47 = vpop.permute.xlu0 %2645 }
 0x1d8   : > { %2810 = vst.msk [vmem:[%s4104_s8 + $0x70] sm:$0xf] %vm2781_vm3, %v2646_v47 }
 0x1da   : > { %v2652_v39 = vpop.permute.xlu1 %2651 }
 0x1db   : > { %2813 = vst.msk [vmem:[%s4104_s8 + $0x7c] sm:$0xf] %vm2781_vm3, %v2652_v39  ;;  %v2650_v11 = vpop.permute.xlu0 %2649 }
 0x1dc   : > { %2812 = vst.msk [vmem:[%s4104_s8 + $0x78] sm:$0xf] %vm2781_vm3, %v2650_v11 }
 0x1de   : > { %v2656_v26 = vpop.permute.xlu1 %2655 }
 0x1df   : > { %2815 = vst.msk [vmem:[%s4104_s8 + $0x84] sm:$0xf] %vm2781_vm3, %v2656_v26  ;;  %v2654_v8 = vpop.permute.xlu0 %2653 }
 0x1e0   : > { %2814 = vst.msk [vmem:[%s4104_s8 + $0x80] sm:$0xf] %vm2781_vm3, %v2654_v8 }
 0x1e2   : > { %v2660_v48 = vpop.permute.xlu1 %2659 }
 0x1e3   : > { %2817 = vst.msk [vmem:[%s4104_s8 + $0x8c] sm:$0xf] %vm2781_vm3, %v2660_v48  ;;  %v2658_v23 = vpop.permute.xlu0 %2657 }
 0x1e4   : > { %2816 = vst.msk [vmem:[%s4104_s8 + $0x88] sm:$0xf] %vm2781_vm3, %v2658_v23 }
 0x1e6   : > { %v2664_v59 = vpop.permute.xlu1 %2663 }
 0x1e7   : > { %2819 = vst.msk [vmem:[%s4104_s8 + $0x94] sm:$0xf] %vm2781_vm3, %v2664_v59  ;;  %v2662_v30 = vpop.permute.xlu0 %2661 }
 0x1e8   : > { %2818 = vst.msk [vmem:[%s4104_s8 + $0x90] sm:$0xf] %vm2781_vm3, %v2662_v30 }
 0x1ea   : > { %v2668_v5 = vpop.permute.xlu1 %2667 }
 0x1eb   : > { %2821 = vst.msk [vmem:[%s4104_s8 + $0x9c] sm:$0xf] %vm2781_vm3, %v2668_v5  ;;  %v2666_v15 = vpop.permute.xlu0 %2665 }
 0x1ec   : > { %2820 = vst.msk [vmem:[%s4104_s8 + $0x98] sm:$0xf] %vm2781_vm3, %v2666_v15 }
 0x1ee   : > { %v2672_v2 = vpop.permute.xlu1 %2671 }
 0x1ef   : > { %2823 = vst.msk [vmem:[%s4104_s8 + $0xa4] sm:$0xf] %vm2781_vm3, %v2672_v2  ;;  %v2670_v16 = vpop.permute.xlu0 %2669 }
 0x1f0   : > { %2822 = vst.msk [vmem:[%s4104_s8 + $0xa0] sm:$0xf] %vm2781_vm3, %v2670_v16 }
 0x1f2   : > { %v2676_v45 = vpop.permute.xlu1 %2675 }
 0x1f3   : > { %2825 = vst.msk [vmem:[%s4104_s8 + $0xac] sm:$0xf] %vm2781_vm3, %v2676_v45  ;;  %v2674_v60 = vpop.permute.xlu0 %2673 }
 0x1f4   : > { %2824 = vst.msk [vmem:[%s4104_s8 + $0xa8] sm:$0xf] %vm2781_vm3, %v2674_v60 }
 0x1f6   : > { %v2680_v9 = vpop.permute.xlu1 %2679 }
 0x1f7   : > { %2827 = vst.msk [vmem:[%s4104_s8 + $0xb4] sm:$0xf] %vm2781_vm3, %v2680_v9  ;;  %v2678_v54 = vpop.permute.xlu0 %2677 }
 0x1f8   : > { %2826 = vst.msk [vmem:[%s4104_s8 + $0xb0] sm:$0xf] %vm2781_vm3, %v2678_v54 }
 0x1fa   : > { %v2684_v22 = vpop.permute.xlu1 %2683 }
 0x1fb   : > { %2829 = vst.msk [vmem:[%s4104_s8 + $0xbc] sm:$0xf] %vm2781_vm3, %v2684_v22  ;;  %v2682_v61 = vpop.permute.xlu0 %2681 }
 0x1fc   : > { %2828 = vst.msk [vmem:[%s4104_s8 + $0xb8] sm:$0xf] %vm2781_vm3, %v2682_v61 }
 0x1fe   : > { %v2688_v32 = vpop.permute.xlu1 %2687 }
 0x1ff   : > { %2831 = vst.msk [vmem:[%s4104_s8 + $0xc4] sm:$0xf] %vm2781_vm3, %v2688_v32  ;;  %v2686_v51 = vpop.permute.xlu0 %2685 }
 0x200   : > { %2830 = vst.msk [vmem:[%s4104_s8 + $0xc0] sm:$0xf] %vm2781_vm3, %v2686_v51 }
 0x202   : > { %v2692_v42 = vpop.permute.xlu1 %2691 }
 0x203   : > { %2833 = vst.msk [vmem:[%s4104_s8 + $0xcc] sm:$0xf] %vm2781_vm3, %v2692_v42  ;;  %v2690_v6 = vpop.permute.xlu0 %2689 }
 0x204   : > { %2832 = vst.msk [vmem:[%s4104_s8 + $0xc8] sm:$0xf] %vm2781_vm3, %v2690_v6 }
 0x206   : > { %v2696_v4 = vpop.permute.xlu1 %2695 }
 0x207   : > { %2835 = vst.msk [vmem:[%s4104_s8 + $0xd4] sm:$0xf] %vm2781_vm3, %v2696_v4  ;;  %v2694_v56 = vpop.permute.xlu0 %2693 }
 0x208   : > { %2834 = vst.msk [vmem:[%s4104_s8 + $0xd0] sm:$0xf] %vm2781_vm3, %v2694_v56 }
 0x20a   : > { %v2700_v49 = vpop.permute.xlu1 %2699 }
 0x20b   : > { %2837 = vst.msk [vmem:[%s4104_s8 + $0xdc] sm:$0xf] %vm2781_vm3, %v2700_v49  ;;  %v2698_v62 = vpop.permute.xlu0 %2697 }
 0x20c   : > { %2836 = vst.msk [vmem:[%s4104_s8 + $0xd8] sm:$0xf] %vm2781_vm3, %v2698_v62 }
 0x20e   : > { %v2704_v19 = vpop.permute.xlu1 %2703 }
 0x20f   : > { %2839 = vst.msk [vmem:[%s4104_s8 + $0xe4] sm:$0xf] %vm2781_vm3, %v2704_v19  ;;  %v2702_v34 = vpop.permute.xlu0 %2701 }
 0x210   : > { %2838 = vst.msk [vmem:[%s4104_s8 + $0xe0] sm:$0xf] %vm2781_vm3, %v2702_v34 }
 0x212   : > { %v2708_v3 = vpop.permute.xlu1 %2707 }
 0x213   : > { %2841 = vst.msk [vmem:[%s4104_s8 + $0xec] sm:$0xf] %vm2781_vm3, %v2708_v3  ;;  %v2706_v35 = vpop.permute.xlu0 %2705 }
 0x214   : > { %2840 = vst.msk [vmem:[%s4104_s8 + $0xe8] sm:$0xf] %vm2781_vm3, %v2706_v35 }
 0x216   : > { %v2712_v29 = vpop.permute.xlu1 %2711 }
 0x217   : > { %2843 = vst.msk [vmem:[%s4104_s8 + $0xf4] sm:$0xf] %vm2781_vm3, %v2712_v29  ;;  %v2710_v53 = vpop.permute.xlu0 %2709 }
 0x218   : > { %2842 = vst.msk [vmem:[%s4104_s8 + $0xf0] sm:$0xf] %vm2781_vm3, %v2710_v53 }
 0x21a   : > { %v2716_v40 = vpop.permute.xlu1 %2715 }
 0x21b   : > { %2845 = vst.msk [vmem:[%s4104_s8 + $0xfc] sm:$0xf] %vm2781_vm3, %v2716_v40  ;;  %v2714_v63 = vpop.permute.xlu0 %2713 }
 0x21c   : > { %2844 = vst.msk [vmem:[%s4104_s8 + $0xf8] sm:$0xf] %vm2781_vm3, %v2714_v63 }
 0x21d PF: > { %s18_s24 = sadd.s32 1, %s3557_s24  }
 0x21e   : > { %p15_p1 = scmp.ge.s32.totalorder %s18_s24, 4  }
 0x220   :  { %17 = sbr.rel (!%p15_p1) target bundleno = 1 (0x1), region = 98 }
 0x225   :  { %2868 = vsyncpa [#allocation3], 1 }
 0x226   :  { %2870 = vsyncpa [#allocation3 + $0x1], 1 }

// kernel: tile.13
= control target key start
LH: loop header
LB: loop body
LE: loop exit
PB: predicated region body
PF: predicated region fallthrough
CT: control target
= control target key end

     0   :  { %s22_s0 = inlined_call_operand.vmem [shape: f32[16], index: 0, kind: input, shape index: {}]   ;;  %s23_s1 = inlined_call_operand.vmem [shape: f32[8,16], index: 1, kind: output, shape index: {}]  }
   0x1   :  { %v4_v0 = vld [vmem:[%s22_s0] ss:$0 sm:$0xff] }
   0x2   :  { %5 = vst [vmem:[%s23_s1] sm:$0xff] %v4_v0 }

// kernel: tile.14
= control target key start
LH: loop header
LB: loop body
LE: loop exit
PB: predicated region body
PF: predicated region fallthrough
CT: control target
= control target key end

     0   :  { %s69_s10 = smov 112   ;;  %s70_s11 = smov 80   ;;  %vm3_vm0 = vcmask 130048   ;;  %vm9_vm1 = vcmask 1048448   ;;  %vm15_vm2 = vcmask 917248   ;;  %vm21_vm3 = vcmask 786048   ;;  %s113_s0 = inlined_call_operand.vmem [shape: f32[8,16], index: 0, kind: input, shape index: {}]   ;;  %s114_s1 = inlined_call_operand.vmem [shape: f32[1,128], index: 1, kind: output, shape index: {}]  }
   0x1   :  { %v55_v0 = vld [vmem:[%s113_s0 + $0x7] sm:$0x1]   ;;  %v57_v1 = vld [vmem:[%s113_s0 + $0x5] sm:$0x1]   ;;  %v56_v2 = vld [vmem:[%s113_s0 + $0x6] sm:$0x1]  }
   0x2   :  { %7 = vrot.lane.b32.xlu0 %v55_v0, %s69_s10  ;;  %19 = vrot.lane.b32.xlu1 %v57_v1, %s70_s11  ;;  %v58_v3 = vld [vmem:[%s113_s0 + $0x4] sm:$0x1]   ;;  %v2_v4 = vld [vmem:[%s113_s0] sm:$0x1]   ;;  %s71_s18 = smov 96   ;;  %s72_s19 = smov 64  }
   0x3   :  { %4 = vst.msk [vmem:[#allocation0] sm:$0x1] %vm3_vm0, %v2_v4   ;;  %v59_v5 = vld [vmem:[%s113_s0 + $0x3] sm:$0x1]   ;;  %v60_v6 = vld [vmem:[%s113_s0 + $0x2] sm:$0x1]  }
   0x4   :  { %s73_s24 = smov 48   ;;  %s74_s25 = smov 32   ;;  %v61_v7 = vld [vmem:[%s113_s0 + $0x1] sm:$0x1]   ;;  %vm27_vm4 = vcmask 654848   ;;  %vm33_vm5 = vcmask 523648  }
   0x5   :  { %s75_s0 = smov 16   ;;  %vm39_vm6 = vcmask 392448   ;;  %vm45_vm7 = vcmask 261248  }
   0x6   :  { %13 = vrot.lane.b32.xlu0 %v56_v2, %s71_s18  ;;  %25 = vrot.lane.b32.xlu1 %v58_v3, %s72_s19 }
   0xa   :  { %31 = vrot.lane.b32.xlu0 %v59_v5, %s73_s24  ;;  %37 = vrot.lane.b32.xlu1 %v60_v6, %s74_s25 }
   0xe   :  { %43 = vrot.lane.b32.xlu0 %v61_v7, %s75_s0 }
  0x74   :  { %v8_v8 = vpop.permute.xlu0 %7   ;;  %v20_v9 = vpop.permute.xlu1 %19  }
  0x75   :  { %10 = vst.msk [vmem:[#allocation0] sm:$0x1] %vm9_vm1, %v8_v8  }
  0x78   :  { %v14_v10 = vpop.permute.xlu0 %13   ;;  %v26_v11 = vpop.permute.xlu1 %25  }
  0x79   :  { %16 = vst.msk [vmem:[#allocation0] sm:$0x1] %vm15_vm2, %v14_v10  }
  0x7a   :  { %22 = vst.msk [vmem:[#allocation0] sm:$0x1] %vm21_vm3, %v20_v9  }
  0x7b   :  { %28 = vst.msk [vmem:[#allocation0] sm:$0x1] %vm27_vm4, %v26_v11  }
  0x7c   :  { %v32_v12 = vpop.permute.xlu0 %31   ;;  %v38_v13 = vpop.permute.xlu1 %37  }
  0x7d   :  { %34 = vst.msk [vmem:[#allocation0] sm:$0x1] %vm33_vm5, %v32_v12  }
  0x7e   :  { %40 = vst.msk [vmem:[#allocation0] sm:$0x1] %vm39_vm6, %v38_v13  }
  0x80   :  { %v44_v14 = vpop.permute.xlu0 %43  }
  0x81   :  { %46 = vst.msk [vmem:[#allocation0] sm:$0x1] %vm45_vm7, %v44_v14  }
  0x88   :  { %v51_v15 = vld [vmem:[#allocation0] sm:$0x1] }
  0x89   :  { %54 = vst [vmem:[%s114_s1] sm:$0x1] %v51_v15 }

// kernel: interlacer_forward.3
= control target key start
LH: loop header
LB: loop body
LE: loop exit
PB: predicated region body
PF: predicated region fallthrough
CT: control target
= control target key end

     0   :  { %s2725_s15 = smov 0   ;;  %s3612_s0 = inlined_call_operand.vmem [shape: bf16[2,10,10,160], index: 0, kind: input, shape index: {}]   ;;  %s3613_s1 = inlined_call_operand.vmem [shape: bf16[9,160,128], index: 1, kind: input, shape index: {}]   ;;  %s3614_s2 = inlined_call_operand.vmem [shape: f32[1,128], index: 2, kind: input, shape index: {}]   ;;  %s3615_s3 = inlined_call_operand.vmem [shape: f32[1,128], index: 3, kind: input, shape index: {}]   ;;  %s3616_s4 = inlined_call_operand.vmem [shape: f32[2,64,128], index: 4, kind: output, shape index: {}]  }
   0x1 LB: > { %s2183_s16 = sadd.s32 4294967295, %s2697_s15   ;;  %p2187_p0 = scmp.ge.s32.totalorder %s2697_s15, 1  ;;  %s2697_s15 = sphi %s2725_s15, %s14_s15  }
   0x2   : > { %p162_p1 = scmp.lt.s32.totalorder %s2697_s15, 3 }
   0x4   : > { %p163_p2 = pnand %p2187_p0, %p162_p1 }
   0x5   : > { %p188_p3 = scmp.lt.s32.totalorder (!%p163_p2), %s2183_s16, 1 }
   0x6   : > { %166 = sbr.rel (%p163_p2) target bundleno = 438 (0x1b6), region = 36 }
   0xb   : > { %v2583_v0 = vld [vmem:[%s3613_s1 + $0x88] sm:$0xff]   ;;  %v2699_v1 = vmov 0   ;;  %v2584_v2 = vld [vmem:[%s3613_s1 + $0x38] sm:$0xff]   ;;  %v2585_v3 = vld [vmem:[%s3613_s1 + $0x80] sm:$0xff]   ;;  %s3622_s16 = smov (!%p188_p3, %s2183_s16), 1  ;;  %vm554_vm0 = vcmask 261120  }
   0xc   : > { %567 = vmatprep.subr.bf16.mxu0 %v2699_v1  ;;  %732 = vmatprep.subr.bf16.mxu1 %v2699_v1  ;;  %v2586_v4 = vld [vmem:[%s3613_s1 + $0x30] sm:$0xff]   ;;  %v2587_v5 = vld [vmem:[%s3613_s1 + $0x78] sm:$0xff]   ;;  %v2588_v6 = vld [vmem:[%s3613_s1 + $0x28] sm:$0xff]   ;;  %s2573_s7 = smul.u32 160, %s3622_s16  ;;  %vm219_vm1 = vsmask.f32 3328 }
   0xd   : > { %568 = vmatpush1.bf16.msra.mxu0 %v2583_v0  ;;  %733 = vmatpush1.bf16.msra.mxu1 %v2584_v2  ;;  %v2589_v7 = vld [vmem:[%s3613_s1 + $0x70] sm:$0xff]   ;;  %v2590_v8 = vld [vmem:[%s3613_s1 + $0x20] sm:$0xff]   ;;  %v2591_v9 = vld [vmem:[%s3613_s1 + $0x68] sm:$0xff]   ;;  %vm220_vm2 = vsmask.f32 7440  ;;  %vm382_vm4 = vcmask 1042432  }
   0xe   : > { %569 = vmatprep.subr.bf16.mxu0 %v2699_v1  ;;  %734 = vmatprep.subr.bf16.mxu1 %v2699_v1  ;;  %v2592_v10 = vld [vmem:[%s3613_s1 + $0x18] sm:$0xff]   ;;  %s2779_s14 = scalar_lea.vmem %s3612_s0, %s2573_s7  ;;  %v2593_v11 = vld [vmem:[%s3613_s1 + $0x60] sm:$0xff]   ;;  %v2594_v12 = vld [vmem:[%s3613_s1 + $0x10] sm:$0xff]   ;;  %vm383_vm5 = vcmask 1046532   ;;  %s2552_s19 = sshll.u32 %s3622_s16, 6 }
   0xf   : > { %v2595_v13 = vld [vmem:[%s3613_s1 + $0x58] sm:$0xff]   ;;  %v2793_v14 = vld [vmem:[%s2779_s14] sm:$0xff]  ;;  %v2796_v15 = vld [vmem:[%s2779_s14 + $0x8] sm:$0x11]  ;;  %s3576_s16 = scalar_lea.vmem %s3616_s4, %s2552_s19 }
  0x10   : > { %v2799_v16 = vld [vmem:[%s2779_s14 + $0x10] sm:$0xff]  ;;  %v2802_v17 = vld [vmem:[%s2779_s14 + $0x18] sm:$0x11]  ;;  %v2805_v18 = vld [vmem:[%s2779_s14 + $0x20] sm:$0xff]  ;;  %v223_v20 = vshrl.u32 %v2793_v14, 16  ;;  %v226_v23 = vshll.u32 %v2793_v14, 16 }
  0x11   : > { %570 = vmatpush1.bf16.msra.mxu0 %v2585_v3  ;;  %735 = vmatpush1.bf16.msra.mxu1 %v2586_v4  ;;  %v2808_v19 = vld [vmem:[%s2779_s14 + $0x28] sm:$0x11]  ;;  %v2244_v21 = vcombine.high %v2793_v14, %v2799_v16  ;;  %v232_v24 = vshll.u32 %v2796_v15, 16  ;;  %v237_v25 = vshrl.u32 %v2799_v16, 16  ;;  %v240_v27 = vshll.u32 %v2799_v16, 16  ;;  %v2597_v36 = vld [vmem:[%s3613_s1 + $0x50] sm:$0xff]   ;;  %vm2836_vm3 = vmor %vm219_vm1, %vm220_vm2 }
  0x12   : > { %571 = vmatprep.subr.bf16.mxu0 %v2699_v1  ;;  %736 = vmatprep.subr.bf16.mxu1 %v2699_v1  ;;  %v2596_v22 = vld [vmem:[%s3613_s1 + $0x8] sm:$0xff]   ;;  %v225_v26 = vrot.slane %v223_v20, 4  ;;  %v246_v28 = vshll.u32 %v2802_v17, 16  ;;  %v251_v29 = vshrl.u32 %v2805_v18, 16  ;;  %v228_v30 = vrot.slane %v226_v23, 5  ;;  %v2598_v37 = vld [vmem:[%s3613_s1] sm:$0xff]   ;;  %vm3043_vm6 = vmor %vm382_vm4, %vm383_vm5 }
  0x13   : > { %v239_v31 = vrot.slane %v237_v25, 4  ;;  %v254_v32 = vshll.u32 %v2805_v18, 16  ;;  %2261 = vmatprep.mubr.msk.bf16.mxu1 %vm554_vm0, %v2244_v21  ;;  %v242_v33 = vrot.slane %v240_v27, 5  ;;  %v260_v35 = vshll.u32 %v2808_v19, 16  ;;  %v2599_v47 = vld [vmem:[%s3613_s1 + $0x98] sm:$0xff]   ;;  %v2600_v49 = vld [vmem:[%s3613_s1 + $0x48] sm:$0xff]  }
  0x14   : > { %v253_v34 = vrot.slane %v251_v29, 4  ;;  %v229_v38 = vor.u32 %v228_v30, %v225_v26  ;;  %v234_v39 = vrot.slane %v232_v24, 5  ;;  %v248_v43 = vrot.slane %v246_v28, 5  ;;  %v2855_v53 = vld [vmem:[%s2779_s14 + $0x30] sm:$0xff]  ;;  %v2858_v54 = vld [vmem:[%s2779_s14 + $0x38] sm:$0x11] }
  0x15   : > { %572 = vmatpush1.bf16.msra.mxu0 %v2587_v5  ;;  %737 = vmatpush1.bf16.msra.mxu1 %v2588_v6  ;;  %v256_v40 = vrot.slane %v254_v32, 5  ;;  %v243_v42 = vor.u32 %v242_v33, %v239_v31  ;;  %v262_v46 = vrot.slane %v260_v35, 5  ;;  %v265_v57 = vshrl.u32 %v2855_v53, 16  ;;  %v2601_v61 = vld [vmem:[%s3613_s1 + $0x90] sm:$0xff]   ;;  %v2602_v0 = vld [vmem:[%s3613_s1 + $0x40] sm:$0xff]   ;;  %v2605_v20 = vld [vmem:[%s3613_s1 + $0xd8] sm:$0xff]  }
  0x16   : > { %573 = vmatprep.subr.bf16.mxu0 %v2699_v1  ;;  %738 = vmatprep.subr.bf16.mxu1 %v2699_v1  ;;  %v230_v44 = vrot.slane %v229_v38, 4  ;;  %v268_v59 = vshll.u32 %v2855_v53, 16  ;;  %v274_v60 = vshll.u32 %v2858_v54, 16  ;;  %v2884_v5 = vld [vmem:[%s2779_s14 + $0x40] sm:$0xff]  ;;  %v2887_v6 = vld [vmem:[%s2779_s14 + $0x48] sm:$0x11]  ;;  %v2920_v33 = vcombine.high %v2805_v18, %v2855_v53 }
  0x17   : > { %v257_v45 = vor.u32 %v256_v40, %v253_v34  ;;  %v244_v48 = vrot.slane %v243_v42, 4  ;;  %v267_v62 = vrot.slane %v265_v57, 4  ;;  %v2606_v24 = vld [vmem:[%s3613_s1 + $0x128] sm:$0xff]   ;;  %v2607_v28 = vld [vmem:[%s3613_s1 + $0xd0] sm:$0xff]   ;;  %v2608_v35 = vld [vmem:[%s3613_s1 + $0x120] sm:$0xff]  }
  0x18   : > { %v235_v50 = vsel %vm2836_vm3, %v230_v44, %v234_v39  ;;  %v270_v2 = vrot.slane %v268_v59, 5  ;;  %v276_v4 = vrot.slane %v274_v60, 5  ;;  %v2935_v42 = vld [vmem:[%s2779_s14 + $0x60] sm:$0xff]  ;;  %v2941_v44 = vld [vmem:[%s2779_s14 + $0x70] sm:$0xff]  ;;  %v2609_v59 = vld [vmem:[%s3613_s1 + $0xc8] sm:$0xff]  }
  0x19   : > { %574 = vmatpush1.bf16.msra.mxu0 %v2589_v7  ;;  %739 = vmatpush1.bf16.msra.mxu1 %v2590_v8  ;;  %v258_v51 = vrot.slane %v257_v45, 4  ;;  %v2852_v52 = vsel %vm2836_vm3, %v244_v48, %v248_v43  ;;  %v2890_v7 = vld [vmem:[%s2779_s14 + $0x50] sm:$0xff]  ;;  %v2938_v43 = vld [vmem:[%s2779_s14 + $0x68] sm:$0x11]  ;;  %v310_v48 = vshll.u32 %v2935_v42, 16  ;;  %v2610_v60 = vld [vmem:[%s3613_s1 + $0x118] sm:$0xff]  }
  0x1a   : > { %575 = vmatprep.subr.bf16.mxu0 %v2699_v1  ;;  %740 = vmatprep.subr.bf16.mxu1 %v2699_v1  ;;  %v2222_v56 = vcombine.high %v235_v50, %v2852_v52  ;;  %v2221_v3 = vcombine.low %v235_v50, %v2852_v52  ;;  %v271_v8 = vor.u32 %v270_v2, %v267_v62  ;;  %v293_v21 = vshrl.u32 %v2890_v7, 16  ;;  %v2684_v41 = vld [vmem:[%s3613_s1 + $0x290] sm:$0xff]  }
  0x1b   : > { %v2863_v55 = vsel %vm2836_vm3, %v258_v51, %v262_v46  ;;  %v2947_v46 = vld [vmem:[%s2779_s14 + $0x78] sm:$0x11]  ;;  %v321_v51 = vshrl.u32 %v2941_v44, 16  ;;  %v312_v2 = vrot.slane %v310_v48, 5 }
  0x1c   : > { %v2369_v58 = vcombine.low %v2852_v52, %v2863_v55  ;;  %2239 = vmatprep.mubr.msk.bf16.mxu0 %vm554_vm0, %v2222_v56  ;;  %v2370_v63 = vcombine.high %v2852_v52, %v2863_v55  ;;  %v272_v25 = vrot.slane %v271_v8, 4  ;;  %v295_v30 = vrot.slane %v293_v21, 4  ;;  %v2613_v21 = vld [vmem:[%s3613_s1 + $0xc0] sm:$0xff]  }
  0x1d   : > { %576 = vmatpush1.bf16.msra.mxu0 %v2591_v9  ;;  %741 = vmatpush1.bf16.msra.mxu1 %v2592_v10  ;;  %v2893_v9 = vld [vmem:[%s2779_s14 + $0x58] sm:$0x11]  ;;  %v279_v10 = vshrl.u32 %v2884_v5, 16  ;;  %v324_v56 = vshll.u32 %v2941_v44, 16  ;;  %v330_v57 = vshll.u32 %v2947_v46, 16  ;;  %v2662_v52 = vld [vmem:[%s3613_s1 + $0x260] sm:$0xff]  }
  0x1e   : > { %577 = vmatprep.subr.bf16.mxu0 %v2699_v1  ;;  %742 = vmatprep.subr.bf16.mxu1 %v2699_v1  ;;  %v302_v23 = vshll.u32 %v2893_v9, 16  ;;  %v2916_v32 = vsel %vm2836_vm3, %v272_v25, %v276_v4 }
  0x1f   : > { %v281_v26 = vrot.slane %v279_v10, 4  ;;  %v2932_v39 = vcombine.low %v2863_v55, %v2916_v32  ;;  %v326_v4 = vrot.slane %v324_v56, 5 }
  0x20   : > { %v304_v38 = vrot.slane %v302_v23, 5  ;;  %v2614_v23 = vld [vmem:[%s3613_s1 + $0x110] sm:$0xff]  }
  0x21   : > { %578 = vmatpush1.bf16.msra.mxu0 %v2593_v11  ;;  %743 = vmatpush1.bf16.msra.mxu1 %v2594_v12  ;;  %v282_v11 = vshll.u32 %v2884_v5, 16  ;;  %v288_v12 = vshll.u32 %v2887_v6, 16 }
  0x22   : > { %579 = vmatprep.subr.bf16.mxu0 %v2699_v1  ;;  %744 = vmatprep.subr.bf16.mxu1 %v2699_v1 }
  0x23   : > { %v284_v27 = vrot.slane %v282_v11, 5  ;;  %v290_v29 = vrot.slane %v288_v12, 5  ;;  %v2984_v12 = vcombine.high %v2884_v5, %v2890_v7 }
  0x25   : > { %580 = vmatpush1.bf16.msra.mxu0 %v2595_v13  ;;  %745 = vmatpush1.bf16.msra.mxu1 %v2596_v22  ;;  %v2243_v13 = vcombine.low %v2793_v14, %v2799_v16  ;;  %v296_v22 = vshll.u32 %v2890_v7, 16  ;;  %v285_v34 = vor.u32 %v284_v27, %v281_v26 }
  0x26   : > { %581 = vmatprep.subr.bf16.mxu0 %v2699_v1  ;;  %746 = vmatprep.subr.bf16.mxu1 %v2699_v1 }
  0x27   : > { %v298_v31 = vrot.slane %v296_v22, 5  ;;  %v286_v40 = vrot.slane %v285_v34, 4  ;;  %v3022_v34 = vcombine.low %v2884_v5, %v2890_v7 }
  0x29   : > { %582 = vmatpush1.bf16.msra.mxu0 %v2597_v36  ;;  %747 = vmatpush1.bf16.msra.mxu1 %v2598_v37  ;;  %v2927_v36 = vcombine.high %v2863_v55, %v2916_v32  ;;  %v299_v37 = vor.u32 %v298_v31, %v295_v30  ;;  %v2956_v50 = vsel %vm2836_vm3, %v286_v40, %v290_v29  ;;  %v2615_v31 = vld [vmem:[%s3613_s1 + $0xb8] sm:$0xff]   ;;  %v391_v40 = vrot.slane %v2802_v17, 5 }
  0x2a   : > { %595 = vmatprep.subr.bf16.mxu0 %v2699_v1  ;;  %760 = vmatprep.subr.bf16.mxu1 %v2699_v1  ;;  %v2372_v25 = vcombine.high %v2916_v32, %v2956_v50  ;;  %v2371_v29 = vcombine.low %v2916_v32, %v2956_v50  ;;  %v2192_v17 = vrot.slane %v2799_v16, 9  ;;  %v2666_v32 = vld [vmem:[%s3613_s1 + $0x250] sm:$0xff]  }
  0x2b   : > { %v300_v45 = vrot.slane %v299_v37, 4  ;;  %v2616_v37 = vld [vmem:[%s3613_s1 + $0x108] sm:$0xff]  }
  0x2d   : > { %596 = vmatpush2.bf16.msra.mxu0 %v2599_v47  ;;  %761 = vmatpush2.bf16.msra.mxu1 %v2600_v49  ;;  %v307_v47 = vshrl.u32 %v2935_v42, 16  ;;  %v316_v49 = vshll.u32 %v2938_v43, 16  ;;  %v2973_v62 = vsel %vm2836_vm3, %v300_v45, %v304_v38  ;;  %v387_v38 = vrot.slane %v2796_v15, 5 }
  0x2e   : > { %597 = vmatprep.subr.bf16.mxu0 %v2699_v1  ;;  %762 = vmatprep.subr.bf16.mxu1 %v2699_v1  ;;  %v2979_v8 = vcombine.high %v2956_v50, %v2973_v62  ;;  %v3007_v27 = vcombine.low %v2956_v50, %v2973_v62  ;;  %v2191_v15 = vrot.slane %v2793_v14, 9 }
  0x2f   : > { %v318_v11 = vrot.slane %v316_v49, 5  ;;  %v2619_v49 = vld [vmem:[%s3613_s1 + $0xb0] sm:$0xff]  }
  0x30   : > { %v388_v56 = vsel %vm3043_vm6, %v2191_v15, %v387_v38  ;;  %v2327_v38 = vcombine.low %v2799_v16, %v2805_v18  ;;  %v2634_v15 = vld [vmem:[%s3613_s1 + $0x1c8] sm:$0xff]  }
  0x31   : > { %598 = vmatpush2.bf16.msra.mxu0 %v2601_v61  ;;  %763 = vmatpush2.bf16.msra.mxu1 %v2602_v0  ;;  %v2969_v61 = vcombine.low %v2805_v18, %v2855_v53  ;;  %v309_v0 = vrot.slane %v307_v47, 4  ;;  %v3040_v47 = vcombine.high %v2935_v42, %v2941_v44 }
  0x32   : > { %918 = vmatprep.subr.bf16.mxu0 %v2699_v1  ;;  %1098 = vmatprep.subr.bf16.mxu1 %v2699_v1 }
  0x33   : > { %v313_v10 = vor.u32 %v312_v2, %v309_v0  ;;  %v2622_v0 = vld [vmem:[%s3613_s1 + $0xf8] sm:$0xff]  }
  0x34   : > { %600 = vmatmul.mubr.bf16.vlgmr.msra.gmra.mxu0 %v2221_v3  ;;  %765 = vmatmul.mubr.bf16.vlgmr.msra.gmra.mxu1 %v2243_v13  ;;  %v323_v3 = vrot.slane %v321_v51, 4  ;;  %v2620_v51 = vld [vmem:[%s3613_s1 + $0x100] sm:$0xff]  }
  0x35   : > { %919 = vmatpush1.bf16.msra.mxu0 %v2605_v20  ;;  %1099 = vmatpush1.bf16.msra.mxu1 %v2606_v24  ;;  %v332_v20 = vrot.slane %v330_v57, 5  ;;  %v314_v22 = vrot.slane %v313_v10, 4  ;;  %v3070_v57 = vsel %vm3043_vm6, %v2192_v17, %v391_v40  ;;  %v2626_v10 = vld [vmem:[%s3613_s1 + $0xf0] sm:$0xff]   ;;  %v2633_v40 = vld [vmem:[%s3613_s1 + $0x178] sm:$0xff]  }
  0x36   : > { %920 = vmatprep.subr.bf16.mxu0 %v2699_v1  ;;  %1100 = vmatprep.subr.bf16.mxu1 %v2699_v1  ;;  %v327_v13 = vor.u32 %v326_v4, %v323_v3  ;;  %v2286_v2 = vcombine.high %v388_v56, %v3070_v57  ;;  %v2328_v3 = vcombine.high %v2799_v16, %v2805_v18  ;;  %v2625_v4 = vld [vmem:[%s3613_s1 + $0xa0] sm:$0xff]   ;;  %v403_v16 = vrot.slane %v2887_v6, 5 }
  0x37   : > { %2240 = vmatprep.mubr.msk.bf16.mxu0 %vm554_vm0, %v2927_v36  ;;  %2262 = vmatprep.mubr.msk.bf16.mxu1 %vm554_vm0, %v2920_v33  ;;  %v3001_v26 = vsel %vm2836_vm3, %v314_v22, %v318_v11  ;;  %v2627_v11 = vld [vmem:[%s3613_s1 + $0xe8] sm:$0xff]   ;;  %v2194_v22 = vrot.slane %v2855_v53, 9  ;;  %v2636_v6 = vld [vmem:[%s3613_s1 + $0x1c0] sm:$0xff]  }
  0x38   : > { %v328_v24 = vrot.slane %v327_v13, 4  ;;  %v2374_v30 = vcombine.high %v2973_v62, %v3001_v26  ;;  %v2628_v13 = vld [vmem:[%s3613_s1 + $0x138] sm:$0xff]  }
  0x39   : > { %921 = vmatpush1.bf16.msra.mxu0 %v2607_v28  ;;  %1101 = vmatpush1.bf16.msra.mxu1 %v2608_v35  ;;  %v2373_v35 = vcombine.low %v2973_v62, %v3001_v26 }
  0x3a   : > { %922 = vmatprep.subr.bf16.mxu0 %v2699_v1  ;;  %1102 = vmatprep.subr.bf16.mxu1 %v2699_v1  ;;  %v3011_v28 = vsel %vm2836_vm3, %v328_v24, %v332_v20  ;;  %v2193_v20 = vrot.slane %v2805_v18, 9  ;;  %v2629_v24 = vld [vmem:[%s3613_s1 + $0xe0] sm:$0xff]   ;;  %v2330_v18 = vcombine.high %v2855_v53, %v2884_v5 }
  0x3b   : > { %v3035_v45 = vcombine.high %v3001_v26, %v3011_v28  ;;  %v3064_v14 = vcombine.low %v3001_v26, %v3011_v28  ;;  %v2671_v26 = vld [vmem:[%s3613_s1 + $0x1e8] sm:$0xff]  }
  0x3c   : > { %608 = vmatmul.mubr.bf16.gmra.mxu0 %v2932_v39  ;;  %773 = vmatmul.mubr.bf16.gmra.mxu1 %v2969_v61 }
  0x3d   : > { %923 = vmatpush1.bf16.msra.mxu0 %v2609_v59  ;;  %1103 = vmatpush1.bf16.msra.mxu1 %v2610_v60  ;;  %v2621_v59 = vld [vmem:[%s3613_s1 + $0xa8] sm:$0xff]   ;;  %v3077_v60 = vcombine.low %v2935_v42, %v2941_v44 }
  0x3e   : > { %924 = vmatprep.subr.bf16.mxu0 %v2699_v1  ;;  %1104 = vmatprep.subr.bf16.mxu1 %v2699_v1 }
  0x3f   : > { %2241 = vmatprep.mubr.msk.bf16.mxu0 %vm554_vm0, %v2979_v8  ;;  %2263 = vmatprep.mubr.msk.bf16.mxu1 %vm554_vm0, %v2984_v12 }
  0x41   : > { %925 = vmatpush1.bf16.msra.mxu0 %v2613_v21  ;;  %1105 = vmatpush1.bf16.msra.mxu1 %v2614_v23  ;;  %v395_v21 = vrot.slane %v2808_v19, 5  ;;  %v399_v23 = vrot.slane %v2858_v54, 5  ;;  %v2285_v19 = vcombine.low %v388_v56, %v3070_v57  ;;  %v407_v56 = vrot.slane %v2893_v9, 5 }
  0x42   : > { %926 = vmatprep.subr.bf16.mxu0 %v2699_v1  ;;  %1106 = vmatprep.subr.bf16.mxu1 %v2699_v1 }
  0x43   : > { %v3126_v54 = vsel %vm3043_vm6, %v2194_v22, %v399_v23  ;;  %v2641_v22 = vld [vmem:[%s3613_s1 + $0x160] sm:$0xff]   ;;  %v2644_v23 = vld [vmem:[%s3613_s1 + $0x158] sm:$0xff]  }
  0x44   : > { %616 = vmatmul.mubr.bf16.gmra.mxu0 %v3007_v27  ;;  %781 = vmatmul.mubr.bf16.gmra.mxu1 %v3022_v34 }
  0x45   : > { %927 = vmatpush1.bf16.msra.mxu0 %v2615_v31  ;;  %1107 = vmatpush1.bf16.msra.mxu1 %v2616_v37  ;;  %v2630_v31 = vld [vmem:[%s3613_s1 + $0x130] sm:$0xff]   ;;  %v3122_v37 = vsel %vm3043_vm6, %v2193_v20, %v395_v21  ;;  %v411_v20 = vrot.slane %v2938_v43, 5  ;;  %v415_v21 = vrot.slane %v2947_v46, 5 }
  0x46   : > { %928 = vmatprep.subr.bf16.mxu0 %v2699_v1  ;;  %1108 = vmatprep.subr.bf16.mxu1 %v2699_v1  ;;  %v3140_v17 = vcombine.high %v3122_v37, %v3126_v54  ;;  %v3160_v9 = vcombine.low %v3122_v37, %v3126_v54  ;;  %v2642_v43 = vld [vmem:[%s3613_s1 + $0x1b0] sm:$0xff]  }
  0x47   : > { %2242 = vmatprep.mubr.msk.bf16.mxu0 %vm554_vm0, %v3035_v45  ;;  %2264 = vmatprep.mubr.msk.bf16.mxu1 %vm554_vm0, %v3040_v47 }
  0x49   : > { %929 = vmatpush1.bf16.msra.mxu0 %v2619_v49  ;;  %1109 = vmatpush1.bf16.msra.mxu1 %v2620_v51  ;;  %v2195_v49 = vrot.slane %v2884_v5, 9  ;;  %v2196_v51 = vrot.slane %v2890_v7, 9 }
  0x4a   : > { %930 = vmatprep.subr.bf16.mxu0 %v2699_v1  ;;  %1110 = vmatprep.subr.bf16.mxu1 %v2699_v1 }
  0x4c   : > { %624 = vmatmul.mubr.bf16.gmra.mxu0 %v3064_v14  ;;  %789 = vmatmul.mubr.bf16.gmra.mxu1 %v3077_v60 }
  0x4d   : > { %931 = vmatpush1.bf16.msra.mxu0 %v2621_v59  ;;  %1111 = vmatpush1.bf16.msra.mxu1 %v2622_v0  ;;  %v2635_v59 = vld [vmem:[%s3613_s1 + $0x170] sm:$0xff]   ;;  %v2638_v0 = vld [vmem:[%s3613_s1 + $0x168] sm:$0xff]  }
  0x4e   : > { %932 = vmatprep.subr.bf16.mxu0 %v2699_v1  ;;  %1112 = vmatprep.subr.bf16.mxu1 %v2699_v1 }
  0x4f   : > { %2303 = vmatprep.mubr.msk.bf16.mxu0 %vm554_vm0, %v2286_v2  ;;  %2345 = vmatprep.mubr.msk.bf16.mxu1 %vm554_vm0, %v2328_v3  ;;  %v3168_v2 = vsel %vm3043_vm6, %v2195_v49, %v403_v16  ;;  %v3172_v3 = vsel %vm3043_vm6, %v2196_v51, %v407_v56  ;;  %v2648_v49 = vld [vmem:[%s3613_s1 + $0x1a0] sm:$0xff]   ;;  %v2651_v56 = vld [vmem:[%s3613_s1 + $0x198] sm:$0xff]  }
  0x50   : > { %v3204_v46 = vcombine.low %v3168_v2, %v3172_v3 }
  0x51   : > { %933 = vmatpush1.bf16.msra.mxu0 %v2625_v4  ;;  %1113 = vmatpush1.bf16.msra.mxu1 %v2626_v10  ;;  %v2329_v4 = vcombine.low %v2855_v53, %v2884_v5  ;;  %v2639_v10 = vld [vmem:[%s3613_s1 + $0x1b8] sm:$0xff]   ;;  %v2332_v53 = vcombine.high %v2890_v7, %v2935_v42  ;;  %v2198_v5 = vrot.slane %v2941_v44, 9 }
  0x52   : > { %946 = vmatprep.subr.bf16.mxu0 %v2699_v1  ;;  %1126 = vmatprep.subr.bf16.mxu1 %v2699_v1 }
  0x55   : > { %947 = vmatpush2.bf16.msra.mxu0 %v2627_v11  ;;  %1127 = vmatpush2.bf16.msra.mxu1 %v2628_v13  ;;  %v3183_v11 = vcombine.high %v3168_v2, %v3172_v3  ;;  %v2197_v13 = vrot.slane %v2935_v42, 9 }
  0x56   : > { %948 = vmatprep.subr.bf16.mxu0 %v2699_v1  ;;  %1128 = vmatprep.subr.bf16.mxu1 %v2699_v1 }
  0x59   : > { %949 = vmatpush2.bf16.msra.mxu0 %v2629_v24  ;;  %1129 = vmatpush2.bf16.msra.mxu1 %v2630_v31  ;;  %v3212_v24 = vsel %vm3043_vm6, %v2197_v13, %v411_v20  ;;  %v3216_v31 = vsel %vm3043_vm6, %v2198_v5, %v415_v21  ;;  %v2659_v5 = vld [vmem:[%s3613_s1 + $0x218] sm:$0xff]   ;;  %v2660_v21 = vld [vmem:[%s3613_s1 + $0x268] sm:$0xff]  }
  0x5a   : > { %1278 = vmatprep.subr.bf16.mxu0 %v2699_v1  ;;  %1458 = vmatprep.subr.bf16.mxu1 %v2699_v1  ;;  %v3247_v16 = vcombine.low %v3212_v24, %v3216_v31 }
  0x5c   : > { %951 = vmatmul.mubr.bf16.vlgmr.msra.gmra.mxu0 %v2285_v19  ;;  %1131 = vmatmul.mubr.bf16.vlgmr.msra.gmra.mxu1 %v2327_v38  ;;  %v2331_v19 = vcombine.low %v2890_v7, %v2935_v42  ;;  %v3221_v38 = vld [vmem:[%s2779_s14 + $0x80] sm:$0xff]  ;;  %v2647_v42 = vld [vmem:[%s3613_s1 + $0x150] sm:$0xff]  }
  0x5d   : > { %1279 = vmatpush1.bf16.msra.mxu0 %v2633_v40  ;;  %1459 = vmatpush1.bf16.msra.mxu1 %v2634_v15  ;;  %v2645_v40 = vld [vmem:[%s3613_s1 + $0x1a8] sm:$0xff]   ;;  %v3230_v15 = vcombine.high %v3212_v24, %v3216_v31  ;;  %v2334_v7 = vcombine.high %v2941_v44, %v3221_v38  ;;  %v2333_v51 = vcombine.low %v2941_v44, %v3221_v38  ;;  %v2653_v44 = vld [vmem:[%s3613_s1 + $0x140] sm:$0xff]   ;;  %v335_v13 = vshrl.u32 %v3221_v38, 16 }
  0x5e   : > { %1280 = vmatprep.subr.bf16.mxu0 %v2699_v1  ;;  %1460 = vmatprep.subr.bf16.mxu1 %v2699_v1  ;;  %v338_v20 = vshll.u32 %v3221_v38, 16 }
  0x5f   : > { %2304 = vmatprep.mubr.msk.bf16.mxu0 %vm554_vm0, %v3140_v17  ;;  %2346 = vmatprep.mubr.msk.bf16.mxu1 %vm554_vm0, %v2330_v18  ;;  %v2650_v18 = vld [vmem:[%s3613_s1 + $0x148] sm:$0xff]  }
  0x61   : > { %1281 = vmatpush1.bf16.msra.mxu0 %v2635_v59  ;;  %1461 = vmatpush1.bf16.msra.mxu1 %v2636_v6  ;;  %v2412_v59 = vcombine.high %v3070_v57, %v3122_v37  ;;  %v2654_v6 = vld [vmem:[%s3613_s1 + $0x190] sm:$0xff]  }
  0x62   : > { %1282 = vmatprep.subr.bf16.mxu0 %v2699_v1  ;;  %1462 = vmatprep.subr.bf16.mxu1 %v2699_v1 }
  0x64   : > { %959 = vmatmul.mubr.bf16.gmra.mxu0 %v3160_v9  ;;  %1139 = vmatmul.mubr.bf16.gmra.mxu1 %v2329_v4  ;;  %v2656_v4 = vld [vmem:[%s3613_s1 + $0x1d8] sm:$0xff]  }
  0x65   : > { %1283 = vmatpush1.bf16.msra.mxu0 %v2638_v0  ;;  %1463 = vmatpush1.bf16.msra.mxu1 %v2639_v10  ;;  %v2655_v0 = vld [vmem:[%s3613_s1 + $0x188] sm:$0xff]   ;;  %v2658_v10 = vld [vmem:[%s3613_s1 + $0x1d0] sm:$0xff]  }
  0x66   : > { %1284 = vmatprep.subr.bf16.mxu0 %v2699_v1  ;;  %1464 = vmatprep.subr.bf16.mxu1 %v2699_v1 }
  0x67   : > { %2305 = vmatprep.mubr.msk.bf16.mxu0 %vm554_vm0, %v3183_v11  ;;  %2347 = vmatprep.mubr.msk.bf16.mxu1 %vm554_vm0, %v2332_v53  ;;  %v2411_v53 = vcombine.low %v3070_v57, %v3122_v37  ;;  %v2414_v57 = vcombine.high %v3126_v54, %v3168_v2  ;;  %v337_v37 = vrot.slane %v335_v13, 4 }
  0x69   : > { %1285 = vmatpush1.bf16.msra.mxu0 %v2641_v22  ;;  %1465 = vmatpush1.bf16.msra.mxu1 %v2642_v43  ;;  %v340_v22 = vrot.slane %v338_v20, 5  ;;  %v2661_v43 = vld [vmem:[%s3613_s1 + $0x210] sm:$0xff]  }
  0x6a   : > { %1286 = vmatprep.subr.bf16.mxu0 %v2699_v1  ;;  %1466 = vmatprep.subr.bf16.mxu1 %v2699_v1 }
  0x6b   : > { %v341_v55 = vor.u32 %v340_v22, %v337_v37 }
  0x6c   : > { %967 = vmatmul.mubr.bf16.gmra.mxu0 %v3204_v46  ;;  %1147 = vmatmul.mubr.bf16.gmra.mxu1 %v2331_v19  ;;  %v2663_v19 = vld [vmem:[%s3613_s1 + $0x208] sm:$0xff]  }
  0x6d   : > { %1287 = vmatpush1.bf16.msra.mxu0 %v2644_v23  ;;  %1467 = vmatpush1.bf16.msra.mxu1 %v2645_v40  ;;  %v216_v23 = vld [vmem:[%s2779_s14 + $0x88] sm:$0x11]  ;;  %v2413_v40 = vcombine.low %v3126_v54, %v3168_v2  ;;  %v2665_v54 = vld [vmem:[%s3613_s1 + $0x200] sm:$0xff]   ;;  %v2199_v2 = vrot.slane %v3221_v38, 9 }
  0x6e   : > { %1288 = vmatprep.subr.bf16.mxu0 %v2699_v1  ;;  %1468 = vmatprep.subr.bf16.mxu1 %v2699_v1 }
  0x6f   : > { %2306 = vmatprep.mubr.msk.bf16.mxu0 %vm554_vm0, %v3230_v15  ;;  %2348 = vmatprep.mubr.msk.bf16.mxu1 %vm554_vm0, %v2334_v7  ;;  %v2664_v7 = vld [vmem:[%s3613_s1 + $0x258] sm:$0xff]  }
  0x71   : > { %1289 = vmatpush1.bf16.msra.mxu0 %v2647_v42  ;;  %1469 = vmatpush1.bf16.msra.mxu1 %v2648_v49  ;;  %v342_v42 = vrot.slane %v341_v55, 4 }
  0x72   : > { %1290 = vmatprep.subr.bf16.mxu0 %v2699_v1  ;;  %1470 = vmatprep.subr.bf16.mxu1 %v2699_v1 }
  0x74   : > { %975 = vmatmul.mubr.bf16.gmra.mxu0 %v3247_v16  ;;  %1155 = vmatmul.mubr.bf16.gmra.mxu1 %v2333_v51  ;;  %v2415_v51 = vcombine.low %v3172_v3, %v3212_v24 }
  0x75   : > { %1291 = vmatpush1.bf16.msra.mxu0 %v2650_v18  ;;  %1471 = vmatpush1.bf16.msra.mxu1 %v2651_v56  ;;  %v419_v18 = vrot.slane %v216_v23, 5 }
  0x76   : > { %1292 = vmatprep.subr.bf16.mxu0 %v2699_v1  ;;  %1472 = vmatprep.subr.bf16.mxu1 %v2699_v1 }
  0x77   : > { %2387 = vmatprep.mubr.msk.bf16.mxu0 %vm554_vm0, %v2370_v63  ;;  %2429 = vmatprep.mubr.msk.bf16.mxu1 %vm554_vm0, %v2412_v59  ;;  %v2657_v63 = vld [vmem:[%s3613_s1 + $0x180] sm:$0xff]   ;;  %v3363_v56 = vsel %vm3043_vm6, %v2199_v2, %v419_v18 }
  0x79   : > { %1293 = vmatpush1.bf16.msra.mxu0 %v2653_v44  ;;  %1473 = vmatpush1.bf16.msra.mxu1 %v2654_v6  ;;  %v2670_v44 = vld [vmem:[%s3613_s1 + $0x240] sm:$0xff]   ;;  %v2672_v6 = vld [vmem:[%s3613_s1 + $0x238] sm:$0xff]  }
  0x7a   : > { %1306 = vmatprep.subr.bf16.mxu0 %v2699_v1  ;;  %1486 = vmatprep.subr.bf16.mxu1 %v2699_v1 }
  0x7d   : > { %1307 = vmatpush2.bf16.msra.mxu0 %v2655_v0  ;;  %1487 = vmatpush2.bf16.msra.mxu1 %v2656_v4  ;;  %v2675_v0 = vld [vmem:[%s3613_s1 + $0x228] sm:$0xff]   ;;  %v2676_v4 = vld [vmem:[%s3613_s1 + $0x278] sm:$0xff]  }
  0x7e   : > { %1308 = vmatprep.subr.bf16.mxu0 %v2699_v1  ;;  %1488 = vmatprep.subr.bf16.mxu1 %v2699_v1 }
  0x81   : > { %1309 = vmatpush2.bf16.msra.mxu0 %v2657_v63  ;;  %1489 = vmatpush2.bf16.msra.mxu1 %v2658_v10  ;;  %v3427_v63 = vld [vmem:[%s2779_s14 + $0x90] sm:$0xff]  ;;  %v2679_v10 = vld [vmem:[%s3613_s1 + $0x2b8] sm:$0xff]  }
  0x82   : > { %1620 = vmatprep.subr.bf16.mxu0 %v2699_v1  ;;  %1782 = vmatprep.subr.bf16.mxu1 %v2699_v1  ;;  %v349_v13 = vshrl.u32 %v3427_v63, 16  ;;  %v352_v20 = vshll.u32 %v3427_v63, 16 }
  0x84   : > { %1311 = vmatmul.mubr.bf16.vlgmr.msra.gmra.mxu0 %v2369_v58  ;;  %1491 = vmatmul.mubr.bf16.vlgmr.msra.gmra.mxu1 %v2411_v53  ;;  %v344_v58 = vshll.u32 %v216_v23, 16  ;;  %v2680_v53 = vld [vmem:[%s3613_s1 + $0x2b0] sm:$0xff]   ;;  %v2689_v23 = vld [vmem:[%s3613_s1 + $0x2c8] sm:$0xff]  }
  0x85   : > { %1621 = vmatpush1.bf16.msra.mxu0 %v2659_v5  ;;  %1783 = vmatpush1.bf16.msra.mxu1 %v2660_v21  ;;  %v351_v5 = vrot.slane %v349_v13, 4  ;;  %v354_v21 = vrot.slane %v352_v20, 5 }
  0x86   : > { %1622 = vmatprep.subr.bf16.mxu0 %v2699_v1  ;;  %1784 = vmatprep.subr.bf16.mxu1 %v2699_v1  ;;  %v346_v49 = vrot.slane %v344_v58, 5 }
  0x87   : > { %2388 = vmatprep.mubr.msk.bf16.mxu0 %vm554_vm0, %v2372_v25  ;;  %2430 = vmatprep.mubr.msk.bf16.mxu1 %vm554_vm0, %v2414_v57  ;;  %v2416_v25 = vcombine.high %v3172_v3, %v3212_v24  ;;  %v2418_v3 = vcombine.high %v3216_v31, %v3363_v56  ;;  %v2669_v24 = vld [vmem:[%s3613_s1 + $0x1f0] sm:$0xff]   ;;  %v3444_v57 = vld [vmem:[%s2779_s14 + $0x98] sm:$0x11] }
  0x88   : > { %v3354_v50 = vsel %vm2836_vm3, %v342_v42, %v346_v49  ;;  %v358_v37 = vshll.u32 %v3444_v57, 16  ;;  %v423_v55 = vrot.slane %v3444_v57, 5 }
  0x89   : > { %1623 = vmatpush1.bf16.msra.mxu0 %v2661_v43  ;;  %1785 = vmatpush1.bf16.msra.mxu1 %v2662_v52  ;;  %v2376_v59 = vcombine.high %v3011_v28, %v3354_v50  ;;  %v2375_v62 = vcombine.low %v3011_v28, %v3354_v50  ;;  %v2673_v28 = vld [vmem:[%s3613_s1 + $0x1e0] sm:$0xff]   ;;  %v2454_v43 = vcombine.high %v3221_v38, %v3427_v63  ;;  %v2200_v52 = vrot.slane %v3427_v63, 9 }
  0x8a   : > { %1624 = vmatprep.subr.bf16.mxu0 %v2699_v1  ;;  %1786 = vmatprep.subr.bf16.mxu1 %v2699_v1  ;;  %v360_v22 = vrot.slane %v358_v37, 5 }
  0x8c   : > { %1319 = vmatmul.mubr.bf16.gmra.mxu0 %v2371_v29  ;;  %1499 = vmatmul.mubr.bf16.gmra.mxu1 %v2413_v40  ;;  %v2667_v29 = vld [vmem:[%s3613_s1 + $0x1f8] sm:$0xff]  }
  0x8d   : > { %1625 = vmatpush1.bf16.msra.mxu0 %v2663_v19  ;;  %1787 = vmatpush1.bf16.msra.mxu1 %v2664_v7 }
  0x8e   : > { %1626 = vmatprep.subr.bf16.mxu0 %v2699_v1  ;;  %1788 = vmatprep.subr.bf16.mxu1 %v2699_v1 }
  0x8f   : > { %2389 = vmatprep.mubr.msk.bf16.mxu0 %vm554_vm0, %v2374_v30  ;;  %2431 = vmatprep.mubr.msk.bf16.mxu1 %vm554_vm0, %v2416_v25  ;;  %v2668_v30 = vld [vmem:[%s3613_s1 + $0x248] sm:$0xff]  }
  0x91   : > { %1627 = vmatpush1.bf16.msra.mxu0 %v2665_v54  ;;  %1789 = vmatpush1.bf16.msra.mxu1 %v2666_v32 }
  0x92   : > { %1628 = vmatprep.subr.bf16.mxu0 %v2699_v1  ;;  %1790 = vmatprep.subr.bf16.mxu1 %v2699_v1 }
  0x94   : > { %1327 = vmatmul.mubr.bf16.gmra.mxu0 %v2373_v35  ;;  %1507 = vmatmul.mubr.bf16.gmra.mxu1 %v2415_v51  ;;  %v2417_v35 = vcombine.low %v3216_v31, %v3363_v56  ;;  %v2674_v31 = vld [vmem:[%s3613_s1 + $0x230] sm:$0xff]  }
  0x95   : > { %1629 = vmatpush1.bf16.msra.mxu0 %v2667_v29  ;;  %1791 = vmatpush1.bf16.msra.mxu1 %v2668_v30 }
  0x96   : > { %1630 = vmatprep.subr.bf16.mxu0 %v2699_v1  ;;  %1792 = vmatprep.subr.bf16.mxu1 %v2699_v1 }
  0x97   : > { %2390 = vmatprep.mubr.msk.bf16.mxu0 %vm554_vm0, %v2376_v59  ;;  %2432 = vmatprep.mubr.msk.bf16.mxu1 %vm554_vm0, %v2418_v3 }
  0x99   : > { %1631 = vmatpush1.bf16.msra.mxu0 %v2669_v24  ;;  %1793 = vmatpush1.bf16.msra.mxu1 %v2670_v44 }
  0x9a   : > { %1632 = vmatprep.subr.bf16.mxu0 %v2699_v1  ;;  %1794 = vmatprep.subr.bf16.mxu1 %v2699_v1 }
  0x9c   : > { %1335 = vmatmul.mubr.bf16.gmra.mxu0 %v2375_v62  ;;  %1515 = vmatmul.mubr.bf16.gmra.mxu1 %v2417_v35 }
  0x9d   : > { %1633 = vmatpush1.bf16.msra.mxu0 %v2671_v26  ;;  %1795 = vmatpush1.bf16.msra.mxu1 %v2672_v6 }
  0x9e   : > { %1634 = vmatprep.subr.bf16.mxu0 %v2699_v1  ;;  %1796 = vmatprep.subr.bf16.mxu1 %v2699_v1 }
  0x9f   : > { %2465 = vmatprep.mubr.msk.bf16.mxu0 %vm554_vm0, %v2920_v33  ;;  %2501 = vmatprep.mubr.msk.bf16.mxu1 %vm554_vm0, %v2927_v36  ;;  %v2677_v33 = vld [vmem:[%s3613_s1 + $0x220] sm:$0xff]   ;;  %v2678_v36 = vld [vmem:[%s3613_s1 + $0x270] sm:$0xff]  }
  0xa1   : > { %1635 = vmatpush1.bf16.msra.mxu0 %v2673_v28  ;;  %1797 = vmatpush1.bf16.msra.mxu1 %v2674_v31 }
  0xa2   : > { %1648 = vmatprep.subr.bf16.mxu0 %v2699_v1  ;;  %1810 = vmatprep.subr.bf16.mxu1 %v2699_v1 }
  0xa5   : > { %1649 = vmatpush2.bf16.msra.mxu0 %v2675_v0  ;;  %1811 = vmatpush2.bf16.msra.mxu1 %v2676_v4 }
  0xa6   : > { %1650 = vmatprep.subr.bf16.mxu0 %v2699_v1  ;;  %1812 = vmatprep.subr.bf16.mxu1 %v2699_v1 }
  0xa9   : > { %1651 = vmatpush2.bf16.msra.mxu0 %v2677_v33  ;;  %1813 = vmatpush2.bf16.msra.mxu1 %v2678_v36 }
  0xaa   : > { %1944 = vmatprep.subr.bf16.mxu0 %v2699_v1  ;;  %2553 = vmatprep.subr.bf16.mxu1 %v2699_v1 }
  0xac   : > { %1653 = vmatmul.mubr.bf16.vlgmr.msra.gmra.mxu0 %v2969_v61  ;;  %1815 = vmatmul.mubr.bf16.vlgmr.msra.gmra.mxu1 %v2932_v39  ;;  %v2681_v39 = vld [vmem:[%s3613_s1 + $0x2a8] sm:$0xff]   ;;  %v355_v61 = vor.u32 %v354_v21, %v351_v5 }
  0xad   : > { %1945 = vmatpush1.bf16.msra.mxu0 %v2679_v10  ;;  %2563 = vmatpush1.bf16.msra.mxu1 %v2679_v10 }
  0xae   : > { %1946 = vmatprep.subr.bf16.mxu0 %v2699_v1  ;;  %2554 = vmatprep.subr.bf16.mxu1 %v2699_v1 }
  0xaf   : > { %2466 = vmatprep.mubr.msk.bf16.mxu0 %vm554_vm0, %v2984_v12  ;;  %2502 = vmatprep.mubr.msk.bf16.mxu1 %vm554_vm0, %v2979_v8  ;;  %v2682_v8 = vld [vmem:[%s3613_s1 + $0x2a0] sm:$0xff]   ;;  %v356_v12 = vrot.slane %v355_v61, 4 }
  0xb1   : > { %1947 = vmatpush1.bf16.msra.mxu0 %v2680_v53  ;;  %2564 = vmatpush1.bf16.msra.mxu1 %v2680_v53 }
  0xb2   : > { %1948 = vmatprep.subr.bf16.mxu0 %v2699_v1  ;;  %2555 = vmatprep.subr.bf16.mxu1 %v2699_v1 }
  0xb4   : > { %1661 = vmatmul.mubr.bf16.gmra.mxu0 %v3022_v34  ;;  %1823 = vmatmul.mubr.bf16.gmra.mxu1 %v3007_v27  ;;  %v2683_v27 = vld [vmem:[%s3613_s1 + $0x298] sm:$0xff]   ;;  %v361_v34 = vsel %vm2836_vm3, %v356_v12, %v360_v22 }
  0xb5   : > { %1949 = vmatpush1.bf16.msra.mxu0 %v2681_v39  ;;  %2565 = vmatpush1.bf16.msra.mxu1 %v2681_v39 }
  0xb6   : > { %1950 = vmatprep.subr.bf16.mxu0 %v2699_v1  ;;  %2556 = vmatprep.subr.bf16.mxu1 %v2699_v1 }
  0xb7   : > { %2467 = vmatprep.mubr.msk.bf16.mxu0 %vm554_vm0, %v3040_v47  ;;  %2503 = vmatprep.mubr.msk.bf16.mxu1 %vm554_vm0, %v3035_v45  ;;  %v2490_v45 = vcombine.high %v3354_v50, %v361_v34  ;;  %v2453_v47 = vcombine.low %v3221_v38, %v3427_v63  ;;  %v2688_v38 = vld [vmem:[%s3613_s1 + $0x280] sm:$0xff]  }
  0xb9   : > { %1951 = vmatpush1.bf16.msra.mxu0 %v2682_v8  ;;  %2566 = vmatpush1.bf16.msra.mxu1 %v2682_v8 }
  0xba   : > { %1952 = vmatprep.subr.bf16.mxu0 %v2699_v1  ;;  %2557 = vmatprep.subr.bf16.mxu1 %v2699_v1 }
  0xbc   : > { %1669 = vmatmul.mubr.bf16.gmra.mxu0 %v3077_v60  ;;  %1831 = vmatmul.mubr.bf16.gmra.mxu1 %v3064_v14  ;;  %v2687_v14 = vld [vmem:[%s3613_s1 + $0x288] sm:$0xff]   ;;  %v2489_v60 = vcombine.low %v3354_v50, %v361_v34 }
  0xbd   : > { %1953 = vmatpush1.bf16.msra.mxu0 %v2683_v27  ;;  %2567 = vmatpush1.bf16.msra.mxu1 %v2683_v27 }
  0xbe   : > { %1954 = vmatprep.subr.bf16.mxu0 %v2699_v1  ;;  %2558 = vmatprep.subr.bf16.mxu1 %v2699_v1 }
  0xbf   : > { %2468 = vmatprep.mubr.msk.bf16.mxu0 %vm554_vm0, %v2454_v43  ;;  %2504 = vmatprep.mubr.msk.bf16.mxu1 %vm554_vm0, %v2490_v45 }
  0xc1   : > { %1955 = vmatpush1.bf16.msra.mxu0 %v2684_v41  ;;  %2568 = vmatpush1.bf16.msra.mxu1 %v2684_v41 }
  0xc2   : > { %1956 = vmatprep.subr.bf16.mxu0 %v2699_v1  ;;  %2559 = vmatprep.subr.bf16.mxu1 %v2699_v1 }
  0xc4   : > { %1677 = vmatmul.mubr.bf16.gmra.mxu0 %v2453_v47  ;;  %1839 = vmatmul.mubr.bf16.gmra.mxu1 %v2489_v60 }
  0xc5   : > { %1957 = vmatpush1.bf16.msra.mxu0 %v2687_v14  ;;  %2569 = vmatpush1.bf16.msra.mxu1 %v2687_v14 }
  0xc6   : > { %1958 = vmatprep.subr.bf16.mxu0 %v2699_v1  ;;  %2560 = vmatprep.subr.bf16.mxu1 %v2699_v1 }
  0xc7   : > { %2537 = vmatprep.mubr.msk.bf16.mxu0 %vm554_vm0, %v3140_v17  ;;  %2539 = vmatprep.mubr.msk.bf16.mxu1 %vm554_vm0, %v3230_v15  ;;  %v2690_v17 = vld [vmem:[%s3613_s1 + $0x2c0] sm:$0xff]   ;;  %v424_v15 = vsel %vm3043_vm6, %v2200_v52, %v423_v55 }
  0xc8   : > { %v2526_v58 = vcombine.high %v3363_v56, %v424_v15  ;;  %v2525_v19 = vcombine.low %v3363_v56, %v424_v15 }
  0xc9   : > { %1959 = vmatpush1.bf16.msra.mxu0 %v2688_v38  ;;  %2570 = vmatpush1.bf16.msra.mxu1 %v2688_v38 }
  0xca   : > { %1972 = vmatprep.subr.bf16.mxu0 %v2699_v1  ;;  %2561 = vmatprep.subr.bf16.mxu1 %v2699_v1 }
  0xcd   : > { %1973 = vmatpush2.bf16.msra.mxu0 %v2689_v23  ;;  %2571 = vmatpush2.bf16.msra.mxu1 %v2689_v23 }
  0xce   : > { %1974 = vmatprep.subr.bf16.mxu0 %v2699_v1  ;;  %2562 = vmatprep.subr.bf16.mxu1 %v2699_v1 }
  0xd1   : > { %1975 = vmatpush2.bf16.msra.mxu0 %v2690_v17  ;;  %2572 = vmatpush2.bf16.msra.mxu1 %v2690_v17 }
  0xd4   : > { %1977 = vmatmul.mubr.bf16.vlgmr.msra.gmra.mxu0 %v3160_v9  ;;  %1993 = vmatmul.mubr.bf16.vlgmr.msra.gmra.mxu1 %v3247_v16 }
  0xd5   : > { %2538 = vmatprep.mubr.msk.bf16.mxu0 %vm554_vm0, %v3183_v11  ;;  %2540 = vmatprep.mubr.msk.bf16.mxu1 %vm554_vm0, %v2526_v58 }
  0xdc   : > { %1985 = vmatmul.mubr.bf16.gmra.mxu0 %v3204_v46  ;;  %2001 = vmatmul.mubr.bf16.gmra.mxu1 %v2525_v19 }
  0xf4   : > { %v601_v48 = vpop.f32.mrf.mxu0  ;;  %v766_v40 = vpop.f32.mrf.mxu1 }
  0xf5   : > { %v767_v7 = vadd.f32 %v766_v40, %v601_v48 }
  0xf6   : > { %v603_v25 = vpop.f32.mrf.mxu0  ;;  %v768_v42 = vpop.f32.mrf.mxu1 }
  0xf8   : > { %v604_v49 = vpop.f32.mrf.mxu0  ;;  %v769_v54 = vpop.f32.mrf.mxu1 }
  0xf9   : > { %v770_v9 = vadd.f32 %v769_v54, %v604_v49 }
  0xfa   : > { %v606_v2 = vpop.f32.mrf.mxu0  ;;  %v771_v16 = vpop.f32.mrf.mxu1 }
  0xfc   : > { %v609_v18 = vpop.f32.mrf.mxu0  ;;  %v774_v32 = vpop.f32.mrf.mxu1 }
  0xfd   : > { %v775_v11 = vadd.f32 %v774_v32, %v609_v18 }
  0xfe   : > { %v611_v50 = vpop.f32.mrf.mxu0  ;;  %v776_v29 = vpop.f32.mrf.mxu1 }
 0x100   : > { %v612_v51 = vpop.f32.mrf.mxu0  ;;  %v777_v56 = vpop.f32.mrf.mxu1 }
 0x101   : > { %v778_v30 = vadd.f32 %v777_v56, %v612_v51 }
 0x102   : > { %v614_v46 = vpop.f32.mrf.mxu0  ;;  %v779_v59 = vpop.f32.mrf.mxu1 }
 0x104   : > { %v617_v3 = vpop.f32.mrf.mxu0  ;;  %v782_v24 = vpop.f32.mrf.mxu1 }
 0x105   : > { %v783_v44 = vadd.f32 %v782_v24, %v617_v3 }
 0x106   : > { %v619_v62 = vpop.f32.mrf.mxu0  ;;  %v784_v26 = vpop.f32.mrf.mxu1 }
 0x108   : > { %v620_v35 = vpop.f32.mrf.mxu0  ;;  %v785_v6 = vpop.f32.mrf.mxu1 }
 0x109   : > { %v786_v28 = vadd.f32 %v785_v6, %v620_v35 }
 0x10a   : > { %v622_v31 = vpop.f32.mrf.mxu0  ;;  %v787_v0 = vpop.f32.mrf.mxu1 }
 0x10c   : > { %v625_v4 = vpop.f32.mrf.mxu0  ;;  %v790_v33 = vpop.f32.mrf.mxu1 }
 0x10d   : > { %v791_v36 = vadd.f32 %v790_v33, %v625_v4 }
 0x10e   : > { %v627_v63 = vpop.f32.mrf.mxu0  ;;  %v792_v10 = vpop.f32.mrf.mxu1 }
 0x110   : > { %v628_v13 = vpop.f32.mrf.mxu0  ;;  %v793_v20 = vpop.f32.mrf.mxu1 }
 0x111   : > { %v794_v53 = vadd.f32 %v793_v20, %v628_v13 }
 0x112   : > { %v630_v5 = vpop.f32.mrf.mxu0  ;;  %v795_v21 = vpop.f32.mrf.mxu1 }
 0x11c   : > { %v952_v57 = vpop.f32.mrf.mxu0  ;;  %v1132_v61 = vpop.f32.mrf.mxu1 }
 0x11d   : > { %v983_v39 = vadd.f32 %v952_v57, %v767_v7 }
 0x11e   : > { %v954_v37 = vpop.f32.mrf.mxu0  ;;  %v1134_v12 = vpop.f32.mrf.mxu1 }
 0x11f   : > { %v1163_v8 = vadd.f32 %v1132_v61, %v983_v39 }
 0x120   : > { %v955_v22 = vpop.f32.mrf.mxu0  ;;  %v1135_v34 = vpop.f32.mrf.mxu1 }
 0x121   : > { %v984_v27 = vadd.f32 %v955_v22, %v770_v9 }
 0x122   : > { %v957_v43 = vpop.f32.mrf.mxu0  ;;  %v1137_v41 = vpop.f32.mrf.mxu1 }
 0x123   : > { %v1164_v45 = vadd.f32 %v1135_v34, %v984_v27 }
 0x124   : > { %v960_v47 = vpop.f32.mrf.mxu0  ;;  %v1140_v60 = vpop.f32.mrf.mxu1 }
 0x125   : > { %v985_v14 = vadd.f32 %v960_v47, %v775_v11 }
 0x126   : > { %v962_v38 = vpop.f32.mrf.mxu0  ;;  %v1142_v52 = vpop.f32.mrf.mxu1 }
 0x127   : > { %v1165_v23 = vadd.f32 %v1140_v60, %v985_v14 }
 0x128   : > { %v963_v55 = vpop.f32.mrf.mxu0  ;;  %v1143_v15 = vpop.f32.mrf.mxu1 }
 0x129   : > { %v986_v17 = vadd.f32 %v963_v55, %v778_v30 }
 0x12a   : > { %v965_v58 = vpop.f32.mrf.mxu0  ;;  %v1145_v48 = vpop.f32.mrf.mxu1 }
 0x12b   : > { %v1166_v19 = vadd.f32 %v1143_v15, %v986_v17 }
 0x12c   : > { %v968_v40 = vpop.f32.mrf.mxu0  ;;  %v1148_v25 = vpop.f32.mrf.mxu1 }
 0x12d   : > { %v987_v7 = vadd.f32 %v968_v40, %v783_v44 }
 0x12e   : > { %v970_v42 = vpop.f32.mrf.mxu0  ;;  %v1150_v54 = vpop.f32.mrf.mxu1 }
 0x12f   : > { %v3526_v49 = vadd.f32 %v1148_v25, %v987_v7 }
 0x130   : > { %v971_v9 = vpop.f32.mrf.mxu0  ;;  %v1151_v16 = vpop.f32.mrf.mxu1 }
 0x131   : > { %v988_v2 = vadd.f32 %v971_v9, %v786_v28 }
 0x132   : > { %v973_v18 = vpop.f32.mrf.mxu0  ;;  %v1153_v11 = vpop.f32.mrf.mxu1 }
 0x133   : > { %v3528_v32 = vadd.f32 %v1151_v16, %v988_v2 }
 0x134   : > { %v976_v50 = vpop.f32.mrf.mxu0  ;;  %v1156_v51 = vpop.f32.mrf.mxu1 }
 0x135   : > { %v989_v29 = vadd.f32 %v976_v50, %v791_v36 }
 0x136   : > { %v978_v56 = vpop.f32.mrf.mxu0  ;;  %v1158_v46 = vpop.f32.mrf.mxu1 }
 0x137   : > { %v3530_v30 = vadd.f32 %v1156_v51, %v989_v29 }
 0x138   : > { %v979_v59 = vpop.f32.mrf.mxu0  ;;  %v1159_v24 = vpop.f32.mrf.mxu1 }
 0x139   : > { %v990_v3 = vadd.f32 %v979_v59, %v794_v53 }
 0x13a   : > { %v981_v44 = vpop.f32.mrf.mxu0  ;;  %v1161_v26 = vpop.f32.mrf.mxu1 }
 0x13b   : > { %v3532_v62 = vadd.f32 %v1159_v24, %v990_v3 }
 0x144   : > { %v1312_v35 = vpop.f32.mrf.mxu0  ;;  %v1492_v28 = vpop.f32.mrf.mxu1 }
 0x145   : > { %v1343_v6 = vadd.f32 %v1312_v35, %v1163_v8 }
 0x146   : > { %v1314_v31 = vpop.f32.mrf.mxu0  ;;  %v1494_v4 = vpop.f32.mrf.mxu1 }
 0x147   : > { %v3534_v0 = vadd.f32 %v1492_v28, %v1343_v6 }
 0x148   : > { %v1315_v33 = vpop.f32.mrf.mxu0  ;;  %v1495_v63 = vpop.f32.mrf.mxu1 }
 0x149   : > { %v1344_v36 = vadd.f32 %v1315_v33, %v1164_v45 }
 0x14a   : > { %v1317_v10 = vpop.f32.mrf.mxu0  ;;  %v1497_v20 = vpop.f32.mrf.mxu1 }
 0x14b   : > { %v3536_v13 = vadd.f32 %v1495_v63, %v1344_v36 }
 0x14c   : > { %v1320_v53 = vpop.f32.mrf.mxu0  ;;  %v1500_v21 = vpop.f32.mrf.mxu1 }
 0x14d   : > { %v1345_v5 = vadd.f32 %v1320_v53, %v1165_v23  ;;  %v2107_v53 = vlaneseq }
 0x14e   : > { %v1322_v57 = vpop.f32.mrf.mxu0  ;;  %v1502_v61 = vpop.f32.mrf.mxu1 }
 0x14f   : > { %v3538_v39 = vadd.f32 %v1500_v21, %v1345_v5 }
 0x150   : > { %v1323_v37 = vpop.f32.mrf.mxu0  ;;  %v1503_v12 = vpop.f32.mrf.mxu1 }
 0x151   : > { %v1346_v8 = vadd.f32 %v1323_v37, %v1166_v19  ;;  %v2104_v37 = vld [vmem:[%s3615_s3] sm:$0x1] }
 0x152   : > { %v1325_v22 = vpop.f32.mrf.mxu0  ;;  %v1505_v34 = vpop.f32.mrf.mxu1  ;;  %vm2105_vm7 = vcmp.gt.f32.partialorder %v2104_v37, 0.5 }
 0x153   : > { %v3540_v27 = vadd.f32 %v1503_v12, %v1346_v8  ;;  %v2108_v8 = vshrl.u32 %v2107_v53, 7 }
 0x154   : > { %v1328_v43 = vpop.f32.mrf.mxu0  ;;  %v1508_v45 = vpop.f32.mrf.mxu1 }
 0x155   : > { %v1347_v21 = vadd.f32 %v1328_v43, %v3526_v49 }
 0x156   : > { %v1330_v41 = vpop.f32.mrf.mxu0  ;;  %v1510_v47 = vpop.f32.mrf.mxu1 }
 0x157   : > { %v1527_v12 = vadd.f32 %v1508_v45, %v1347_v21  ;;  %v2109_v47 = vsub.s32 0, %v2108_v8 }
 0x158   : > { %v1331_v14 = vpop.f32.mrf.mxu0  ;;  %v1511_v60 = vpop.f32.mrf.mxu1 }
 0x159   : > { %v1348_v22 = vadd.f32 %v1331_v14, %v3528_v32  ;;  %v3555_v32 = vld [vmem:[%s3614_s2] ss:$0 sm:$0xff] }
 0x15a   : > { %v1333_v38 = vpop.f32.mrf.mxu0  ;;  %v1513_v23 = vpop.f32.mrf.mxu1 }
 0x15b   : > { %v2106_v23 = vsel %vm2105_vm7, 1, %v2699_v1  ;;  %v1528_v49 = vadd.f32 %v1511_v60, %v1348_v22 }
 0x15c   : > { %v1336_v52 = vpop.f32.mrf.mxu0  ;;  %v1516_v55 = vpop.f32.mrf.mxu1 }
 0x15d   : > { %v1349_v38 = vadd.f32 %v1336_v52, %v3530_v30 }
 0x15e   : > { %v1338_v17 = vpop.f32.mrf.mxu0  ;;  %v1518_v15 = vpop.f32.mrf.mxu1 }
 0x15f   : > { %v1529_v14 = vadd.f32 %v1516_v55, %v1349_v38 }
 0x160   : > { %v1339_v58 = vpop.f32.mrf.mxu0  ;;  %v1519_v48 = vpop.f32.mrf.mxu1 }
 0x161   : > { %v1350_v43 = vadd.f32 %v1339_v58, %v3532_v62 }
 0x162   : > { %v1341_v19 = vpop.f32.mrf.mxu0  ;;  %v1521_v40 = vpop.f32.mrf.mxu1 }
 0x163   : > { %v1530_v52 = vadd.f32 %v1519_v48, %v1350_v43 }
 0x16c   : > { %v1654_v7 = vpop.f32.mrf.mxu0  ;;  %v1816_v25 = vpop.f32.mrf.mxu1 }
 0x16d   : > { %v1685_v34 = vadd.f32 %v1654_v7, %v3534_v0  ;;  %v3557_v0 = vrot.slane %v2106_v23, %v2109_v47 }
 0x16e   : > { %v1656_v42 = vpop.f32.mrf.mxu0  ;;  %v1818_v54 = vpop.f32.mrf.mxu1 }
 0x16f   : > { %v1847_v17 = vadd.f32 %v1816_v25, %v1685_v34  ;;  %vm2111_vm8 = vcmp.eq.s32.totalorder %v3557_v0, 1 }
 0x170   : > { %v1657_v9 = vpop.f32.mrf.mxu0  ;;  %v1819_v2 = vpop.f32.mrf.mxu1 }
 0x171   : > { %v1686_v15 = vadd.f32 %v1657_v9, %v3536_v13 }
 0x172   : > { %v1659_v16 = vpop.f32.mrf.mxu0  ;;  %v1821_v18 = vpop.f32.mrf.mxu1 }
 0x173   : > { %v1848_v7 = vadd.f32 %v1819_v2, %v1686_v15 }
 0x174   : > { %v1662_v11 = vpop.f32.mrf.mxu0  ;;  %v1824_v50 = vpop.f32.mrf.mxu1 }
 0x175   : > { %v1687_v30 = vadd.f32 %v1662_v11, %v3538_v39 }
 0x176   : > { %v1664_v29 = vpop.f32.mrf.mxu0  ;;  %v1826_v51 = vpop.f32.mrf.mxu1 }
 0x177   : > { %v1849_v39 = vadd.f32 %v1824_v50, %v1687_v30 }
 0x178   : > { %v1665_v56 = vpop.f32.mrf.mxu0  ;;  %v1827_v46 = vpop.f32.mrf.mxu1 }
 0x179   : > { %v1688_v62 = vadd.f32 %v1665_v56, %v3540_v27 }
 0x17a   : > { %v1667_v59 = vpop.f32.mrf.mxu0  ;;  %v1829_v3 = vpop.f32.mrf.mxu1 }
 0x17b   : > { %v3564_v27 = vadd.f32 %v1827_v46, %v1688_v62 }
 0x17c   : > { %v1670_v24 = vpop.f32.mrf.mxu0  ;;  %v1832_v44 = vpop.f32.mrf.mxu1 }
 0x17d   : > { %v1689_v41 = vadd.f32 %v1670_v24, %v1527_v12 }
 0x17e   : > { %v1672_v26 = vpop.f32.mrf.mxu0  ;;  %v1834_v35 = vpop.f32.mrf.mxu1 }
 0x17f   : > { %v1851_v19 = vadd.f32 %v1832_v44, %v1689_v41 }
 0x180   : > { %v1673_v6 = vpop.f32.mrf.mxu0  ;;  %v1835_v28 = vpop.f32.mrf.mxu1 }
 0x181   : > { %v1690_v40 = vadd.f32 %v1673_v6, %v1528_v49 }
 0x182   : > { %v1675_v31 = vpop.f32.mrf.mxu0  ;;  %v1837_v4 = vpop.f32.mrf.mxu1 }
 0x183   : > { %v1852_v9 = vadd.f32 %v1835_v28, %v1690_v40 }
 0x184   : > { %v1678_v33 = vpop.f32.mrf.mxu0  ;;  %v1840_v36 = vpop.f32.mrf.mxu1 }
 0x185   : > { %v1691_v25 = vadd.f32 %v1678_v33, %v1529_v14 }
 0x186   : > { %v1680_v63 = vpop.f32.mrf.mxu0  ;;  %v1842_v10 = vpop.f32.mrf.mxu1 }
 0x187   : > { %v1853_v24 = vadd.f32 %v1840_v36, %v1691_v25 }
 0x188   : > { %v1681_v20 = vpop.f32.mrf.mxu0  ;;  %v1843_v5 = vpop.f32.mrf.mxu1 }
 0x189   : > { %v1692_v16 = vadd.f32 %v1681_v20, %v1530_v52 }
 0x18a   : > { %v1683_v57 = vpop.f32.mrf.mxu0  ;;  %v1845_v61 = vpop.f32.mrf.mxu1 }
 0x18b   : > { %v1854_v28 = vadd.f32 %v1843_v5, %v1692_v16 }
 0x194   : > { %v1978_v45 = vpop.f32.mrf.mxu0  ;;  %v1994_v60 = vpop.f32.mrf.mxu1 }
 0x195   : > { %v2009_v1 = vadd.f32 %v1978_v45, %v1847_v17  ;;  %v2013_v58 = vadd.f32 %v1994_v60, %v1851_v19 }
 0x196   : > { %v1980_v13 = vpop.f32.mrf.mxu0  ;;  %v1996_v54 = vpop.f32.mrf.mxu1 }
 0x197   : > { %v2024_v42 = vadd.f32 %v3555_v32, %v2009_v1  ;;  %v2028_v55 = vadd.f32 %v3555_v32, %v2013_v58 }
 0x198   : > { %v1981_v18 = vpop.f32.mrf.mxu0  ;;  %v1997_v51 = vpop.f32.mrf.mxu1 }
 0x199   : > { %v2542_v11 = vadd.f32 -1.0, %v2024_v42  ;;  %v2072_v29 = vsub.f32 -1.0, %v2024_v42  ;;  %v2010_v48 = vadd.f32 %v1981_v18, %v1848_v7  ;;  %v2546_v56 = vadd.f32 -1.0, %v2028_v55 }
 0x19a   : > { %v2076_v2 = vsub.f32 -1.0, %v2028_v55  ;;  %v2014_v59 = vadd.f32 %v1997_v51, %v1852_v9  ;;  %v1983_v3 = vpop.f32.mrf.mxu0  ;;  %v1999_v6 = vpop.f32.mrf.mxu1  ;;  %v2032_v46 = vmax.f32 %v2024_v42, 0.0  ;;  %v2036_v10 = vmax.f32 %v2028_v55, 0.0 }
 0x19b   : > { %v2048_v44 = vmul.f32 0.5, %v2542_v11  ;;  %v2080_v26 = vmul.f32 0.5, %v2072_v29  ;;  %v2025_v35 = vadd.f32 %v3555_v32, %v2010_v48  ;;  %v2052_v31 = vmul.f32 0.5, %v2546_v56 }
 0x19c   : > { %v2084_v50 = vmul.f32 0.5, %v2076_v2  ;;  %v3568_v4 = vadd.f32 %v3555_v32, %v2014_v59  ;;  %v1986_v33 = vpop.f32.mrf.mxu0  ;;  %v2002_v53 = vpop.f32.mrf.mxu1 }
 0x19d   : > { %v2056_v63 = vmax.f32 %v2048_v44, 0.0  ;;  %v2543_v20 = vadd.f32 -1.0, %v2025_v35  ;;  %v2088_v21 = vmax.f32 %v2080_v26, 0.0  ;;  %v2060_v36 = vmax.f32 %v2052_v31, 0.0 }
 0x19e   : > { %v2092_v57 = vmax.f32 %v2084_v50, 0.0  ;;  %v2073_v61 = vsub.f32 -1.0, %v2025_v35  ;;  %v1988_v37 = vpop.f32.mrf.mxu0  ;;  %v2547_v5 = vadd.f32 -1.0, %v3568_v4  ;;  %v2077_v22 = vsub.f32 -1.0, %v3568_v4  ;;  %v2004_v34 = vpop.f32.mrf.mxu1 }
 0x19f   : > { %v2064_v8 = vadd.f32 %v2056_v63, %v2024_v42  ;;  %v2049_v12 = vmul.f32 0.5, %v2543_v20  ;;  %v2068_v41 = vadd.f32 %v2060_v36, %v2028_v55  ;;  %v2011_v38 = vadd.f32 %v1986_v33, %v1849_v39 }
 0x1a0   : > { %v2081_v47 = vmul.f32 0.5, %v2073_v61  ;;  %v2015_v23 = vadd.f32 %v2002_v53, %v1853_v24  ;;  %v1989_v49 = vpop.f32.mrf.mxu0  ;;  %v2053_v15 = vmul.f32 0.5, %v2547_v5  ;;  %v2085_v19 = vmul.f32 0.5, %v2077_v22  ;;  %v2005_v40 = vpop.f32.mrf.mxu1 }
 0x1a1   : > { %v2096_v43 = vadd.f32 %v2088_v21, %v2064_v8  ;;  %v2057_v17 = vmax.f32 %v2049_v12, 0.0  ;;  %v2100_v45 = vadd.f32 %v2092_v57, %v2068_v41  ;;  %v2033_v14 = vmax.f32 %v2025_v35, 0.0 }
 0x1a2   : > { %v2026_v30 = vadd.f32 %v3555_v32, %v2011_v38  ;;  %v2030_v1 = vadd.f32 %v3555_v32, %v2015_v23  ;;  %v1991_v60 = vpop.f32.mrf.mxu0  ;;  %v2089_v58 = vmax.f32 %v2081_v47, 0.0  ;;  %v2061_v13 = vmax.f32 %v2053_v15, 0.0  ;;  %v2007_v7 = vpop.f32.mrf.mxu1 }
 0x1a3   : > { %v2112_v52 = vsel %vm2111_vm8, %v2032_v46, %v2096_v43  ;;  %v2065_v62 = vadd.f32 %v2057_v17, %v2025_v35  ;;  %v2116_v25 = vsel %vm2111_vm8, %v2036_v10, %v2100_v45  ;;  %v2037_v42 = vmax.f32 %v3568_v4, 0.0 }
 0x1a4   : > { %2120 = vst [vmem:[%s3576_s16] sm:$0xff] %v2112_v52  ;;  %v2544_v54 = vadd.f32 -1.0, %v2026_v30  ;;  %v2074_v9 = vsub.f32 -1.0, %v2026_v30  ;;  %2124 = vst [vmem:[%s3576_s16 + $0x20] sm:$0xff] %v2116_v25  ;;  %v2069_v55 = vadd.f32 %v2061_v13, %v3568_v4  ;;  %v2093_v18 = vmax.f32 %v2085_v19, 0.0 }
 0x1a5   : > { %v2097_v16 = vadd.f32 %v2089_v58, %v2065_v62  ;;  %v2548_v39 = vadd.f32 -1.0, %v2030_v1  ;;  %v2078_v48 = vsub.f32 -1.0, %v2030_v1  ;;  %v2012_v51 = vadd.f32 %v1989_v49, %v3564_v27 }
 0x1a6   : > { %v2050_v11 = vmul.f32 0.5, %v2544_v54  ;;  %v2082_v29 = vmul.f32 0.5, %v2074_v9  ;;  %v2101_v2 = vadd.f32 %v2093_v18, %v2069_v55  ;;  %v2016_v3 = vadd.f32 %v2005_v40, %v1854_v28 }
 0x1a7   : > { %v2113_v56 = vsel %vm2111_vm8, %v2033_v14, %v2097_v16  ;;  %v2054_v59 = vmul.f32 0.5, %v2548_v39  ;;  %v2086_v44 = vmul.f32 0.5, %v2078_v48  ;;  %v2027_v26 = vadd.f32 %v3555_v32, %v2012_v51 }
 0x1a8   : > { %2121 = vst [vmem:[%s3576_s16 + $0x8] sm:$0xff] %v2113_v56  ;;  %v2058_v24 = vmax.f32 %v2050_v11, 0.0  ;;  %v2117_v35 = vsel %vm2111_vm8, %v2037_v42, %v2101_v2  ;;  %v2031_v31 = vadd.f32 %v3555_v32, %v2016_v3  ;;  %v2090_v27 = vmax.f32 %v2082_v29, 0.0 }
 0x1a9   : > { %v2062_v6 = vmax.f32 %v2054_v59, 0.0  ;;  %2125 = vst [vmem:[%s3576_s16 + $0x28] sm:$0xff] %v2117_v35  ;;  %v2545_v4 = vadd.f32 -1.0, %v2027_v26  ;;  %v2094_v46 = vmax.f32 %v2086_v44, 0.0  ;;  %v2075_v63 = vsub.f32 -1.0, %v2027_v26 }
 0x1aa   : > { %v2066_v50 = vadd.f32 %v2058_v24, %v2026_v30  ;;  %v2549_v28 = vadd.f32 -1.0, %v2031_v31  ;;  %v2034_v10 = vmax.f32 %v2026_v30, 0.0  ;;  %v2079_v21 = vsub.f32 -1.0, %v2031_v31 }
 0x1ab   : > { %v2070_v33 = vadd.f32 %v2062_v6, %v2030_v1  ;;  %v2051_v53 = vmul.f32 0.5, %v2545_v4  ;;  %v2038_v36 = vmax.f32 %v2030_v1, 0.0  ;;  %v2083_v61 = vmul.f32 0.5, %v2075_v63 }
 0x1ac   : > { %v2098_v20 = vadd.f32 %v2090_v27, %v2066_v50  ;;  %v2055_v37 = vmul.f32 0.5, %v2549_v28  ;;  %v2087_v12 = vmul.f32 0.5, %v2079_v21  ;;  %v2035_v23 = vmax.f32 %v2027_v26, 0.0 }
 0x1ad   : > { %v2102_v57 = vadd.f32 %v2094_v46, %v2070_v33  ;;  %v2059_v8 = vmax.f32 %v2051_v53, 0.0  ;;  %v2091_v41 = vmax.f32 %v2083_v61, 0.0  ;;  %v2039_v43 = vmax.f32 %v2031_v31, 0.0 }
 0x1ae   : > { %v2114_v32 = vsel %vm2111_vm8, %v2034_v10, %v2098_v20  ;;  %v2063_v22 = vmax.f32 %v2055_v37, 0.0  ;;  %v2095_v38 = vmax.f32 %v2087_v12, 0.0 }
 0x1af   : > { %2122 = vst [vmem:[%s3576_s16 + $0x10] sm:$0xff] %v2114_v32  ;;  %v2118_v5 = vsel %vm2111_vm8, %v2038_v36, %v2102_v57  ;;  %v2067_v34 = vadd.f32 %v2059_v8, %v2027_v26 }
 0x1b0   : > { %2126 = vst [vmem:[%s3576_s16 + $0x30] sm:$0xff] %v2118_v5  ;;  %v2071_v47 = vadd.f32 %v2063_v22, %v2031_v31 }
 0x1b1   : > { %v2099_v49 = vadd.f32 %v2091_v41, %v2067_v34 }
 0x1b2   : > { %v2103_v17 = vadd.f32 %v2095_v38, %v2071_v47 }
 0x1b3   : > { %v2115_v15 = vsel %vm2111_vm8, %v2035_v23, %v2099_v49 }
 0x1b4   : > { %2123 = vst [vmem:[%s3576_s16 + $0x18] sm:$0xff] %v2115_v15  ;;  %v2119_v19 = vsel %vm2111_vm8, %v2039_v43, %v2103_v17 }
 0x1b5   : > { %2127 = vst [vmem:[%s3576_s16 + $0x38] sm:$0xff] %v2119_v19 }
 0x1b6 PF: > { %s14_s15 = sadd.s32 1, %s2697_s15  }
 0x1b7   : > { %p11_p4 = scmp.ge.s32.totalorder %s14_s15, 4  }
 0x1b9   :  { %13 = sbr.rel (!%p11_p4) target bundleno = 1 (0x1), region = 74 }

</bundles_post_ra>
